<compile_context>
chip_gen: v6e
topology: v6e:2x2x1
jax: 0.10.0
libtpu: 0.0.40
codegen_flags: <defaults>
</compile_context>

<pallas_src>
import math

import jax
import jax.numpy as jnp
import numpy as np
from jax.experimental import pallas as pl
from jax.experimental.pallas import tpu as pltpu

KH, KW = 3, 3      # conv kernel (3x3, padding=1)
LANE = 128         # TPU lane width
_OFF = 8           # sublane-aligned column offset of the image interior in the padded scratch
_EPS = 1e-5


def _round_up(x, m):
    return (x + m - 1) // m * m


def _fused_ode_kernel(t_ref, x_ref,
                      w1_ref, win1_ref, b1_ref, g1_ref, be1_ref,
                      w2_ref, win2_ref, b2_ref, g2_ref, be2_ref,
                      o_ref, xpad_ref, col_ref):
    """Two fused (3x3 SAME conv -> training-mode BatchNorm -> ReLU) layers.

    t_ref     : (1, 1)                f32  SMEM scalar ODE time
    x_ref     : (N, H, W, C)          f32  input (time channel folded out of the conv)
    w*_ref    : (K_PAD, C)            bf16 im2col weights, 2 taps per 128-lane slot
    win*_ref  : (H*W, C)              f32  border-aware windowed sum of time-channel taps
    b*_ref    : (1, C)                f32  conv bias
    g*/be*    : (1, C)                f32  BN gamma / beta
    o_ref     : (N, H, W, C)          f32  output
    xpad_ref  : (N, H+2, _OFF+W+1, C) f32  zero-halo padded image / h1 scratch
    col_ref   : (N*H*W, K_PAD)        bf16 im2col scratch
    """
    N, H, W, C = x_ref.shape
    M = N * H * W
    PW = xpad_ref.shape[2]
    K_PAD = col_ref.shape[1]
    NTAP = KH * KW
    t = t_ref[0, 0]
    inv_m = 1.0 / M

    # Zero only the halo the taps actually read (rows 0 / H+1, cols _OFF-1 / _OFF+W);
    # it stays zero across both layers.  The interior and every lane of col_ref are
    # fully overwritten each layer, so no full-scratch zero fill.
    zrow = jnp.zeros((N, 1, PW, C), jnp.float32)
    zcol = jnp.zeros((N, H + 2, 1, C), jnp.float32)
    xpad_ref[:, 0:1, :, :] = zrow
    xpad_ref[:, H + 1:H + 2, :, :] = zrow
    xpad_ref[:, :, _OFF - 1:_OFF, :] = zcol
    xpad_ref[:, :, _OFF + W:_OFF + W + 1, :] = zcol

    def conv_bn_relu(w_ref, win_ref, b_ref, g_ref, be_ref):
        # im2col: 9 shifted HxW windows, packed two 64-wide taps per 128-lane slot so
        # every col store is a full unmasked 128-lane store and K is only 5*128.
        # TODO(synk): 6 of 9 taps slice xpad at a non-8-aligned sublane offset (7/9),
        # which relayouts before the store; derive the +/-1 W-shifts from the aligned
        # center window with pltpu.roll (XLU) once rank-4 rolls are validated here.
        def tap_patch(tap):
            ky, kx = tap // KW, tap % KW
            c0 = _OFF - 1 + kx
            return xpad_ref[:, ky:ky + H, c0:c0 + W, :].reshape(M, C).astype(col_ref.dtype)

        for p in range(K_PAD // LANE):
            lo = tap_patch(2 * p)
            hi = (tap_patch(2 * p + 1) if 2 * p + 1 < NTAP
                  else jnp.zeros((M, C), col_ref.dtype))
            col_ref[:, p * LANE:(p + 1) * LANE] = jnp.concatenate([lo, hi], axis=1)

        # One long-K bf16 MXU matmul per layer, f32 accumulation.
        acc = jnp.dot(col_ref[...], w_ref[...],
                      preferred_element_type=jnp.float32)               # (M, C) f32
        # Conv bias + folded constant-time-channel term (per pixel, border-aware).
        bmap = b_ref[...] + t * win_ref[...]                            # (H*W, C)
        acc = (acc.reshape(N, H * W, C) + bmap[None]).reshape(M, C)
        # BatchNorm2d (training mode): biased batch stats over all N*H*W rows, eps=1e-5,
        # folded into one per-channel scale + shift.  Both sums share one lane-dense
        # 128-lane reduction.
        # TODO(synk): for large M tiles, compute this sum on the idle MXU via
        # ones(1, M) @ [acc | acc*acc], and switch to per-tile partials + finalize
        # (global stats) when the spatial grid lands.
        stacked = jnp.concatenate([acc, acc * acc], axis=1)             # (M, 2C)
        sums = jnp.sum(stacked, axis=0, keepdims=True)                  # (1, 2C)
        mean = sums[:, :C] * inv_m
        var = sums[:, C:] * inv_m - mean * mean
        scale = g_ref[...] * jax.lax.rsqrt(var + _EPS)
        shift = be_ref[...] - mean * scale
        return jnp.maximum(acc * scale + shift, 0.0)                    # (M, C) f32

    # ---- layer 1: pad the input into the VMEM scratch interior, conv+BN+ReLU -------
    xpad_ref[:, 1:H + 1, _OFF:_OFF + W, :] = x_ref[...]
    h1 = conv_bn_relu(w1_ref, win1_ref, b1_ref, g1_ref, be1_ref)

    # ---- layer 2: h1 never leaves VMEM; reuse the padded scratch (halo still zero) --
    xpad_ref[:, 1:H + 1, _OFF:_OFF + W, :] = h1.reshape(N, H, W, C)
    h2 = conv_bn_relu(w2_ref, win2_ref, b2_ref, g2_ref, be2_ref)

    o_ref[...] = h2.reshape(N, H, W, C)


# ----------------------- hoisted, t-independent preprocessing -----------------------
def _pack_conv_weights(w_hwio):
    """Pack the 65-channel HWIO conv weights for the kernel's im2col layout (bf16).

    Row block [tap*64, (tap+1)*64) holds w[ky, kx, :64, :] for tap = ky*3 + kx (two taps
    share each 128-lane slot); rows [576, 640) are zero so K is a lane multiple.
    """
    kh, kw, cin_p1, cout = w_hwio.shape
    cin = cin_p1 - 1
    k = kh * kw * cin
    k_pad = _round_up(k, LANE)
    w_sp = w_hwio[:, :, :cin, :].reshape(k, cout)
    return (jnp.zeros((k_pad, cout), w_hwio.dtype).at[:k, :].set(w_sp)
            .astype(jnp.bfloat16))


def _time_window_map(w_hwio, H, W):
    """conv of the constant time channel == t * (border-aware windowed sum of its taps)."""
    kh, kw, cin_p1, _ = w_hwio.shape
    w_t = w_hwio[:, :, cin_p1 - 1, :]                             # (3, 3, cout) time taps
    ys = jnp.arange(H)[:, None] + jnp.arange(kh)[None, :] - 1     # input row per (y, ky)
    xs = jnp.arange(W)[:, None] + jnp.arange(kw)[None, :] - 1     # input col per (x, kx)
    vh = ((ys >= 0) & (ys < H)).astype(w_hwio.dtype)              # (H, 3) tap validity
    vw = ((xs >= 0) & (xs < W)).astype(w_hwio.dtype)              # (W, 3)
    win = jnp.einsum("yi,xj,ijc->yxc", vh, vw, w_t)               # (H, W, cout)
    return win.reshape(H * W, -1)


def prepare_ode_params(params, H, W):
    """Hoist ALL t-independent preprocessing out of the per-step path (call once)."""
    return {
        "w1p": _pack_conv_weights(params["w1"]),
        "w2p": _pack_conv_weights(params["w2"]),
        "win1": _time_window_map(params["w1"], H, W),
        "win2": _time_window_map(params["w2"], H, W),
        "b1": params["b1"].reshape(1, -1), "b2": params["b2"].reshape(1, -1),
        "g1": params["g1"].reshape(1, -1), "g2": params["g2"].reshape(1, -1),
        "be1": params["be1"].reshape(1, -1), "be2": params["be2"].reshape(1, -1),
    }


# ---------------------------------- per-step path -----------------------------------
def ode_function_forward_nhwc(z_nhwc, t, prepped):
    """ODEFunction.forward on an NHWC state (fast path, no layout transposes)."""
    N, H, W, C = z_nhwc.shape
    k_pad = _round_up(KH * KW * C, LANE)
    vmem = pl.BlockSpec(memory_space=pltpu.MemorySpace.VMEM)
    smem = pl.BlockSpec(memory_space=pltpu.MemorySpace.SMEM)
    t_arr = jnp.asarray(t, jnp.float32).reshape(1, 1)
    return pl.pallas_call(
        _fused_ode_kernel,
        out_shape=jax.ShapeDtypeStruct((N, H, W, C), jnp.float32),
        in_specs=[smem] + [vmem] * 11,
        out_specs=vmem,
        scratch_shapes=[
            pltpu.VMEM((N, H + 2, _OFF + W + 1, C), jnp.float32),    # padded image / h1
            pltpu.VMEM((N * H * W, k_pad), jnp.bfloat16),            # im2col matrix
        ],
        compiler_params=pltpu.CompilerParams(vmem_limit_bytes=32 * 1024 * 1024),
    )(t_arr, z_nhwc,
      prepped["w1p"], prepped["win1"], prepped["b1"], prepped["g1"], prepped["be1"],
      prepped["w2p"], prepped["win2"], prepped["b2"], prepped["g2"], prepped["be2"])


def ode_function_forward(z_nchw, t, prepped):
    """PyTorch-facing NCHW wrapper around the NHWC fast path."""
    # TODO(synk): keep the ODE state in (flattened) NHWC between solver steps so these
    # two transposes (an HBM round trip comparable to the kernel itself) disappear.
    z = jnp.transpose(z_nchw, (0, 2, 3, 1))
    out = ode_function_forward_nhwc(z, t, prepped)
    return jnp.transpose(out, (0, 3, 1, 2))


def func_flattener_forward(z_flat, t, in_shapes, prepped):
    """FuncFlattener.forward: unflatten -> func(z, t) -> flatten (pure reshape plumbing)."""
    sizes = [int(np.prod(s)) for s in in_shapes]
    parts = jnp.split(z_flat, list(np.cumsum(sizes)[:-1]))
    z_tuple = tuple(p.reshape(s) for p, s in zip(parts, in_shapes))
    outputs = (ode_function_forward(z_tuple[0], t, prepped),)     # wrapped func (tuple in/out)
    return jnp.concatenate([o.reshape(-1) for o in outputs])


# ------------------------------ pure-JAX references ------------------------------
def _ref_block(x_nhwc, w_hwio, b, gamma, beta, conv_dtype):
    y = jax.lax.conv_general_dilated(
        x_nhwc.astype(conv_dtype), w_hwio.astype(conv_dtype),
        window_strides=(1, 1), padding="SAME",
        dimension_numbers=("NHWC", "HWIO", "NHWC"),
        preferred_element_type=jnp.float32)
    y = y + b
    mean = y.mean(axis=(0, 1, 2))
    var = ((y - mean) ** 2).mean(axis=(0, 1, 2))
    y = (y - mean) / jnp.sqrt(var + _EPS) * gamma + beta
    return jnp.maximum(y, 0.0)


def ode_function_reference(z_nchw, t, params, conv_dtype=jnp.float32):
    """Naive reference: concat the time channel, lax.conv, training-mode BN, ReLU."""
    z = jnp.transpose(z_nchw, (0, 2, 3, 1))
    N, H, W, _ = z.shape
    t_map = jnp.full((N, H, W, 1), t, dtype=z.dtype)
    h1 = _ref_block(jnp.concatenate([z, t_map], axis=-1),
                    params["w1"], params["b1"], params["g1"], params["be1"], conv_dtype)
    h2 = _ref_block(jnp.concatenate([h1, t_map], axis=-1),
                    params["w2"], params["b2"], params["g2"], params["be2"], conv_dtype)
    return jnp.transpose(h2, (0, 3, 1, 2))


if __name__ == "__main__":
    key = jax.random.PRNGKey(0)
    kz, kw1, kb1, kw2, kb2 = jax.random.split(key, 5)

    CIN, COUT = 65, 64
    bound = 1.0 / math.sqrt(CIN * KH * KW)   # PyTorch Conv2d default init bound

    params = {
        "w1": jax.random.uniform(kw1, (KH, KW, CIN, COUT), jnp.float32, -bound, bound),
        "b1": jax.random.uniform(kb1, (COUT,), jnp.float32, -bound, bound),
        "g1": jnp.ones((COUT,), jnp.float32),     # BatchNorm2d default gamma
        "be1": jnp.zeros((COUT,), jnp.float32),   # BatchNorm2d default beta
        "w2": jax.random.uniform(kw2, (KH, KW, CIN, COUT), jnp.float32, -bound, bound),
        "b2": jax.random.uniform(kb2, (COUT,), jnp.float32, -bound, bound),
        "g2": jnp.ones((COUT,), jnp.float32),
        "be2": jnp.zeros((COUT,), jnp.float32),
    }

    # Small example consistent with the module: N=2, C=64 (fixed by conv1), 8x8 spatial.
    z = jax.random.normal(kz, (2, 64, 8, 8), jnp.float32)        # NCHW like PyTorch
    t = jnp.float32(0.5)                                         # scalar ODE time

    # t-independent packing done ONCE (outside the ODE step loop).
    prepped = prepare_ode_params(params, H=8, W=8)

    in_shapes = (z.shape,)
    out_flat = jax.block_until_ready(
        func_flattener_forward(z.reshape(-1), t, in_shapes, prepped))
    out = out_flat.reshape(z.shape)

    # Semantics at matched (bf16-operand / f32-accumulate) conv precision: tight bound.
    ref_matched = ode_function_reference(z, t, params, conv_dtype=jnp.bfloat16)
    # Ground-truth f32 reference: looser bound covering bf16 MXU operand rounding.
    ref_f32 = ode_function_reference(z, t, params, conv_dtype=jnp.float32)

    err_matched = float(jnp.max(jnp.abs(out - ref_matched)))
    err_f32 = float(jnp.max(jnp.abs(out - ref_f32)))

    assert out.shape == z.shape, out.shape
    assert err_matched < 1e-2, err_matched
    assert err_f32 < 6e-2, err_f32
    print("KERNEL_OK")
</pallas_src>

<mosaic_0001>
module attributes {stable_mosaic.version = 11 : i64} {
  func.func @_fused_ode_kernel(%arg0: memref<1x1xf32, #tpu.memory_space<smem>>, %arg1: memref<2x8x8x64xf32, #tpu.memory_space<vmem>>, %arg2: memref<640x64xbf16, #tpu.memory_space<vmem>>, %arg3: memref<64x64xf32, #tpu.memory_space<vmem>>, %arg4: memref<1x64xf32, #tpu.memory_space<vmem>>, %arg5: memref<1x64xf32, #tpu.memory_space<vmem>>, %arg6: memref<1x64xf32, #tpu.memory_space<vmem>>, %arg7: memref<640x64xbf16, #tpu.memory_space<vmem>>, %arg8: memref<64x64xf32, #tpu.memory_space<vmem>>, %arg9: memref<1x64xf32, #tpu.memory_space<vmem>>, %arg10: memref<1x64xf32, #tpu.memory_space<vmem>>, %arg11: memref<1x64xf32, #tpu.memory_space<vmem>>, %arg12: memref<2x8x8x64xf32, #tpu.memory_space<vmem>>, %arg13: memref<2x10x17x64xf32, #tpu.memory_space<vmem>>, %arg14: memref<128x640xbf16, #tpu.memory_space<vmem>>) attributes {dimension_semantics = [], scalar_prefetch = 0 : i64, scratch_operands = 2 : i64, tpu.core_type = #tpu.core_type<tc>} {
    %c0 = arith.constant 0 : index
    %c0_0 = arith.constant 0 : index
    %0 = memref.load %arg0[%c0, %c0_0] : memref<1x1xf32, #tpu.memory_space<smem>>
    %cst = arith.constant 0.000000e+00 : f32
    %1 = vector.broadcast %cst : f32 to vector<2x1x17x64xf32>
    %cst_1 = arith.constant 0.000000e+00 : f32
    %2 = vector.broadcast %cst_1 : f32 to vector<2x10x1x64xf32>
    %c0_2 = arith.constant 0 : index
    %c0_3 = arith.constant 0 : index
    %c0_4 = arith.constant 0 : index
    %c0_5 = arith.constant 0 : index
    %3 = vector.load %arg13[%c0_2, %c0_3, %c0_4, %c0_5] : memref<2x10x17x64xf32, #tpu.memory_space<vmem>>, vector<2x1x17x64xf32>
    tpu.vector_store %arg13[%c0_2, %c0_3, %c0_4, %c0_5], %1 {strides = array<i32>} : memref<2x10x17x64xf32, #tpu.memory_space<vmem>>, vector<2x1x17x64xf32>,
    %c0_6 = arith.constant 0 : index
    %c9 = arith.constant 9 : index
    %c0_7 = arith.constant 0 : index
    %c0_8 = arith.constant 0 : index
    %4 = vector.load %arg13[%c0_6, %c9, %c0_7, %c0_8] : memref<2x10x17x64xf32, #tpu.memory_space<vmem>>, vector<2x1x17x64xf32>
    tpu.vector_store %arg13[%c0_6, %c9, %c0_7, %c0_8], %1 {strides = array<i32>} : memref<2x10x17x64xf32, #tpu.memory_space<vmem>>, vector<2x1x17x64xf32>,
    %c0_9 = arith.constant 0 : index
    %c0_10 = arith.constant 0 : index
    %c7 = arith.constant 7 : index
    %c0_11 = arith.constant 0 : index
    %5 = vector.load %arg13[%c0_9, %c0_10, %c7, %c0_11] : memref<2x10x17x64xf32, #tpu.memory_space<vmem>>, vector<2x10x1x64xf32>
    tpu.vector_store %arg13[%c0_9, %c0_10, %c7, %c0_11], %2 {strides = array<i32>} : memref<2x10x17x64xf32, #tpu.memory_space<vmem>>, vector<2x10x1x64xf32>,
    %c0_12 = arith.constant 0 : index
    %c0_13 = arith.constant 0 : index
    %c16 = arith.constant 16 : index
    %c0_14 = arith.constant 0 : index
    %6 = vector.load %arg13[%c0_12, %c0_13, %c16, %c0_14] : memref<2x10x17x64xf32, #tpu.memory_space<vmem>>, vector<2x10x1x64xf32>
    tpu.vector_store %arg13[%c0_12, %c0_13, %c16, %c0_14], %2 {strides = array<i32>} : memref<2x10x17x64xf32, #tpu.memory_space<vmem>>, vector<2x10x1x64xf32>,
    %c0_15 = arith.constant 0 : index
    %c0_16 = arith.constant 0 : index
    %c0_17 = arith.constant 0 : index
    %c0_18 = arith.constant 0 : index
    %7 = vector.load %arg1[%c0_15, %c0_16, %c0_17, %c0_18] : memref<2x8x8x64xf32, #tpu.memory_space<vmem>>, vector<2x8x8x64xf32>
    %c0_19 = arith.constant 0 : index
    %c1 = arith.constant 1 : index
    %c8 = arith.constant 8 : index
    %c0_20 = arith.constant 0 : index
    %8 = vector.load %arg13[%c0_19, %c1, %c8, %c0_20] : memref<2x10x17x64xf32, #tpu.memory_space<vmem>>, vector<2x8x8x64xf32>
    tpu.vector_store %arg13[%c0_19, %c1, %c8, %c0_20], %7 {strides = array<i32>} : memref<2x10x17x64xf32, #tpu.memory_space<vmem>>, vector<2x8x8x64xf32>,
    %c0_21 = arith.constant 0 : index
    %c0_22 = arith.constant 0 : index
    %c7_23 = arith.constant 7 : index
    %c0_24 = arith.constant 0 : index
    %9 = vector.load %arg13[%c0_21, %c0_22, %c7_23, %c0_24] : memref<2x10x17x64xf32, #tpu.memory_space<vmem>>, vector<2x8x8x64xf32>
    %10 = vector.shape_cast %9 : vector<2x8x8x64xf32> to vector<128x64xf32>
    %11 = arith.truncf %10 : vector<128x64xf32> to vector<128x64xbf16>
    %c0_25 = arith.constant 0 : index
    %c0_26 = arith.constant 0 : index
    %c8_27 = arith.constant 8 : index
    %c0_28 = arith.constant 0 : index
    %12 = vector.load %arg13[%c0_25, %c0_26, %c8_27, %c0_28] : memref<2x10x17x64xf32, #tpu.memory_space<vmem>>, vector<2x8x8x64xf32>
    %13 = vector.shape_cast %12 : vector<2x8x8x64xf32> to vector<128x64xf32>
    %14 = arith.truncf %13 : vector<128x64xf32> to vector<128x64xbf16>
    %15 = tpu.concatenate %11, %14 in 1 : vector<128x64xbf16>, vector<128x64xbf16> -> vector<128x128xbf16>
    %c0_29 = arith.constant 0 : index
    %c0_30 = arith.constant 0 : index
    %16 = vector.load %arg14[%c0_29, %c0_30] : memref<128x640xbf16, #tpu.memory_space<vmem>>, vector<128x128xbf16>
    tpu.vector_store %arg14[%c0_29, %c0_30], %15 {strides = array<i32>} : memref<128x640xbf16, #tpu.memory_space<vmem>>, vector<128x128xbf16>,
    %c0_31 = arith.constant 0 : index
    %c0_32 = arith.constant 0 : index
    %c9_33 = arith.constant 9 : index
    %c0_34 = arith.constant 0 : index
    %17 = vector.load %arg13[%c0_31, %c0_32, %c9_33, %c0_34] : memref<2x10x17x64xf32, #tpu.memory_space<vmem>>, vector<2x8x8x64xf32>
    %18 = vector.shape_cast %17 : vector<2x8x8x64xf32> to vector<128x64xf32>
    %19 = arith.truncf %18 : vector<128x64xf32> to vector<128x64xbf16>
    %c0_35 = arith.constant 0 : index
    %c1_36 = arith.constant 1 : index
    %c7_37 = arith.constant 7 : index
    %c0_38 = arith.constant 0 : index
    %20 = vector.load %arg13[%c0_35, %c1_36, %c7_37, %c0_38] : memref<2x10x17x64xf32, #tpu.memory_space<vmem>>, vector<2x8x8x64xf32>
    %21 = vector.shape_cast %20 : vector<2x8x8x64xf32> to vector<128x64xf32>
    %22 = arith.truncf %21 : vector<128x64xf32> to vector<128x64xbf16>
    %23 = tpu.concatenate %19, %22 in 1 : vector<128x64xbf16>, vector<128x64xbf16> -> vector<128x128xbf16>
    %c0_39 = arith.constant 0 : index
    %c128 = arith.constant 128 : index
    %24 = vector.load %arg14[%c0_39, %c128] : memref<128x640xbf16, #tpu.memory_space<vmem>>, vector<128x128xbf16>
    tpu.vector_store %arg14[%c0_39, %c128], %23 {strides = array<i32>} : memref<128x640xbf16, #tpu.memory_space<vmem>>, vector<128x128xbf16>,
    %c0_40 = arith.constant 0 : index
    %c1_41 = arith.constant 1 : index
    %c8_42 = arith.constant 8 : index
    %c0_43 = arith.constant 0 : index
    %25 = vector.load %arg13[%c0_40, %c1_41, %c8_42, %c0_43] : memref<2x10x17x64xf32, #tpu.memory_space<vmem>>, vector<2x8x8x64xf32>
    %26 = vector.shape_cast %25 : vector<2x8x8x64xf32> to vector<128x64xf32>
    %27 = arith.truncf %26 : vector<128x64xf32> to vector<128x64xbf16>
    %c0_44 = arith.constant 0 : index
    %c1_45 = arith.constant 1 : index
    %c9_46 = arith.constant 9 : index
    %c0_47 = arith.constant 0 : index
    %28 = vector.load %arg13[%c0_44, %c1_45, %c9_46, %c0_47] : memref<2x10x17x64xf32, #tpu.memory_space<vmem>>, vector<2x8x8x64xf32>
    %29 = vector.shape_cast %28 : vector<2x8x8x64xf32> to vector<128x64xf32>
    %30 = arith.truncf %29 : vector<128x64xf32> to vector<128x64xbf16>
    %31 = tpu.concatenate %27, %30 in 1 : vector<128x64xbf16>, vector<128x64xbf16> -> vector<128x128xbf16>
    %c0_48 = arith.constant 0 : index
    %c256 = arith.constant 256 : index
    %32 = vector.load %arg14[%c0_48, %c256] : memref<128x640xbf16, #tpu.memory_space<vmem>>, vector<128x128xbf16>
    tpu.vector_store %arg14[%c0_48, %c256], %31 {strides = array<i32>} : memref<128x640xbf16, #tpu.memory_space<vmem>>, vector<128x128xbf16>,
    %c0_49 = arith.constant 0 : index
    %c2 = arith.constant 2 : index
    %c7_50 = arith.constant 7 : index
    %c0_51 = arith.constant 0 : index
    %33 = vector.load %arg13[%c0_49, %c2, %c7_50, %c0_51] : memref<2x10x17x64xf32, #tpu.memory_space<vmem>>, vector<2x8x8x64xf32>
    %34 = vector.shape_cast %33 : vector<2x8x8x64xf32> to vector<128x64xf32>
    %35 = arith.truncf %34 : vector<128x64xf32> to vector<128x64xbf16>
    %c0_52 = arith.constant 0 : index
    %c2_53 = arith.constant 2 : index
    %c8_54 = arith.constant 8 : index
    %c0_55 = arith.constant 0 : index
    %36 = vector.load %arg13[%c0_52, %c2_53, %c8_54, %c0_55] : memref<2x10x17x64xf32, #tpu.memory_space<vmem>>, vector<2x8x8x64xf32>
    %37 = vector.shape_cast %36 : vector<2x8x8x64xf32> to vector<128x64xf32>
    %38 = arith.truncf %37 : vector<128x64xf32> to vector<128x64xbf16>
    %39 = tpu.concatenate %35, %38 in 1 : vector<128x64xbf16>, vector<128x64xbf16> -> vector<128x128xbf16>
    %c0_56 = arith.constant 0 : index
    %c384 = arith.constant 384 : index
    %40 = vector.load %arg14[%c0_56, %c384] : memref<128x640xbf16, #tpu.memory_space<vmem>>, vector<128x128xbf16>
    tpu.vector_store %arg14[%c0_56, %c384], %39 {strides = array<i32>} : memref<128x640xbf16, #tpu.memory_space<vmem>>, vector<128x128xbf16>,
    %c0_57 = arith.constant 0 : index
    %c2_58 = arith.constant 2 : index
    %c9_59 = arith.constant 9 : index
    %c0_60 = arith.constant 0 : index
    %41 = vector.load %arg13[%c0_57, %c2_58, %c9_59, %c0_60] : memref<2x10x17x64xf32, #tpu.memory_space<vmem>>, vector<2x8x8x64xf32>
    %42 = vector.shape_cast %41 : vector<2x8x8x64xf32> to vector<128x64xf32>
    %43 = arith.truncf %42 : vector<128x64xf32> to vector<128x64xbf16>
    %cst_61 = arith.constant 0.000000e+00 : bf16
    %44 = vector.broadcast %cst_61 : bf16 to vector<128x64xbf16>
    %45 = tpu.concatenate %43, %44 in 1 : vector<128x64xbf16>, vector<128x64xbf16> -> vector<128x128xbf16>
    %c0_62 = arith.constant 0 : index
    %c512 = arith.constant 512 : index
    %46 = vector.load %arg14[%c0_62, %c512] : memref<128x640xbf16, #tpu.memory_space<vmem>>, vector<128x128xbf16>
    tpu.vector_store %arg14[%c0_62, %c512], %45 {strides = array<i32>} : memref<128x640xbf16, #tpu.memory_space<vmem>>, vector<128x128xbf16>,
    %c0_63 = arith.constant 0 : index
    %c0_64 = arith.constant 0 : index
    %47 = vector.load %arg14[%c0_63, %c0_64] : memref<128x640xbf16, #tpu.memory_space<vmem>>, vector<128x640xbf16>
    %c0_65 = arith.constant 0 : index
    %c0_66 = arith.constant 0 : index
    %48 = vector.load %arg2[%c0_65, %c0_66] : memref<640x64xbf16, #tpu.memory_space<vmem>>, vector<640x64xbf16>
    %cst_67 = arith.constant dense<0.000000e+00> : vector<128x64xf32>
    %49 = tpu.matmul %47, %48, %cst_67 {dimension_numbers = #tpu.dot_dimension_numbers<[1], [0], [0], [1], [0, 0, 1, 1], [], []>} : vector<128x640xbf16>, vector<640x64xbf16>, vector<128x64xf32> -> vector<128x64xf32>
    %c0_68 = arith.constant 0 : index
    %c0_69 = arith.constant 0 : index
    %50 = vector.load %arg4[%c0_68, %c0_69] : memref<1x64xf32, #tpu.memory_space<vmem>>, vector<1x64xf32>
    %c0_70 = arith.constant 0 : index
    %c0_71 = arith.constant 0 : index
    %51 = vector.load %arg3[%c0_70, %c0_71] : memref<64x64xf32, #tpu.memory_space<vmem>>, vector<64x64xf32>
    %52 = vector.broadcast %0 : f32 to vector<64x64xf32>
    %53 = arith.mulf %52, %51 : vector<64x64xf32>
    %54 = vector.broadcast %50 : vector<1x64xf32> to vector<64x64xf32>
    %55 = arith.addf %54, %53 : vector<64x64xf32>
    %56 = vector.shape_cast %49 : vector<128x64xf32> to vector<2x64x64xf32>
    %57 = vector.shape_cast %55 : vector<64x64xf32> to vector<1x64x64xf32>
    %58 = vector.broadcast %57 : vector<1x64x64xf32> to vector<2x64x64xf32>
    %59 = arith.addf %56, %58 : vector<2x64x64xf32>
    %60 = vector.shape_cast %59 : vector<2x64x64xf32> to vector<128x64xf32>
    %61 = arith.mulf %60, %60 : vector<128x64xf32>
    %62 = tpu.concatenate %60, %61 in 1 : vector<128x64xf32>, vector<128x64xf32> -> vector<128x128xf32>
    %cst_72 = arith.constant dense<0.000000e+00> : vector<128xf32>
    %63 = vector.multi_reduction <add>, %62, %cst_72 [0] : vector<128x128xf32> to vector<128xf32>
    %64 = vector.shape_cast %63 : vector<128xf32> to vector<1x128xf32>
    %65 = vector.extract_strided_slice %64 {offsets = [0, 0], sizes = [1, 64], strides = [1, 1]} : vector<1x128xf32> to vector<1x64xf32>
    %cst_73 = arith.constant 7.812500e-03 : f32
    %66 = vector.broadcast %cst_73 : f32 to vector<1x64xf32>
    %67 = arith.mulf %65, %66 : vector<1x64xf32>
    %68 = vector.extract_strided_slice %64 {offsets = [0, 64], sizes = [1, 64], strides = [1, 1]} : vector<1x128xf32> to vector<1x64xf32>
    %cst_74 = arith.constant 7.812500e-03 : f32
    %69 = vector.broadcast %cst_74 : f32 to vector<1x64xf32>
    %70 = arith.mulf %68, %69 : vector<1x64xf32>
    %71 = arith.mulf %67, %67 : vector<1x64xf32>
    %72 = arith.subf %70, %71 : vector<1x64xf32>
    %c0_75 = arith.constant 0 : index
    %c0_76 = arith.constant 0 : index
    %73 = vector.load %arg5[%c0_75, %c0_76] : memref<1x64xf32, #tpu.memory_space<vmem>>, vector<1x64xf32>
    %cst_77 = arith.constant 9.99999974E-6 : f32
    %74 = vector.broadcast %cst_77 : f32 to vector<1x64xf32>
    %75 = arith.addf %72, %74 : vector<1x64xf32>
    %76 = math.rsqrt %75 : vector<1x64xf32>
    %77 = arith.mulf %73, %76 : vector<1x64xf32>
    %c0_78 = arith.constant 0 : index
    %c0_79 = arith.constant 0 : index
    %78 = vector.load %arg6[%c0_78, %c0_79] : memref<1x64xf32, #tpu.memory_space<vmem>>, vector<1x64xf32>
    %79 = arith.mulf %67, %77 : vector<1x64xf32>
    %80 = arith.subf %78, %79 : vector<1x64xf32>
    %81 = vector.broadcast %77 : vector<1x64xf32> to vector<128x64xf32>
    %82 = arith.mulf %60, %81 : vector<128x64xf32>
    %83 = vector.broadcast %80 : vector<1x64xf32> to vector<128x64xf32>
    %84 = arith.addf %82, %83 : vector<128x64xf32>
    %cst_80 = arith.constant 0.000000e+00 : f32
    %85 = vector.broadcast %cst_80 : f32 to vector<128x64xf32>
    %86 = arith.maximumf %84, %85 : vector<128x64xf32>
    %87 = vector.shape_cast %86 : vector<128x64xf32> to vector<2x8x8x64xf32>
    %c0_81 = arith.constant 0 : index
    %c1_82 = arith.constant 1 : index
    %c8_83 = arith.constant 8 : index
    %c0_84 = arith.constant 0 : index
    %88 = vector.load %arg13[%c0_81, %c1_82, %c8_83, %c0_84] : memref<2x10x17x64xf32, #tpu.memory_space<vmem>>, vector<2x8x8x64xf32>
    tpu.vector_store %arg13[%c0_81, %c1_82, %c8_83, %c0_84], %87 {strides = array<i32>} : memref<2x10x17x64xf32, #tpu.memory_space<vmem>>, vector<2x8x8x64xf32>,
    %c0_85 = arith.constant 0 : index
    %c0_86 = arith.constant 0 : index
    %c7_87 = arith.constant 7 : index
    %c0_88 = arith.constant 0 : index
    %89 = vector.load %arg13[%c0_85, %c0_86, %c7_87, %c0_88] : memref<2x10x17x64xf32, #tpu.memory_space<vmem>>, vector<2x8x8x64xf32>
    %90 = vector.shape_cast %89 : vector<2x8x8x64xf32> to vector<128x64xf32>
    %91 = arith.truncf %90 : vector<128x64xf32> to vector<128x64xbf16>
    %c0_89 = arith.constant 0 : index
    %c0_90 = arith.constant 0 : index
    %c8_91 = arith.constant 8 : index
    %c0_92 = arith.constant 0 : index
    %92 = vector.load %arg13[%c0_89, %c0_90, %c8_91, %c0_92] : memref<2x10x17x64xf32, #tpu.memory_space<vmem>>, vector<2x8x8x64xf32>
    %93 = vector.shape_cast %92 : vector<2x8x8x64xf32> to vector<128x64xf32>
    %94 = arith.truncf %93 : vector<128x64xf32> to vector<128x64xbf16>
    %95 = tpu.concatenate %91, %94 in 1 : vector<128x64xbf16>, vector<128x64xbf16> -> vector<128x128xbf16>
    %c0_93 = arith.constant 0 : index
    %c0_94 = arith.constant 0 : index
    %96 = vector.load %arg14[%c0_93, %c0_94] : memref<128x640xbf16, #tpu.memory_space<vmem>>, vector<128x128xbf16>
    tpu.vector_store %arg14[%c0_93, %c0_94], %95 {strides = array<i32>} : memref<128x640xbf16, #tpu.memory_space<vmem>>, vector<128x128xbf16>,
    %c0_95 = arith.constant 0 : index
    %c0_96 = arith.constant 0 : index
    %c9_97 = arith.constant 9 : index
    %c0_98 = arith.constant 0 : index
    %97 = vector.load %arg13[%c0_95, %c0_96, %c9_97, %c0_98] : memref<2x10x17x64xf32, #tpu.memory_space<vmem>>, vector<2x8x8x64xf32>
    %98 = vector.shape_cast %97 : vector<2x8x8x64xf32> to vector<128x64xf32>
    %99 = arith.truncf %98 : vector<128x64xf32> to vector<128x64xbf16>
    %c0_99 = arith.constant 0 : index
    %c1_100 = arith.constant 1 : index
    %c7_101 = arith.constant 7 : index
    %c0_102 = arith.constant 0 : index
    %100 = vector.load %arg13[%c0_99, %c1_100, %c7_101, %c0_102] : memref<2x10x17x64xf32, #tpu.memory_space<vmem>>, vector<2x8x8x64xf32>
    %101 = vector.shape_cast %100 : vector<2x8x8x64xf32> to vector<128x64xf32>
    %102 = arith.truncf %101 : vector<128x64xf32> to vector<128x64xbf16>
    %103 = tpu.concatenate %99, %102 in 1 : vector<128x64xbf16>, vector<128x64xbf16> -> vector<128x128xbf16>
    %c0_103 = arith.constant 0 : index
    %c128_104 = arith.constant 128 : index
    %104 = vector.load %arg14[%c0_103, %c128_104] : memref<128x640xbf16, #tpu.memory_space<vmem>>, vector<128x128xbf16>
    tpu.vector_store %arg14[%c0_103, %c128_104], %103 {strides = array<i32>} : memref<128x640xbf16, #tpu.memory_space<vmem>>, vector<128x128xbf16>,
    %c0_105 = arith.constant 0 : index
    %c1_106 = arith.constant 1 : index
    %c8_107 = arith.constant 8 : index
    %c0_108 = arith.constant 0 : index
    %105 = vector.load %arg13[%c0_105, %c1_106, %c8_107, %c0_108] : memref<2x10x17x64xf32, #tpu.memory_space<vmem>>, vector<2x8x8x64xf32>
    %106 = vector.shape_cast %105 : vector<2x8x8x64xf32> to vector<128x64xf32>
    %107 = arith.truncf %106 : vector<128x64xf32> to vector<128x64xbf16>
    %c0_109 = arith.constant 0 : index
    %c1_110 = arith.constant 1 : index
    %c9_111 = arith.constant 9 : index
    %c0_112 = arith.constant 0 : index
    %108 = vector.load %arg13[%c0_109, %c1_110, %c9_111, %c0_112] : memref<2x10x17x64xf32, #tpu.memory_space<vmem>>, vector<2x8x8x64xf32>
    %109 = vector.shape_cast %108 : vector<2x8x8x64xf32> to vector<128x64xf32>
    %110 = arith.truncf %109 : vector<128x64xf32> to vector<128x64xbf16>
    %111 = tpu.concatenate %107, %110 in 1 : vector<128x64xbf16>, vector<128x64xbf16> -> vector<128x128xbf16>
    %c0_113 = arith.constant 0 : index
    %c256_114 = arith.constant 256 : index
    %112 = vector.load %arg14[%c0_113, %c256_114] : memref<128x640xbf16, #tpu.memory_space<vmem>>, vector<128x128xbf16>
    tpu.vector_store %arg14[%c0_113, %c256_114], %111 {strides = array<i32>} : memref<128x640xbf16, #tpu.memory_space<vmem>>, vector<128x128xbf16>,
    %c0_115 = arith.constant 0 : index
    %c2_116 = arith.constant 2 : index
    %c7_117 = arith.constant 7 : index
    %c0_118 = arith.constant 0 : index
    %113 = vector.load %arg13[%c0_115, %c2_116, %c7_117, %c0_118] : memref<2x10x17x64xf32, #tpu.memory_space<vmem>>, vector<2x8x8x64xf32>
    %114 = vector.shape_cast %113 : vector<2x8x8x64xf32> to vector<128x64xf32>
    %115 = arith.truncf %114 : vector<128x64xf32> to vector<128x64xbf16>
    %c0_119 = arith.constant 0 : index
    %c2_120 = arith.constant 2 : index
    %c8_121 = arith.constant 8 : index
    %c0_122 = arith.constant 0 : index
    %116 = vector.load %arg13[%c0_119, %c2_120, %c8_121, %c0_122] : memref<2x10x17x64xf32, #tpu.memory_space<vmem>>, vector<2x8x8x64xf32>
    %117 = vector.shape_cast %116 : vector<2x8x8x64xf32> to vector<128x64xf32>
    %118 = arith.truncf %117 : vector<128x64xf32> to vector<128x64xbf16>
    %119 = tpu.concatenate %115, %118 in 1 : vector<128x64xbf16>, vector<128x64xbf16> -> vector<128x128xbf16>
    %c0_123 = arith.constant 0 : index
    %c384_124 = arith.constant 384 : index
    %120 = vector.load %arg14[%c0_123, %c384_124] : memref<128x640xbf16, #tpu.memory_space<vmem>>, vector<128x128xbf16>
    tpu.vector_store %arg14[%c0_123, %c384_124], %119 {strides = array<i32>} : memref<128x640xbf16, #tpu.memory_space<vmem>>, vector<128x128xbf16>,
    %c0_125 = arith.constant 0 : index
    %c2_126 = arith.constant 2 : index
    %c9_127 = arith.constant 9 : index
    %c0_128 = arith.constant 0 : index
    %121 = vector.load %arg13[%c0_125, %c2_126, %c9_127, %c0_128] : memref<2x10x17x64xf32, #tpu.memory_space<vmem>>, vector<2x8x8x64xf32>
    %122 = vector.shape_cast %121 : vector<2x8x8x64xf32> to vector<128x64xf32>
    %123 = arith.truncf %122 : vector<128x64xf32> to vector<128x64xbf16>
    %cst_129 = arith.constant 0.000000e+00 : bf16
    %124 = vector.broadcast %cst_129 : bf16 to vector<128x64xbf16>
    %125 = tpu.concatenate %123, %124 in 1 : vector<128x64xbf16>, vector<128x64xbf16> -> vector<128x128xbf16>
    %c0_130 = arith.constant 0 : index
    %c512_131 = arith.constant 512 : index
    %126 = vector.load %arg14[%c0_130, %c512_131] : memref<128x640xbf16, #tpu.memory_space<vmem>>, vector<128x128xbf16>
    tpu.vector_store %arg14[%c0_130, %c512_131], %125 {strides = array<i32>} : memref<128x640xbf16, #tpu.memory_space<vmem>>, vector<128x128xbf16>,
    %c0_132 = arith.constant 0 : index
    %c0_133 = arith.constant 0 : index
    %127 = vector.load %arg14[%c0_132, %c0_133] : memref<128x640xbf16, #tpu.memory_space<vmem>>, vector<128x640xbf16>
    %c0_134 = arith.constant 0 : index
    %c0_135 = arith.constant 0 : index
    %128 = vector.load %arg7[%c0_134, %c0_135] : memref<640x64xbf16, #tpu.memory_space<vmem>>, vector<640x64xbf16>
    %cst_136 = arith.constant dense<0.000000e+00> : vector<128x64xf32>
    %129 = tpu.matmul %127, %128, %cst_136 {dimension_numbers = #tpu.dot_dimension_numbers<[1], [0], [0], [1], [0, 0, 1, 1], [], []>} : vector<128x640xbf16>, vector<640x64xbf16>, vector<128x64xf32> -> vector<128x64xf32>
    %c0_137 = arith.constant 0 : index
    %c0_138 = arith.constant 0 : index
    %130 = vector.load %arg9[%c0_137, %c0_138] : memref<1x64xf32, #tpu.memory_space<vmem>>, vector<1x64xf32>
    %c0_139 = arith.constant 0 : index
    %c0_140 = arith.constant 0 : index
    %131 = vector.load %arg8[%c0_139, %c0_140] : memref<64x64xf32, #tpu.memory_space<vmem>>, vector<64x64xf32>
    %132 = vector.broadcast %0 : f32 to vector<64x64xf32>
    %133 = arith.mulf %132, %131 : vector<64x64xf32>
    %134 = vector.broadcast %130 : vector<1x64xf32> to vector<64x64xf32>
    %135 = arith.addf %134, %133 : vector<64x64xf32>
    %136 = vector.shape_cast %129 : vector<128x64xf32> to vector<2x64x64xf32>
    %137 = vector.shape_cast %135 : vector<64x64xf32> to vector<1x64x64xf32>
    %138 = vector.broadcast %137 : vector<1x64x64xf32> to vector<2x64x64xf32>
    %139 = arith.addf %136, %138 : vector<2x64x64xf32>
    %140 = vector.shape_cast %139 : vector<2x64x64xf32> to vector<128x64xf32>
    %141 = arith.mulf %140, %140 : vector<128x64xf32>
    %142 = tpu.concatenate %140, %141 in 1 : vector<128x64xf32>, vector<128x64xf32> -> vector<128x128xf32>
    %cst_141 = arith.constant dense<0.000000e+00> : vector<128xf32>
    %143 = vector.multi_reduction <add>, %142, %cst_141 [0] : vector<128x128xf32> to vector<128xf32>
    %144 = vector.shape_cast %143 : vector<128xf32> to vector<1x128xf32>
    %145 = vector.extract_strided_slice %144 {offsets = [0, 0], sizes = [1, 64], strides = [1, 1]} : vector<1x128xf32> to vector<1x64xf32>
    %cst_142 = arith.constant 7.812500e-03 : f32
    %146 = vector.broadcast %cst_142 : f32 to vector<1x64xf32>
    %147 = arith.mulf %145, %146 : vector<1x64xf32>
    %148 = vector.extract_strided_slice %144 {offsets = [0, 64], sizes = [1, 64], strides = [1, 1]} : vector<1x128xf32> to vector<1x64xf32>
    %cst_143 = arith.constant 7.812500e-03 : f32
    %149 = vector.broadcast %cst_143 : f32 to vector<1x64xf32>
    %150 = arith.mulf %148, %149 : vector<1x64xf32>
    %151 = arith.mulf %147, %147 : vector<1x64xf32>
    %152 = arith.subf %150, %151 : vector<1x64xf32>
    %c0_144 = arith.constant 0 : index
    %c0_145 = arith.constant 0 : index
    %153 = vector.load %arg10[%c0_144, %c0_145] : memref<1x64xf32, #tpu.memory_space<vmem>>, vector<1x64xf32>
    %cst_146 = arith.constant 9.99999974E-6 : f32
    %154 = vector.broadcast %cst_146 : f32 to vector<1x64xf32>
    %155 = arith.addf %152, %154 : vector<1x64xf32>
    %156 = math.rsqrt %155 : vector<1x64xf32>
    %157 = arith.mulf %153, %156 : vector<1x64xf32>
    %c0_147 = arith.constant 0 : index
    %c0_148 = arith.constant 0 : index
    %158 = vector.load %arg11[%c0_147, %c0_148] : memref<1x64xf32, #tpu.memory_space<vmem>>, vector<1x64xf32>
    %159 = arith.mulf %147, %157 : vector<1x64xf32>
    %160 = arith.subf %158, %159 : vector<1x64xf32>
    %161 = vector.broadcast %157 : vector<1x64xf32> to vector<128x64xf32>
    %162 = arith.mulf %140, %161 : vector<128x64xf32>
    %163 = vector.broadcast %160 : vector<1x64xf32> to vector<128x64xf32>
    %164 = arith.addf %162, %163 : vector<128x64xf32>
    %cst_149 = arith.constant 0.000000e+00 : f32
    %165 = vector.broadcast %cst_149 : f32 to vector<128x64xf32>
    %166 = arith.maximumf %164, %165 : vector<128x64xf32>
    %167 = vector.shape_cast %166 : vector<128x64xf32> to vector<2x8x8x64xf32>
    %c0_150 = arith.constant 0 : index
    %c0_151 = arith.constant 0 : index
    %c0_152 = arith.constant 0 : index
    %c0_153 = arith.constant 0 : index
    %168 = vector.load %arg12[%c0_150, %c0_151, %c0_152, %c0_153] : memref<2x8x8x64xf32, #tpu.memory_space<vmem>>, vector<2x8x8x64xf32>
    tpu.vector_store %arg12[%c0_150, %c0_151, %c0_152, %c0_153], %167 {strides = array<i32>} : memref<2x8x8x64xf32, #tpu.memory_space<vmem>>, vector<2x8x8x64xf32>,
    return
  }
}

</mosaic_0001>

<bundles_post_ra>
// kernel: tpu_custom_call.1
= control target key start
LH: loop header
LB: loop body
LE: loop exit
PB: predicated region body
PF: predicated region fallthrough
CT: control target
= control target key end

     0   :  { %vm45_vm0 = vcmask 523264   ;;  %v4902_v3 = vmov 0.0   ;;  %vm48_vm1 = vcmask 516096   ;;  %s6622_s0 = inlined_call_operand.<no memory space> [shape: f32[1,1], index: 0, kind: input, shape index: {}]   ;;  %s6623_s1 = inlined_call_operand.vmem [shape: f32[2,8,8,64], index: 1, kind: input, shape index: {}]   ;;  %s6624_s2 = inlined_call_operand.vmem [shape: bf16[640,64], index: 2, kind: input, shape index: {}]   ;;  %s6625_s3 = inlined_call_operand.vmem [shape: f32[64,64], index: 3, kind: input, shape index: {}]   ;;  %s6626_s4 = inlined_call_operand.vmem [shape: f32[1,64], index: 4, kind: input, shape index: {}]   ;;  %s6627_s5 = inlined_call_operand.vmem [shape: f32[1,64], index: 5, kind: input, shape index: {}]   ;;  %s6628_s6 = inlined_call_operand.vmem [shape: f32[1,64], index: 6, kind: input, shape index: {}]   ;;  %s6629_s7 = inlined_call_operand.vmem [shape: bf16[640,64], index: 7, kind: input, shape index: {}]   ;;  %s6630_s8 = inlined_call_operand.vmem [shape: f32[64,64], index: 8, kind: input, shape index: {}]   ;;  %s6631_s9 = inlined_call_operand.vmem [shape: f32[1,64], index: 9, kind: input, shape index: {}]   ;;  %s6632_s10 = inlined_call_operand.vmem [shape: f32[1,64], index: 10, kind: input, shape index: {}]   ;;  %s6633_s11 = inlined_call_operand.vmem [shape: f32[1,64], index: 11, kind: input, shape index: {}]   ;;  %s6634_s12 = inlined_call_operand.hbm [shape: f32[2,8,8,64], index: 12, kind: output, shape index: {}]  }
   0x1   :  { %v101_v0 = vld [vmem:[%s6623_s1 + $0x8] sm:$0xff]  ;;  %v102_v1 = vld [vmem:[%s6623_s1 + $0x10] sm:$0xff]  ;;  %v100_v2 = vld [vmem:[%s6623_s1] sm:$0xff]  ;;  %47 = vst.msk [vmem:[#allocation2 + $0x8] sm:$0xff] %vm45_vm0, %v4902_v3 }
   0x2   :  { %118 = vst.msk [vmem:[#allocation2 + $0x38] sm:$0xff] %vm45_vm0, %v101_v0  ;;  %119 = vst.msk [vmem:[#allocation2 + $0x50] sm:$0xff] %vm45_vm0, %v102_v1  ;;  %v103_v4 = vld [vmem:[%s6623_s1 + $0x18] sm:$0xff]  ;;  %v104_v5 = vld [vmem:[%s6623_s1 + $0x20] sm:$0xff] }
   0x3   :  { %117 = vst.msk [vmem:[#allocation2 + $0x20] sm:$0xff] %vm45_vm0, %v100_v2  ;;  %46 = vst.msk [vmem:[#allocation2] sm:$0xff] %vm45_vm0, %v4902_v3  ;;  %v105_v6 = vld [vmem:[%s6623_s1 + $0x28] sm:$0xff]  ;;  %v106_v7 = vld [vmem:[%s6623_s1 + $0x30] sm:$0xff] }
   0x4   :  { %50 = vst.msk [vmem:[#allocation2 + $0xf0] sm:$0xff] %vm45_vm0, %v4902_v3  ;;  %51 = vst.msk [vmem:[#allocation2 + $0xf8] sm:$0xff] %vm45_vm0, %v4902_v3  ;;  %v107_v8 = vld [vmem:[%s6623_s1 + $0x38] sm:$0xff]  ;;  %v108_v9 = vld [vmem:[%s6623_s1 + $0x40] sm:$0xff] }
   0x5   :  { %54 = vst.msk [vmem:[#allocation2 + $0xd8] sm:$0xff] %vm45_vm0, %v4902_v3  ;;  %55 = vst.msk [vmem:[#allocation2 + $0xe0] sm:$0xff] %vm45_vm0, %v4902_v3  ;;  %v109_v10 = vld [vmem:[%s6623_s1 + $0x48] sm:$0xff]  ;;  %v110_v11 = vld [vmem:[%s6623_s1 + $0x50] sm:$0xff] }
   0x6   :  { %57 = vst.msk [vmem:[#allocation2 + $0x1c8] sm:$0xff] %vm45_vm0, %v4902_v3  ;;  %58 = vst.msk [vmem:[#allocation2 + $0x1d0] sm:$0xff] %vm45_vm0, %v4902_v3  ;;  %v111_v12 = vld [vmem:[%s6623_s1 + $0x58] sm:$0xff]  ;;  %v112_v13 = vld [vmem:[%s6623_s1 + $0x60] sm:$0xff] }
   0x7   :  { %63 = vst.msk [vmem:[#allocation2 + $0x4f] sm:$0x1] %vm48_vm1, %v4902_v3  ;;  %64 = vst.msk [vmem:[#allocation2 + $0x67] sm:$0x1] %vm48_vm1, %v4902_v3  ;;  %v113_v14 = vld [vmem:[%s6623_s1 + $0x68] sm:$0xff]  ;;  %v114_v15 = vld [vmem:[%s6623_s1 + $0x70] sm:$0xff] }
   0x8   :  { %120 = vst.msk [vmem:[#allocation2 + $0x68] sm:$0xff] %vm45_vm0, %v103_v4  ;;  %121 = vst.msk [vmem:[#allocation2 + $0x80] sm:$0xff] %vm45_vm0, %v104_v5  ;;  %v115_v16 = vld [vmem:[%s6623_s1 + $0x78] sm:$0xff]  ;;  %v157_v21 = vld [vmem:[#allocation2 + $0x8] sm:$0xff]  ;;  %s4903_s1 = smov 64  }
   0x9   :  { %49 = vst.msk [vmem:[#allocation2 + $0x10] sm:$0x1] %vm48_vm1, %v4902_v3  ;;  %52 = vst.msk [vmem:[#allocation2 + $0x100] sm:$0x1] %vm48_vm1, %v4902_v3  ;;  %v4678_v17 = vld [vmem:[%s6624_s2 + $0x78] sm:$0xff]   ;;  %v160_v20 = vld [vmem:[#allocation2 + $0x50] sm:$0xff] }
   0xa   :  { %56 = vst.msk [vmem:[#allocation2 + $0xe8] sm:$0x1] %vm48_vm1, %v4902_v3  ;;  %59 = vst.msk [vmem:[#allocation2 + $0x1d8] sm:$0x1] %vm48_vm1, %v4902_v3  ;;  %v4679_v18 = vld [vmem:[%s6624_s2 + $0x38] sm:$0xff]   ;;  %4320 = vmatprep.subr.bf16.mxu0 %v4678_v17  ;;  %v5150_v23 = vld [vmem:[#allocation2 + $0x20] sm:$0xff] }
   0xb   :  { %60 = vst.msk [vmem:[#allocation2 + $0x7] sm:$0x1] %vm48_vm1, %v4902_v3  ;;  %61 = vst.msk [vmem:[#allocation2 + $0x1f] sm:$0x1] %vm48_vm1, %v4902_v3  ;;  %v5147_v19 = vld [vmem:[#allocation2 + $0x38] sm:$0xff]  ;;  %4321 = vmatpush3.bf16.msra.mxu0 %v4679_v18  ;;  %v173_v26 = vpack.c.bf16 %v5150_v23, %v157_v21  ;;  %v4680_v51 = vld [vmem:[%s6624_s2 + $0x70] sm:$0xff]  }
   0xc   :  { %62 = vst.msk [vmem:[#allocation2 + $0x37] sm:$0x1] %vm48_vm1, %v4902_v3  ;;  %65 = vst.msk [vmem:[#allocation2 + $0x7f] sm:$0x1] %vm48_vm1, %v4902_v3  ;;  %v174_v22 = vpack.c.bf16 %v160_v20, %v5147_v19  ;;  %v165_v45 = vld [vmem:[#allocation2 + $0xf8] sm:$0xff]  ;;  %v4681_v54 = vld [vmem:[%s6624_s2 + $0x30] sm:$0xff]   ;;  %4322 = vmatprep.subr.bf16.mxu0 %v4680_v51 }
   0xd   :  { %66 = vst.msk [vmem:[#allocation2 + $0x97] sm:$0x1] %vm48_vm1, %v4902_v3  ;;  %67 = vst.msk [vmem:[#allocation2 + $0xaf] sm:$0x1] %vm48_vm1, %v4902_v3  ;;  %189 = vrot.lane.b32.xlu0 %v173_v26, %s4903_s1  ;;  %v4682_v57 = vld [vmem:[%s6624_s2 + $0x68] sm:$0xff]   ;;  %v4684_v60 = vld [vmem:[%s6624_s2 + $0x60] sm:$0xff]  }
   0xe   :  { %68 = vst.msk [vmem:[#allocation2 + $0xc7] sm:$0x1] %vm48_vm1, %v4902_v3  ;;  %69 = vst.msk [vmem:[#allocation2 + $0xdf] sm:$0x1] %vm48_vm1, %v4902_v3  ;;  %v5152_v24 = vld [vmem:[#allocation2 + $0x4f] sm:$0xff]  ;;  %191 = vrot.lane.b32.xlu1 %v174_v22, %s4903_s1  ;;  %v4685_v0 = vld [vmem:[%s6624_s2 + $0x20] sm:$0xff]  }
   0xf   :  { %70 = vst.msk [vmem:[#allocation2 + $0xf7] sm:$0x1] %vm48_vm1, %v4902_v3  ;;  %71 = vst.msk [vmem:[#allocation2 + $0x10f] sm:$0x1] %vm48_vm1, %v4902_v3  ;;  %v5154_v25 = vld [vmem:[#allocation2 + $0x67] sm:$0xff]  ;;  %4323 = vmatpush3.bf16.msra.mxu0 %v4681_v54  ;;  %v4686_v2 = vld [vmem:[%s6624_s2 + $0x58] sm:$0xff]  }
  0x10   :  { %72 = vst.msk [vmem:[#allocation2 + $0x127] sm:$0x1] %vm48_vm1, %v4902_v3  ;;  %73 = vst.msk [vmem:[#allocation2 + $0x13f] sm:$0x1] %vm48_vm1, %v4902_v3  ;;  %v342_v29 = vpack.c.bf16 %v5154_v25, %v5152_v24  ;;  %v5171_v33 = vld [vmem:[#allocation2 + $0x68] sm:$0xff]  ;;  %v162_v34 = vld [vmem:[#allocation2 + $0x80] sm:$0xff]  ;;  %4324 = vmatprep.subr.bf16.mxu0 %v4682_v57 }
  0x11   :  { %74 = vst.msk [vmem:[#allocation2 + $0x157] sm:$0x1] %vm48_vm1, %v4902_v3  ;;  %75 = vst.msk [vmem:[#allocation2 + $0x16f] sm:$0x1] %vm48_vm1, %v4902_v3  ;;  %v175_v36 = vpack.c.bf16 %v162_v34, %v5171_v33  ;;  %v4683_v59 = vld [vmem:[%s6624_s2 + $0x28] sm:$0xff]   ;;  %v4691_v18 = vld [vmem:[%s6624_s2 + $0x10] sm:$0xff]  }
  0x12   :  { %76 = vst.msk [vmem:[#allocation2 + $0x187] sm:$0x1] %vm48_vm1, %v4902_v3  ;;  %77 = vst.msk [vmem:[#allocation2 + $0x19f] sm:$0x1] %vm48_vm1, %v4902_v3  ;;  %v5157_v27 = vld [vmem:[#allocation2 + $0x1f] sm:$0xff]  ;;  %359 = vrot.lane.b32.xlu1 %v342_v29, %s4903_s1  ;;  %v4694_v20 = vld [vmem:[%s6624_s2 + $0x48] sm:$0xff]  }
  0x13   :  { %78 = vst.msk [vmem:[#allocation2 + $0x1b7] sm:$0x1] %vm48_vm1, %v4902_v3  ;;  %79 = vst.msk [vmem:[#allocation2 + $0x1cf] sm:$0x1] %vm48_vm1, %v4902_v3  ;;  %v5159_v28 = vld [vmem:[#allocation2 + $0x37] sm:$0xff]  ;;  %v5167_v31 = vld [vmem:[#allocation2 + $0x7f] sm:$0xff]  ;;  %4325 = vmatpush3.bf16.msra.mxu0 %v4683_v59 }
  0x14   :  { %81 = vst.msk [vmem:[#allocation2 + $0x28] sm:$0x1] %vm48_vm1, %v4902_v3  ;;  %82 = vst.msk [vmem:[#allocation2 + $0x40] sm:$0x1] %vm48_vm1, %v4902_v3  ;;  %v341_v30 = vpack.c.bf16 %v5159_v28, %v5157_v27  ;;  %4326 = vmatprep.subr.bf16.mxu0 %v4684_v60  ;;  %v4696_v26 = vld [vmem:[%s6624_s2 + $0xe8] sm:$0xff]   ;;  %v4701_v51 = vld [vmem:[%s6624_s2 + $0xa0] sm:$0xff]  }
  0x15   :  { %83 = vst.msk [vmem:[#allocation2 + $0x58] sm:$0x1] %vm48_vm1, %v4902_v3  ;;  %84 = vst.msk [vmem:[#allocation2 + $0x70] sm:$0x1] %vm48_vm1, %v4902_v3  ;;  %v4697_v34 = vld [vmem:[%s6624_s2 + $0xa8] sm:$0xff]  }
  0x16   :  { %85 = vst.msk [vmem:[#allocation2 + $0x88] sm:$0x1] %vm48_vm1, %v4902_v3  ;;  %86 = vst.msk [vmem:[#allocation2 + $0xa0] sm:$0x1] %vm48_vm1, %v4902_v3  ;;  %357 = vrot.lane.b32.xlu0 %v341_v30, %s4903_s1 }
  0x17   :  { %87 = vst.msk [vmem:[#allocation2 + $0xb8] sm:$0x1] %vm48_vm1, %v4902_v3  ;;  %88 = vst.msk [vmem:[#allocation2 + $0xd0] sm:$0x1] %vm48_vm1, %v4902_v3  ;;  %4327 = vmatpush3.bf16.msra.mxu0 %v4685_v0  ;;  %v4711_v0 = vld [vmem:[%s6624_s2 + $0x90] sm:$0xff]  }
  0x18   :  { %91 = vst.msk [vmem:[#allocation2 + $0x118] sm:$0x1] %vm48_vm1, %v4902_v3  ;;  %92 = vst.msk [vmem:[#allocation2 + $0x130] sm:$0x1] %vm48_vm1, %v4902_v3  ;;  %4328 = vmatprep.subr.bf16.mxu0 %v4686_v2  ;;  %v4714_v2 = vld [vmem:[%s6624_s2 + $0xc8] sm:$0xff]  }
  0x19   :  { %93 = vst.msk [vmem:[#allocation2 + $0x148] sm:$0x1] %vm48_vm1, %v4902_v3  ;;  %94 = vst.msk [vmem:[#allocation2 + $0x160] sm:$0x1] %vm48_vm1, %v4902_v3 }
  0x1a   :  { %95 = vst.msk [vmem:[#allocation2 + $0x178] sm:$0x1] %vm48_vm1, %v4902_v3  ;;  %96 = vst.msk [vmem:[#allocation2 + $0x190] sm:$0x1] %vm48_vm1, %v4902_v3  ;;  %193 = vrot.lane.b32.xlu0 %v175_v36, %s4903_s1 }
  0x1b   :  { %97 = vst.msk [vmem:[#allocation2 + $0x1a8] sm:$0x1] %vm48_vm1, %v4902_v3  ;;  %98 = vst.msk [vmem:[#allocation2 + $0x1c0] sm:$0x1] %vm48_vm1, %v4902_v3  ;;  %v5194_v49 = vld [vmem:[#allocation2 + $0x21] sm:$0xff]  ;;  %v5196_v50 = vld [vmem:[#allocation2 + $0x39] sm:$0xff] }
  0x1c   :  { %122 = vst.msk [vmem:[#allocation2 + $0x98] sm:$0xff] %vm45_vm0, %v105_v6  ;;  %123 = vst.msk [vmem:[#allocation2 + $0xb0] sm:$0xff] %vm45_vm0, %v106_v7  ;;  %v509_v58 = vpack.c.bf16 %v5196_v50, %v5194_v49  ;;  %v5224_v62 = vld [vmem:[#allocation2 + $0x51] sm:$0xff]  ;;  %v5226_v63 = vld [vmem:[#allocation2 + $0x69] sm:$0xff] }
  0x1d   :  { %80 = vst.msk [vmem:[#allocation2 + $0x10] sm:$0x1] %vm48_vm1, %v4902_v3  ;;  %89 = vst.msk [vmem:[#allocation2 + $0xe8] sm:$0x1] %vm48_vm1, %v4902_v3  ;;  %v4689_v6 = vld [vmem:[%s6624_s2 + $0xb8] sm:$0xff]  }
  0x1e   :  { %90 = vst.msk [vmem:[#allocation2 + $0x100] sm:$0x1] %vm48_vm1, %v4902_v3  ;;  %99 = vst.msk [vmem:[#allocation2 + $0x1d8] sm:$0x1] %vm48_vm1, %v4902_v3  ;;  %v4688_v3 = vld [vmem:[%s6624_s2 + $0xf8] sm:$0xff]  }
  0x1f   :  { %124 = vst.msk [vmem:[#allocation2 + $0xc8] sm:$0xff] %vm45_vm0, %v107_v8  ;;  %125 = vst.msk [vmem:[#allocation2 + $0x110] sm:$0xff] %vm45_vm0, %v108_v9  ;;  %4384 = vmatprep.subr.bf16.mxu1 %v4688_v3  ;;  %v510_v9 = vpack.c.bf16 %v5226_v63, %v5224_v62 }
  0x20   :  { %126 = vst.msk [vmem:[#allocation2 + $0x128] sm:$0xff] %vm45_vm0, %v109_v10  ;;  %127 = vst.msk [vmem:[#allocation2 + $0x140] sm:$0xff] %vm45_vm0, %v110_v11  ;;  %v4687_v10 = vld [vmem:[%s6624_s2 + $0x18] sm:$0xff]   ;;  %4385 = vmatpush3.bf16.msra.mxu1 %v4689_v6  ;;  %v4690_v11 = vld [vmem:[%s6624_s2 + $0x50] sm:$0xff]  }
  0x21   :  { %128 = vst.msk [vmem:[#allocation2 + $0x158] sm:$0xff] %vm45_vm0, %v111_v12  ;;  %129 = vst.msk [vmem:[#allocation2 + $0x170] sm:$0xff] %vm45_vm0, %v112_v13  ;;  %v4692_v12 = vld [vmem:[%s6624_s2 + $0xf0] sm:$0xff]   ;;  %4329 = vmatpush3.bf16.msra.mxu0 %v4687_v10 }
  0x22   :  { %130 = vst.msk [vmem:[#allocation2 + $0x188] sm:$0xff] %vm45_vm0, %v113_v14  ;;  %131 = vst.msk [vmem:[#allocation2 + $0x1a0] sm:$0xff] %vm45_vm0, %v114_v15  ;;  %v5264_v14 = vld [vmem:[#allocation2 + $0x81] sm:$0xff]  ;;  %4330 = vmatprep.subr.bf16.mxu0 %v4690_v11  ;;  %4386 = vmatprep.subr.bf16.mxu1 %v4692_v12 }
  0x23   :  { %132 = vst.msk [vmem:[#allocation2 + $0x1b8] sm:$0xff] %vm45_vm0, %v115_v16  ;;  %v5169_v32 = vld [vmem:[#allocation2 + $0x97] sm:$0xff]  ;;  %v5178_v37 = vld [vmem:[#allocation2 + $0xaf] sm:$0xff] }
  0x24   :  { %v343_v35 = vpack.c.bf16 %v5169_v32, %v5167_v31  ;;  %v163_v39 = vld [vmem:[#allocation2 + $0x98] sm:$0xff]  ;;  %v164_v40 = vld [vmem:[#allocation2 + $0xb0] sm:$0xff] }
  0x25   :  { %v5183_v42 = vpack.c.bf16 %v164_v40, %v163_v39  ;;  %v5266_v15 = vld [vmem:[#allocation2 + $0x99] sm:$0xff]  ;;  %v4693_v16 = vld [vmem:[%s6624_s2 + $0xb0] sm:$0xff]   ;;  %4331 = vmatpush3.bf16.msra.mxu0 %v4691_v18 }
  0x26   :  { %v332_v38 = vld [vmem:[#allocation2 + $0xc7] sm:$0xff]  ;;  %361 = vrot.lane.b32.xlu1 %v343_v35, %s4903_s1  ;;  %v5185_v43 = vld [vmem:[#allocation2 + $0x10f] sm:$0xff]  ;;  %4387 = vmatpush3.bf16.msra.mxu1 %v4693_v16  ;;  %v511_v35 = vpack.c.bf16 %v5266_v15, %v5264_v14 }
  0x27   :  { %v344_v41 = vpack.c.bf16 %v332_v38, %v5178_v37  ;;  %v5187_v44 = vld [vmem:[#allocation2 + $0x127] sm:$0xff]  ;;  %v166_v46 = vld [vmem:[#allocation2 + $0x110] sm:$0xff]  ;;  %195 = vrot.lane.b32.xlu0 %v5183_v42, %s4903_s1  ;;  %v5201_v52 = vld [vmem:[#allocation2 + $0x13f] sm:$0xff]  ;;  %4332 = vmatprep.subr.bf16.mxu0 %v4694_v20 }
  0x28   :  { %v345_v47 = vpack.c.bf16 %v5187_v44, %v5185_v43  ;;  %v177_v48 = vpack.c.bf16 %v166_v46, %v165_v45  ;;  %v5203_v53 = vld [vmem:[#allocation2 + $0x157] sm:$0xff]  ;;  %v167_v55 = vld [vmem:[#allocation2 + $0x128] sm:$0xff]  ;;  %v168_v56 = vld [vmem:[#allocation2 + $0x140] sm:$0xff]  ;;  %4388 = vmatprep.subr.bf16.mxu1 %v4696_v26 }
  0x29   :  { %v346_v61 = vpack.c.bf16 %v5203_v53, %v5201_v52  ;;  %v5232_v1 = vpack.c.bf16 %v168_v56, %v167_v55  ;;  %v5240_v4 = vld [vmem:[#allocation2 + $0x16f] sm:$0xff]  ;;  %v5242_v5 = vld [vmem:[#allocation2 + $0x187] sm:$0xff]  ;;  %v169_v7 = vld [vmem:[#allocation2 + $0x158] sm:$0xff] }
  0x2a   :  { %363 = vrot.lane.b32.xlu1 %v344_v41, %s4903_s1  ;;  %v170_v8 = vld [vmem:[#allocation2 + $0x170] sm:$0xff]  ;;  %v347_v13 = vpack.c.bf16 %v5242_v5, %v5240_v4  ;;  %v5280_v21 = vld [vmem:[#allocation2 + $0x19f] sm:$0xff]  ;;  %v171_v29 = vld [vmem:[#allocation2 + $0x188] sm:$0xff]  ;;  %4389 = vmatpush3.bf16.msra.mxu1 %v4697_v34 }
  0x2b   :  { %197 = vrot.lane.b32.xlu0 %v177_v48, %s4903_s1  ;;  %v5272_v17 = vpack.c.bf16 %v170_v8, %v169_v7  ;;  %v172_v30 = vld [vmem:[#allocation2 + $0x1a0] sm:$0xff]  ;;  %v5299_v39 = vld [vmem:[#allocation2 + $0xc8] sm:$0xff]  ;;  %v5307_v46 = vld [vmem:[#allocation2 + $0xb1] sm:$0xff] }
  0x2c   :  { %v4698_v38 = vld [vmem:[%s6624_s2 + $0x40] sm:$0xff]   ;;  %v180_v54 = vpack.c.bf16 %v172_v30, %v171_v29  ;;  %v4706_v55 = vld [vmem:[%s6624_s2 + $0xd8] sm:$0xff]   ;;  %v4715_v8 = vld [vmem:[%s6624_s2 + $0x88] sm:$0xff]  }
  0x2d   :  { %v669_v40 = vld [vmem:[#allocation2 + $0xe0] sm:$0xff]  ;;  %v4707_v56 = vld [vmem:[%s6624_s2 + $0x98] sm:$0xff]   ;;  %v5366_v12 = vld [vmem:[#allocation2 + $0x189] sm:$0xff] }
  0x2e   :  { %365 = vrot.lane.b32.xlu1 %v345_v47, %s4903_s1  ;;  %v4700_v41 = vld [vmem:[%s6624_s2 + $0xe0] sm:$0xff]   ;;  %v500_v47 = vld [vmem:[#allocation2 + $0xc9] sm:$0xff]  ;;  %v681_v57 = vpack.c.bf16 %v669_v40, %v5299_v39  ;;  %v5334_v60 = vld [vmem:[#allocation2 + $0x111] sm:$0xff] }
  0x2f   :  { %525 = vrot.lane.b32.xlu0 %v509_v58, %s4903_s1  ;;  %v4699_v48 = vld [vmem:[%s6624_s2] sm:$0xff]   ;;  %4390 = vmatprep.subr.bf16.mxu1 %v4700_v41  ;;  %v4710_v58 = vld [vmem:[%s6624_s2 + $0xd0] sm:$0xff]   ;;  %v512_v59 = vpack.c.bf16 %v500_v47, %v5307_v46 }
  0x30   :  { %4391 = vmatpush3.bf16.msra.mxu1 %v4701_v51  ;;  %v5349_v6 = vld [vmem:[#allocation2 + $0x141] sm:$0xff]  ;;  %v5351_v7 = vld [vmem:[#allocation2 + $0x159] sm:$0xff]  ;;  %v5364_v11 = vld [vmem:[#allocation2 + $0x171] sm:$0xff] }
  0x31   :  { %4392 = vmatprep.subr.bf16.mxu1 %v4706_v55  ;;  %v514_v10 = vpack.c.bf16 %v5351_v7, %v5349_v6  ;;  %v515_v16 = vpack.c.bf16 %v5366_v12, %v5364_v11  ;;  %v677_v18 = vld [vmem:[#allocation2 + $0x1d0] sm:$0xff]  ;;  %v5376_v20 = vld [vmem:[#allocation2 + $0x1a1] sm:$0xff]  ;;  %v806_v29 = vld [vmem:[#allocation2 + $0x39] sm:$0xff] }
  0x32   :  { %694 = vrot.lane.b32.xlu1 %v174_v22, %s4903_s1  ;;  %v340_v22 = vld [vmem:[#allocation2 + $0x1b7] sm:$0xff]  ;;  %v808_v34 = vld [vmem:[#allocation2 + $0x69] sm:$0xff] }
  0x33   :  { %199 = vrot.lane.b32.xlu0 %v5232_v1, %s4903_s1  ;;  %v348_v45 = vpack.c.bf16 %v340_v22, %v5280_v21  ;;  %v508_v22 = vld [vmem:[#allocation2 + $0x1b9] sm:$0xff]  ;;  %v807_v30 = vld [vmem:[#allocation2 + $0x51] sm:$0xff] }
  0x34   :  { %4393 = vmatpush3.bf16.msra.mxu1 %v4707_v56  ;;  %v811_v55 = vld [vmem:[#allocation2 + $0xb1] sm:$0xff] }
  0x35   :  { %4394 = vmatprep.subr.bf16.mxu1 %v4710_v58  ;;  %v813_v58 = vld [vmem:[#allocation2 + $0xe1] sm:$0xff] }
  0x36   :  { %367 = vrot.lane.b32.xlu1 %v346_v61, %s4903_s1  ;;  %v5336_v61 = vld [vmem:[#allocation2 + $0x129] sm:$0xff] }
  0x37   :  { %527 = vrot.lane.b32.xlu0 %v510_v9, %s4903_s1  ;;  %v513_v3 = vpack.c.bf16 %v5336_v61, %v5334_v60  ;;  %v4716_v9 = vld [vmem:[%s6624_s2 + $0xc0] sm:$0xff]  }
  0x38   :  { %4395 = vmatpush3.bf16.msra.mxu1 %v4711_v0 }
  0x39   :  { %4396 = vmatprep.subr.bf16.mxu1 %v4714_v2 }
  0x3a   :  { %696 = vrot.lane.b32.xlu1 %v175_v36, %s4903_s1  ;;  %v4695_v36 = vld [vmem:[%s6624_s2 + $0x8] sm:$0xff]  }
  0x3b   :  { %201 = vrot.lane.b32.xlu0 %v5272_v17, %s4903_s1  ;;  %4333 = vmatpush3.bf16.msra.mxu0 %v4695_v36  ;;  %v822_v36 = vpack.c.bf16 %v807_v30, %v806_v29 }
  0x3c   :  { %4334 = vmatprep.subr.bf16.mxu0 %v4698_v38  ;;  %4397 = vmatpush3.bf16.msra.mxu1 %v4715_v8 }
  0x3d   :  { %4398 = vmatprep.subr.bf16.mxu1 %v4716_v9  ;;  %v832_v40 = vsel %vm45_vm0, %v822_v36, 0 }
  0x3e   :  { %369 = vrot.lane.b32.xlu1 %v347_v13, %s4903_s1  ;;  %v4717_v13 = vld [vmem:[%s6624_s2 + $0x80] sm:$0xff]   ;;  %v4063_v47 = vcombine.high %v832_v40, %v832_v40 }
  0x3f   :  { %529 = vrot.lane.b32.xlu0 %v511_v35, %s4903_s1  ;;  %4335 = vmatpush3.bf16.msra.mxu0 %v4699_v48  ;;  %v809_v35 = vld [vmem:[#allocation2 + $0x81] sm:$0xff] }
  0x40   :  { %4399 = vmatpush3.bf16.msra.mxu1 %v4717_v13  ;;  %v823_v38 = vpack.c.bf16 %v809_v35, %v808_v34  ;;  %904 = vst [vmem:[#allocation3 + $0x24] sm:$0xf] %v4063_v47  ;;  %v814_v13 = vld [vmem:[#allocation2 + $0x129] sm:$0xff]  ;;  %v821_v47 = vld [vmem:[#allocation2 + $0x1d1] sm:$0xff] }
  0x42   :  { %698 = vrot.lane.b32.xlu1 %v5183_v42, %s4903_s1  ;;  %v5319_v42 = vld [vmem:[%s6624_s2 + $0x138] sm:$0xff]   ;;  %v834_v41 = vsel %vm45_vm0, %v823_v38, 0  ;;  %v818_v38 = vld [vmem:[#allocation2 + $0x189] sm:$0xff] }
  0x43   :  { %203 = vrot.lane.b32.xlu0 %v180_v54, %s4903_s1  ;;  %4608 = vmatprep.subr.bf16.mxu0 %v5319_v42  ;;  %v4064_v48 = vcombine.low %v834_v41, %v834_v41  ;;  %v4065_v51 = vcombine.high %v834_v41, %v834_v41 }
  0x45   :  { %905 = vst [vmem:[#allocation3 + $0x38] sm:$0xf] %v4064_v48  ;;  %906 = vst [vmem:[#allocation3 + $0x4c] sm:$0xf] %v4065_v51 }
  0x46   :  { %371 = vrot.lane.b32.xlu1 %v348_v45, %s4903_s1  ;;  %v4062_v45 = vcombine.low %v832_v40, %v832_v40  ;;  %v819_v40 = vld [vmem:[#allocation2 + $0x1a1] sm:$0xff] }
  0x47   :  { %531 = vrot.lane.b32.xlu0 %v512_v59, %s4903_s1  ;;  %v828_v41 = vpack.c.bf16 %v819_v40, %v818_v38 }
  0x48   :  { %903 = vst [vmem:[#allocation3 + $0x10] sm:$0xf] %v4062_v45  ;;  %v820_v45 = vld [vmem:[#allocation2 + $0x1b9] sm:$0xff] }
  0x49   :  { %v829_v48 = vpack.c.bf16 %v821_v47, %v820_v45  ;;  %v844_v51 = vsel %vm45_vm0, %v828_v41, 0 }
  0x4a   :  { %700 = vrot.lane.b32.xlu1 %v681_v57, %s4903_s1  ;;  %v812_v57 = vld [vmem:[#allocation2 + $0xc9] sm:$0xff] }
  0x4b   :  { %533 = vrot.lane.b32.xlu0 %v513_v3, %s4903_s1  ;;  %v825_v59 = vpack.c.bf16 %v813_v58, %v812_v57 }
  0x4d   :  { %v838_v8 = vsel %vm45_vm0, %v825_v59, 0 }
  0x4e   :  { %702 = vrot.lane.b32.xlu1 %v5232_v1, %s4903_s1  ;;  %v676_v1 = vld [vmem:[#allocation2 + $0x1b8] sm:$0xff]  ;;  %v4068_v9 = vcombine.low %v838_v8, %v838_v8 }
  0x4f   :  { %535 = vrot.lane.b32.xlu0 %v514_v10, %s4903_s1  ;;  %v685_v26 = vpack.c.bf16 %v677_v18, %v676_v1  ;;  %v4069_v10 = vcombine.high %v838_v8, %v838_v8  ;;  %v815_v1 = vld [vmem:[#allocation2 + $0x141] sm:$0xff] }
  0x50   :  { %909 = vst [vmem:[#allocation3 + $0x88] sm:$0xf] %v4068_v9  ;;  %v826_v18 = vpack.c.bf16 %v815_v1, %v814_v13 }
  0x51   :  { %910 = vst [vmem:[#allocation3 + $0x9c] sm:$0xf] %v4069_v10 }
  0x52   :  { %704 = vrot.lane.b32.xlu1 %v5272_v17, %s4903_s1  ;;  %v516_v17 = vpack.c.bf16 %v508_v22, %v5376_v20  ;;  %v817_v22 = vld [vmem:[#allocation2 + $0x171] sm:$0xff]  ;;  %v840_v29 = vsel %vm45_vm0, %v826_v18, 0 }
  0x53   :  { %537 = vrot.lane.b32.xlu0 %v515_v16, %s4903_s1  ;;  %v816_v16 = vld [vmem:[#allocation2 + $0x159] sm:$0xff]  ;;  %v4070_v30 = vcombine.low %v840_v29, %v840_v29  ;;  %v4071_v34 = vcombine.high %v840_v29, %v840_v29 }
  0x55   :  { %911 = vst [vmem:[#allocation3 + $0xb0] sm:$0xf] %v4070_v30  ;;  %912 = vst [vmem:[#allocation3 + $0xc4] sm:$0xf] %v4071_v34 }
  0x56   :  { %706 = vrot.lane.b32.xlu1 %v180_v54, %s4903_s1  ;;  %v810_v54 = vld [vmem:[#allocation2 + $0x99] sm:$0xff] }
  0x57   :  { %539 = vrot.lane.b32.xlu0 %v516_v17, %s4903_s1  ;;  %v824_v56 = vpack.c.bf16 %v811_v55, %v810_v54  ;;  %v4074_v54 = vcombine.low %v844_v51, %v844_v51  ;;  %v4075_v55 = vcombine.high %v844_v51, %v844_v51 }
  0x59   :  { %v836_v0 = vsel %vm45_vm0, %v824_v56, 0  ;;  %v846_v56 = vsel %vm45_vm0, %v829_v48, 0  ;;  %915 = vst [vmem:[#allocation3 + $0x100] sm:$0xf] %v4074_v54  ;;  %916 = vst [vmem:[#allocation3 + $0x114] sm:$0xf] %v4075_v55 }
  0x5a   :  { %708 = vrot.lane.b32.xlu1 %v685_v26, %s4903_s1  ;;  %v4066_v2 = vcombine.low %v836_v0, %v836_v0  ;;  %v4067_v3 = vcombine.high %v836_v0, %v836_v0  ;;  %v827_v26 = vpack.c.bf16 %v817_v22, %v816_v16  ;;  %v4076_v57 = vcombine.low %v846_v56, %v846_v56 }
  0x5b   :  { %v4077_v58 = vcombine.high %v846_v56, %v846_v56 }
  0x5c   :  { %907 = vst [vmem:[#allocation3 + $0x60] sm:$0xf] %v4066_v2  ;;  %908 = vst [vmem:[#allocation3 + $0x74] sm:$0xf] %v4067_v3  ;;  %v842_v17 = vsel %vm45_vm0, %v827_v26, 0 }
  0x5d   :  { %v4072_v35 = vcombine.low %v842_v17, %v842_v17  ;;  %v4073_v36 = vcombine.high %v842_v17, %v842_v17  ;;  %917 = vst [vmem:[#allocation3 + $0x128] sm:$0xf] %v4076_v57  ;;  %918 = vst [vmem:[#allocation3 + $0x13c] sm:$0xf] %v4077_v58 }
  0x5f   :  { %913 = vst [vmem:[#allocation3 + $0xd8] sm:$0xf] %v4072_v35  ;;  %914 = vst [vmem:[#allocation3 + $0xec] sm:$0xf] %v4073_v36 }
  0x60   :  { %18 = vsyncpa [#allocation6], 0  ;;  %v133_v59 = vld [vmem:[#allocation2 + $0x7] sm:$0xff]  ;;  %v5393_v0 = vpack.c.bf16 %v5152_v24, %v5159_v28  ;;  %v318_v13 = vpack.c.bf16 %v5224_v62, %v5196_v50  ;;  %v319_v17 = vpack.c.bf16 %v5264_v14, %v5226_v63  ;;  %v320_v63 = vpack.c.bf16 %v5307_v46, %v5266_v15  ;;  %v141_v51 = vld [vmem:[#allocation2 + $0xf7] sm:$0xff] }
  0x61   :  { %v149_v2 = vpack.c.bf16 %v5157_v27, %v133_v59  ;;  %v301_v3 = vld [vmem:[#allocation2 + $0x9] sm:$0xff] }
  0x62   :  { %v317_v22 = vpack.c.bf16 %v5194_v49, %v301_v3  ;;  %v5408_v49 = vpack.c.bf16 %v5167_v31, %v5154_v25  ;;  %v5417_v25 = vpack.c.bf16 %v5178_v37, %v5169_v32  ;;  %v309_v31 = vld [vmem:[#allocation2 + $0xf9] sm:$0xff]  ;;  %v153_v37 = vpack.c.bf16 %v5185_v43, %v141_v51 }
  0x63   :  { %v321_v55 = vpack.c.bf16 %v5334_v60, %v309_v31 }
  0x7f   :  { %v190_v10 = vpop.permute.xlu0 %189 }
  0x80   :  { %v192_v8 = vpop.permute.xlu1 %191  ;;  %v207_v18 = vsel %vm45_vm0, %v149_v2, %v190_v10 }
  0x81   :  { %v210_v9 = vsel %vm45_vm0, %v5393_v0, %v192_v8  ;;  %v3998_v26 = vcombine.low %v207_v18, %v207_v18  ;;  %v3999_v24 = vcombine.high %v207_v18, %v207_v18  ;;  %v485_v18 = vpack.c.bf16 %v5147_v19, %v5150_v23  ;;  %v4722_v19 = vld [vmem:[%s6624_s2 + $0x128] sm:$0xff]  }
  0x82   :  { %v4000_v1 = vcombine.low %v210_v9, %v210_v9  ;;  %v4001_v16 = vcombine.high %v210_v9, %v210_v9 }
  0x83   :  { %285 = vst [vmem:[#allocation3] sm:$0xf] %v3998_v26  ;;  %286 = vst [vmem:[#allocation3 + $0x14] sm:$0xf] %v3999_v24 }
  0x84   :  { %287 = vst [vmem:[#allocation3 + $0x28] sm:$0xf] %v4000_v1  ;;  %288 = vst [vmem:[#allocation3 + $0x3c] sm:$0xf] %v4001_v16  ;;  %v360_v27 = vpop.permute.xlu1 %359 }
  0x85   :  { %v378_v28 = vsel %vm45_vm0, %v318_v13, %v360_v27  ;;  %v4712_v13 = vld [vmem:[%s6624_s2 + $0x130] sm:$0xff]  }
  0x86   :  { %v4016_v50 = vcombine.low %v378_v28, %v378_v28  ;;  %v4017_v62 = vcombine.high %v378_v28, %v378_v28 }
  0x88   :  { %v358_v29 = vpop.permute.xlu0 %357  ;;  %455 = vst [vmem:[#allocation3 + $0x2c] sm:$0xf] %v4016_v50  ;;  %456 = vst [vmem:[#allocation3 + $0x40] sm:$0xf] %v4017_v62  ;;  %v154_v50 = vpack.c.bf16 %v5201_v52, %v5187_v44 }
  0x89   :  { %v375_v30 = vsel %vm45_vm0, %v317_v22, %v358_v29  ;;  %v322_v29 = vpack.c.bf16 %v5349_v6, %v5336_v61 }
  0x8a   :  { %v4014_v34 = vcombine.low %v375_v30, %v375_v30  ;;  %v4015_v35 = vcombine.high %v375_v30, %v375_v30  ;;  %v4705_v60 = vld [vmem:[#allocation3] ss:$20 sps:$4 sm:$0xff]  }
  0x8c   :  { %453 = vst [vmem:[#allocation3 + $0x4] sm:$0xf] %v4014_v34  ;;  %454 = vst [vmem:[#allocation3 + $0x18] sm:$0xf] %v4015_v35  ;;  %v194_v40 = vpop.permute.xlu0 %193  ;;  %v4713_v35 = vld [vmem:[#allocation3 + $0x28] ss:$20 sps:$4 sm:$0xff]  }
  0x8d   :  { %v213_v45 = vsel %vm45_vm0, %v5408_v49, %v194_v40  ;;  %v4873_v40 = vld [vmem:[#allocation2 + $0x50] sm:$0xff] }
  0x8e   :  { %v4002_v47 = vcombine.low %v213_v45, %v213_v45  ;;  %v4003_v48 = vcombine.high %v213_v45, %v213_v45 }
  0x8f   :  { %v4708_v2 = vld [vmem:[#allocation3 + $0x2c] ss:$20 sps:$4 sm:$0xff]  }
  0x90   :  { %289 = vst [vmem:[#allocation3 + $0x50] sm:$0xf] %v4002_v47  ;;  %290 = vst [vmem:[#allocation3 + $0x64] sm:$0xf] %v4003_v48  ;;  %v323_v48 = vpack.c.bf16 %v5364_v11, %v5351_v7 }
  0x93   :  { %v4702_v8 = vld [vmem:[#allocation3 + $0x4] ss:$20 sps:$4 sm:$0xff]  }
  0x94   :  { %1527 = vmatprep.mubr.bf16.mxu0 %v4702_v8  ;;  %v4875_v8 = vld [vmem:[#allocation2 + $0x98] sm:$0xff] }
  0x95   :  { %1528 = vmatmul.mubr.bf16.vlgmr.msra.gmra.mxu0 %v4705_v60 }
  0x96   :  { %4609 = vmatpush3.bf16.msra.mxu0 %v5319_v42  ;;  %1535 = vmatprep.mubr.bf16.mxu0 %v4708_v2 }
  0x97   :  { %4610 = vmatprep.subr.bf16.mxu0 %v4712_v13 }
  0x98   :  { %v362_v36 = vpop.permute.xlu1 %361 }
  0x99   :  { %v381_v38 = vsel %vm45_vm0, %v319_v17, %v362_v36  ;;  %v196_v46 = vpop.permute.xlu0 %195  ;;  %v4729_v36 = vld [vmem:[%s6624_s2 + $0x120] sm:$0xff]  }
  0x9a   :  { %v4018_v14 = vcombine.low %v381_v38, %v381_v38  ;;  %v4019_v41 = vcombine.high %v381_v38, %v381_v38  ;;  %v216_v32 = vsel %vm45_vm0, %v5417_v25, %v196_v46  ;;  %4611 = vmatpush3.bf16.msra.mxu0 %v4712_v13  ;;  %v155_v46 = vpack.c.bf16 %v5240_v4, %v5203_v53  ;;  %v4743_v53 = vld [vmem:[%s6624_s2 + $0x110] sm:$0xff]  }
  0x9b   :  { %v4004_v58 = vcombine.low %v216_v32, %v216_v32  ;;  %v4005_v59 = vcombine.high %v216_v32, %v216_v32  ;;  %4612 = vmatprep.subr.bf16.mxu0 %v4722_v19 }
  0x9c   :  { %457 = vst [vmem:[#allocation3 + $0x54] sm:$0xf] %v4018_v14  ;;  %458 = vst [vmem:[#allocation3 + $0x68] sm:$0xf] %v4019_v41  ;;  %v364_v54 = vpop.permute.xlu1 %363 }
  0x9d   :  { %v384_v15 = vsel %vm45_vm0, %v320_v63, %v364_v54  ;;  %291 = vst [vmem:[#allocation3 + $0x78] sm:$0xf] %v4004_v58  ;;  %292 = vst [vmem:[#allocation3 + $0x8c] sm:$0xf] %v4005_v59  ;;  %v198_v10 = vpop.permute.xlu0 %197  ;;  %v486_v63 = vpack.c.bf16 %v5171_v33, %v4873_v40  ;;  %1536 = vmatmul.mubr.bf16.gmra.mxu0 %v4713_v35  ;;  %v4736_v33 = vld [vmem:[%s6624_s2 + $0x118] sm:$0xff]   ;;  %v646_v35 = vld [vmem:[#allocation2 + $0x127] sm:$0xff] }
  0x9e   :  { %v4020_v56 = vcombine.low %v384_v15, %v384_v15  ;;  %v4021_v57 = vcombine.high %v384_v15, %v384_v15  ;;  %v219_v43 = vsel %vm45_vm0, %v153_v37, %v198_v10  ;;  %4613 = vmatpush3.bf16.msra.mxu0 %v4722_v19 }
  0x9f   :  { %v4006_v22 = vcombine.low %v219_v43, %v219_v43  ;;  %v4007_v26 = vcombine.high %v219_v43, %v219_v43  ;;  %4614 = vmatprep.subr.bf16.mxu0 %v4729_v36  ;;  %v324_v43 = vpack.c.bf16 %v5376_v20, %v5366_v12 }
  0xa0   :  { %459 = vst [vmem:[#allocation3 + $0x7c] sm:$0xf] %v4020_v56  ;;  %460 = vst [vmem:[#allocation3 + $0x90] sm:$0xf] %v4021_v57  ;;  %v366_v3 = vpop.permute.xlu1 %365  ;;  %v4723_v57 = vld [vmem:[#allocation3 + $0x50] ss:$20 sps:$4 sm:$0xff]  }
  0xa1   :  { %v387_v9 = vsel %vm45_vm0, %v321_v55, %v366_v3  ;;  %293 = vst [vmem:[#allocation3 + $0xa0] sm:$0xf] %v4006_v22  ;;  %294 = vst [vmem:[#allocation3 + $0xb4] sm:$0xf] %v4007_v26  ;;  %v526_v28 = vpop.permute.xlu0 %525  ;;  %v4874_v3 = vld [vmem:[#allocation2 + $0x80] sm:$0xff] }
  0xa2   :  { %v4022_v1 = vcombine.low %v387_v9, %v387_v9  ;;  %v4023_v16 = vcombine.high %v387_v9, %v387_v9  ;;  %v543_v42 = vsel %vm45_vm0, %v485_v18, %v526_v28  ;;  %4615 = vmatpush3.bf16.msra.mxu0 %v4729_v36  ;;  %v487_v9 = vpack.c.bf16 %v4875_v8, %v4874_v3  ;;  %v4750_v18 = vld [vmem:[%s6624_s2 + $0x108] sm:$0xff]   ;;  %v645_v28 = vld [vmem:[#allocation2 + $0xdf] sm:$0xff] }
  0xa3   :  { %v4030_v62 = vcombine.low %v543_v42, %v543_v42  ;;  %v4031_v30 = vcombine.high %v543_v42, %v543_v42  ;;  %v4718_v34 = vld [vmem:[#allocation3 + $0x54] ss:$20 sps:$4 sm:$0xff]   ;;  %4616 = vmatprep.subr.bf16.mxu0 %v4736_v33  ;;  %v651_v8 = vld [vmem:[#allocation2 + $0x19f] sm:$0xff] }
  0xa4   :  { %461 = vst [vmem:[#allocation3 + $0xa4] sm:$0xf] %v4022_v1  ;;  %462 = vst [vmem:[#allocation3 + $0xb8] sm:$0xf] %v4023_v16  ;;  %v695_v24 = vpop.permute.xlu1 %694  ;;  %1543 = vmatprep.mubr.bf16.mxu0 %v4718_v34  ;;  %v650_v3 = vld [vmem:[#allocation2 + $0x187] sm:$0xff] }
  0xa5   :  { %v712_v27 = vsel %vm45_vm0, %v5393_v0, %v695_v24  ;;  %621 = vst [vmem:[#allocation3 + $0x8] sm:$0xf] %v4030_v62  ;;  %622 = vst [vmem:[#allocation3 + $0x1c] sm:$0xf] %v4031_v30  ;;  %v200_v6 = vpop.permute.xlu0 %199  ;;  %1544 = vmatmul.mubr.bf16.gmra.mxu0 %v4723_v57  ;;  %v4876_v62 = vld [vmem:[#allocation2 + $0xc7] sm:$0xff] }
  0xa6   :  { %v4046_v23 = vcombine.low %v712_v27, %v712_v27  ;;  %v4047_v17 = vcombine.high %v712_v27, %v712_v27  ;;  %v222_v52 = vsel %vm45_vm0, %v154_v50, %v200_v6  ;;  %4617 = vmatpush3.bf16.msra.mxu0 %v4736_v33  ;;  %v156_v27 = vpack.c.bf16 %v5280_v21, %v5242_v5  ;;  %v4757_v5 = vld [vmem:[%s6624_s2 + $0x100] sm:$0xff]   ;;  %v648_v33 = vld [vmem:[#allocation2 + $0x157] sm:$0xff] }
  0xa7   :  { %v4008_v14 = vcombine.low %v222_v52, %v222_v52  ;;  %v4009_v41 = vcombine.high %v222_v52, %v222_v52  ;;  %4618 = vmatprep.subr.bf16.mxu0 %v4743_v53  ;;  %v657_v30 = vpack.c.bf16 %v645_v28, %v4876_v62  ;;  %v652_v28 = vld [vmem:[#allocation2 + $0x1b7] sm:$0xff] }
  0xa8   :  { %790 = vst [vmem:[#allocation3 + $0xc] sm:$0xf] %v4046_v23  ;;  %791 = vst [vmem:[#allocation3 + $0x20] sm:$0xf] %v4047_v17  ;;  %v368_v0 = vpop.permute.xlu1 %367 }
  0xa9   :  { %v390_v61 = vsel %vm45_vm0, %v322_v29, %v368_v0  ;;  %295 = vst [vmem:[#allocation3 + $0xc8] sm:$0xf] %v4008_v14  ;;  %296 = vst [vmem:[#allocation3 + $0xdc] sm:$0xf] %v4009_v41  ;;  %v528_v47 = vpop.permute.xlu0 %527  ;;  %v4878_v14 = vld [vmem:[#allocation2 + $0x13f] sm:$0xff] }
  0xaa   :  { %v4024_v38 = vcombine.low %v390_v61, %v390_v61  ;;  %v4025_v44 = vcombine.high %v390_v61, %v390_v61  ;;  %v546_v15 = vsel %vm45_vm0, %v486_v63, %v528_v47  ;;  %4619 = vmatpush3.bf16.msra.mxu0 %v4743_v53  ;;  %v4877_v61 = vld [vmem:[#allocation2 + $0xb0] sm:$0xff]  ;;  %v658_v41 = vpack.c.bf16 %v4878_v14, %v646_v35  ;;  %v4879_v47 = vld [vmem:[#allocation2 + $0x128] sm:$0xff] }
  0xab   :  { %v4032_v55 = vcombine.low %v546_v15, %v546_v15  ;;  %v4033_v56 = vcombine.high %v546_v15, %v546_v15  ;;  %v4732_v23 = vld [vmem:[#allocation3 + $0xa4] ss:$20 sps:$4 sm:$0xff]   ;;  %4620 = vmatprep.subr.bf16.mxu0 %v4750_v18  ;;  %v488_v6 = vpack.c.bf16 %v5299_v39, %v4877_v61 }
  0xac   :  { %463 = vst [vmem:[#allocation3 + $0xcc] sm:$0xf] %v4024_v38  ;;  %464 = vst [vmem:[#allocation3 + $0xe0] sm:$0xf] %v4025_v44  ;;  %v697_v45 = vpop.permute.xlu1 %696  ;;  %v4724_v58 = vld [vmem:[#allocation3 + $0x8] ss:$20 sps:$4 sm:$0xff]  }
  0xad   :  { %v715_v31 = vsel %vm45_vm0, %v5408_v49, %v697_v45  ;;  %v4725_v49 = vld [vmem:[#allocation3 + $0x7c] ss:$20 sps:$4 sm:$0xff]   ;;  %623 = vst [vmem:[#allocation3 + $0x30] sm:$0xf] %v4032_v55  ;;  %624 = vst [vmem:[#allocation3 + $0x44] sm:$0xf] %v4033_v56  ;;  %v202_v37 = vpop.permute.xlu0 %201 }
  0xae   :  { %v4048_v51 = vcombine.low %v715_v31, %v715_v31  ;;  %v4049_v54 = vcombine.high %v715_v31, %v715_v31  ;;  %v225_v2 = vsel %vm45_vm0, %v155_v46, %v202_v37  ;;  %1551 = vmatprep.mubr.bf16.mxu0 %v4725_v49  ;;  %v477_v44 = vld [vmem:[#allocation2 + $0x110] sm:$0xff]  ;;  %4621 = vmatpush3.bf16.msra.mxu0 %v4750_v18  ;;  %v479_v55 = vld [vmem:[#allocation2 + $0x140] sm:$0xff]  ;;  %v480_v56 = vld [vmem:[#allocation2 + $0x158] sm:$0xff] }
  0xaf   :  { %v4720_v7 = vld [vmem:[#allocation3 + $0xc] ss:$20 sps:$4 sm:$0xff]   ;;  %v4010_v10 = vcombine.low %v225_v2, %v225_v2  ;;  %v4011_v60 = vcombine.high %v225_v2, %v225_v2  ;;  %4622 = vmatprep.subr.bf16.mxu0 %v4757_v5  ;;  %v490_v2 = vpack.c.bf16 %v480_v56, %v479_v55  ;;  %v660_v18 = vpack.c.bf16 %v651_v8, %v650_v3 }
  0xb0   :  { %792 = vst [vmem:[#allocation3 + $0x34] sm:$0xf] %v4048_v51  ;;  %793 = vst [vmem:[#allocation3 + $0x48] sm:$0xf] %v4049_v54  ;;  %v370_v32 = vpop.permute.xlu1 %369  ;;  %1624 = vmatprep.mubr.bf16.mxu1 %v4720_v7  ;;  %v649_v51 = vld [vmem:[#allocation2 + $0x16f] sm:$0xff] }
  0xb1   :  { %v393_v11 = vsel %vm45_vm0, %v323_v48, %v370_v32  ;;  %1625 = vmatmul.mubr.bf16.vlgmr.msra.gmra.mxu1 %v4724_v58  ;;  %297 = vst [vmem:[#allocation3 + $0xf0] sm:$0xf] %v4010_v10  ;;  %298 = vst [vmem:[#allocation3 + $0x104] sm:$0xf] %v4011_v60  ;;  %v530_v16 = vpop.permute.xlu0 %529  ;;  %v489_v48 = vpack.c.bf16 %v4879_v47, %v477_v44  ;;  %v4737_v32 = vld [vmem:[#allocation3 + $0xa0] ss:$20 sps:$4 sm:$0xff]   ;;  %v659_v58 = vpack.c.bf16 %v649_v51, %v648_v33 }
  0xb2   :  { %v4026_v4 = vcombine.low %v393_v11, %v393_v11  ;;  %v4027_v59 = vcombine.high %v393_v11, %v393_v11  ;;  %v549_v24 = vsel %vm45_vm0, %v487_v9, %v530_v16  ;;  %4623 = vmatpush3.bf16.msra.mxu0 %v4757_v5  ;;  %v481_v60 = vld [vmem:[#allocation2 + $0x170] sm:$0xff]  ;;  %v4764_v56 = vld [vmem:[#allocation3 + $0x38] ss:$20 sps:$4 sm:$0xff]  }
  0xb3   :  { %v4034_v29 = vcombine.low %v549_v24, %v549_v24  ;;  %v4035_v19 = vcombine.high %v549_v24, %v549_v24  ;;  %v4739_v46 = vld [vmem:[#allocation3 + $0xcc] ss:$20 sps:$4 sm:$0xff]  }
  0xb4   :  { %465 = vst [vmem:[#allocation3 + $0xf4] sm:$0xf] %v4026_v4  ;;  %466 = vst [vmem:[#allocation3 + $0x108] sm:$0xf] %v4027_v59  ;;  %v699_v13 = vpop.permute.xlu1 %698  ;;  %v4731_v50 = vld [vmem:[#allocation3 + $0x30] ss:$20 sps:$4 sm:$0xff]  }
  0xb5   :  { %v718_v1 = vsel %vm45_vm0, %v5417_v25, %v699_v13  ;;  %v4730_v25 = vld [vmem:[#allocation3 + $0x78] ss:$20 sps:$4 sm:$0xff]   ;;  %625 = vst [vmem:[#allocation3 + $0x58] sm:$0xf] %v4034_v29  ;;  %626 = vst [vmem:[#allocation3 + $0x6c] sm:$0xf] %v4035_v19  ;;  %v204_v42 = vpop.permute.xlu0 %203 }
  0xb6   :  { %v4050_v22 = vcombine.low %v718_v1, %v718_v1  ;;  %v4051_v26 = vcombine.high %v718_v1, %v718_v1  ;;  %v228_v34 = vsel %vm45_vm0, %v156_v27, %v204_v42  ;;  %1552 = vmatmul.mubr.bf16.gmra.mxu0 %v4730_v25  ;;  %v482_v13 = vld [vmem:[#allocation2 + $0x188] sm:$0xff] }
  0xb7   :  { %v4727_v20 = vld [vmem:[#allocation3 + $0x34] ss:$20 sps:$4 sm:$0xff]   ;;  %v4012_v36 = vcombine.low %v228_v34, %v228_v34  ;;  %v4013_v38 = vcombine.high %v228_v34, %v228_v34  ;;  %1559 = vmatprep.mubr.bf16.mxu0 %v4732_v23  ;;  %v491_v27 = vpack.c.bf16 %v482_v13, %v481_v60 }
  0xb8   :  { %794 = vst [vmem:[#allocation3 + $0x5c] sm:$0xf] %v4050_v22  ;;  %795 = vst [vmem:[#allocation3 + $0x70] sm:$0xf] %v4051_v26  ;;  %v372_v12 = vpop.permute.xlu1 %371  ;;  %1632 = vmatprep.mubr.bf16.mxu1 %v4727_v20  ;;  %v653_v29 = vld [vmem:[#allocation2 + $0x1cf] sm:$0xff]  ;;  %v484_v20 = vld [vmem:[#allocation2 + $0x1b8] sm:$0xff] }
  0xb9   :  { %v396_v17 = vsel %vm45_vm0, %v324_v43, %v372_v12  ;;  %1633 = vmatmul.mubr.bf16.gmra.mxu1 %v4731_v50  ;;  %299 = vst [vmem:[#allocation3 + $0x118] sm:$0xf] %v4012_v36  ;;  %300 = vst [vmem:[#allocation3 + $0x12c] sm:$0xf] %v4013_v38  ;;  %v532_v63 = vpop.permute.xlu0 %531  ;;  %v483_v12 = vld [vmem:[#allocation2 + $0x1a0] sm:$0xff] }
  0xba   :  { %v4028_v21 = vcombine.low %v396_v17, %v396_v17  ;;  %v4029_v0 = vcombine.high %v396_v17, %v396_v17  ;;  %v552_v31 = vsel %vm45_vm0, %v488_v6, %v532_v63  ;;  %v4744_v50 = vld [vmem:[#allocation3 + $0xc8] ss:$20 sps:$4 sm:$0xff]   ;;  %v492_v6 = vpack.c.bf16 %v484_v20, %v483_v12  ;;  %v4751_v33 = vld [vmem:[#allocation3 + $0xf0] ss:$20 sps:$4 sm:$0xff]  }
  0xbb   :  { %v4036_v54 = vcombine.low %v552_v31, %v552_v31  ;;  %v4037_v15 = vcombine.high %v552_v31, %v552_v31  ;;  %v4746_v23 = vld [vmem:[#allocation3 + $0xf4] ss:$20 sps:$4 sm:$0xff]  }
  0xbc   :  { %467 = vst [vmem:[#allocation3 + $0x11c] sm:$0xf] %v4028_v21  ;;  %468 = vst [vmem:[#allocation3 + $0x130] sm:$0xf] %v4029_v0  ;;  %v701_v52 = vpop.permute.xlu1 %700  ;;  %v4738_v7 = vld [vmem:[#allocation3 + $0x58] ss:$20 sps:$4 sm:$0xff]   ;;  %v661_v21 = vpack.c.bf16 %v653_v29, %v652_v28 }
  0xbd   :  { %v721_v40 = vsel %vm45_vm0, %v657_v30, %v701_v52  ;;  %627 = vst [vmem:[#allocation3 + $0x80] sm:$0xf] %v4036_v54  ;;  %628 = vst [vmem:[#allocation3 + $0x94] sm:$0xf] %v4037_v15  ;;  %v534_v37 = vpop.permute.xlu0 %533  ;;  %v4762_v54 = vld [vmem:[#allocation3 + $0x10] ss:$20 sps:$4 sm:$0xff]  }
  0xbe   :  { %v4052_v39 = vcombine.low %v721_v40, %v721_v40  ;;  %v4053_v45 = vcombine.high %v721_v40, %v721_v40  ;;  %v555_v59 = vsel %vm45_vm0, %v489_v48, %v534_v37  ;;  %1560 = vmatmul.mubr.bf16.gmra.mxu0 %v4737_v32  ;;  %v4771_v37 = vld [vmem:[#allocation3 + $0xd8] ss:$20 sps:$4 sm:$0xff]  }
  0xbf   :  { %v4734_v57 = vld [vmem:[#allocation3 + $0x5c] ss:$20 sps:$4 sm:$0xff]   ;;  %v4038_v9 = vcombine.low %v555_v59, %v555_v59  ;;  %v4039_v10 = vcombine.high %v555_v59, %v555_v59  ;;  %1567 = vmatprep.mubr.bf16.mxu0 %v4739_v46 }
  0xc0   :  { %796 = vst [vmem:[#allocation3 + $0x84] sm:$0xf] %v4052_v39  ;;  %797 = vst [vmem:[#allocation3 + $0x98] sm:$0xf] %v4053_v45  ;;  %v703_v49 = vpop.permute.xlu1 %702  ;;  %1640 = vmatprep.mubr.bf16.mxu1 %v4734_v57  ;;  %v4758_v46 = vld [vmem:[#allocation3 + $0x118] ss:$20 sps:$4 sm:$0xff]  }
  0xc1   :  { %v724_v11 = vsel %vm45_vm0, %v658_v41, %v703_v49  ;;  %1641 = vmatmul.mubr.bf16.gmra.mxu1 %v4738_v7  ;;  %629 = vst [vmem:[#allocation3 + $0xa8] sm:$0xf] %v4038_v9  ;;  %630 = vst [vmem:[#allocation3 + $0xbc] sm:$0xf] %v4039_v10  ;;  %v536_v43 = vpop.permute.xlu0 %535  ;;  %v4767_v49 = vld [vmem:[#allocation3 + $0x60] ss:$20 sps:$4 sm:$0xff]  }
  0xc2   :  { %v4054_v53 = vcombine.low %v724_v11, %v724_v11  ;;  %v4055_v4 = vcombine.high %v724_v11, %v724_v11  ;;  %v558_v24 = vsel %vm45_vm0, %v490_v2, %v536_v43  ;;  %v4769_v7 = vld [vmem:[#allocation3 + $0x88] ss:$20 sps:$4 sm:$0xff]   ;;  %v4770_v11 = vld [vmem:[#allocation3 + $0xb0] ss:$20 sps:$4 sm:$0xff]  }
  0xc3   :  { %v4040_v19 = vcombine.low %v558_v24, %v558_v24  ;;  %v4041_v25 = vcombine.high %v558_v24, %v558_v24  ;;  %v4753_v45 = vld [vmem:[#allocation3 + $0x11c] ss:$20 sps:$4 sm:$0xff]  }
  0xc4   :  { %798 = vst [vmem:[#allocation3 + $0xac] sm:$0xf] %v4054_v53  ;;  %799 = vst [vmem:[#allocation3 + $0xc0] sm:$0xf] %v4055_v4  ;;  %v705_v1 = vpop.permute.xlu1 %704  ;;  %v4745_v62 = vld [vmem:[#allocation3 + $0x80] ss:$20 sps:$4 sm:$0xff]  }
  0xc5   :  { %v727_v16 = vsel %vm45_vm0, %v659_v58, %v705_v1  ;;  %631 = vst [vmem:[#allocation3 + $0xd0] sm:$0xf] %v4040_v19  ;;  %632 = vst [vmem:[#allocation3 + $0xe4] sm:$0xf] %v4041_v25  ;;  %v538_v5 = vpop.permute.xlu0 %537  ;;  %v4772_v58 = vld [vmem:[#allocation3 + $0x100] ss:$20 sps:$4 sm:$0xff]  }
  0xc6   :  { %v4056_v22 = vcombine.low %v727_v16, %v727_v16  ;;  %v4057_v26 = vcombine.high %v727_v16, %v727_v16  ;;  %v561_v61 = vsel %vm45_vm0, %v491_v27, %v538_v5  ;;  %1568 = vmatmul.mubr.bf16.gmra.mxu0 %v4744_v50  ;;  %v4773_v53 = vld [vmem:[#allocation3 + $0x128] ss:$20 sps:$4 sm:$0xff]  }
  0xc7   :  { %v4741_v17 = vld [vmem:[#allocation3 + $0x84] ss:$20 sps:$4 sm:$0xff]   ;;  %v4042_v35 = vcombine.low %v561_v61, %v561_v61  ;;  %v4043_v36 = vcombine.high %v561_v61, %v561_v61  ;;  %1575 = vmatprep.mubr.bf16.mxu0 %v4746_v23 }
  0xc8   :  { %800 = vst [vmem:[#allocation3 + $0xd4] sm:$0xf] %v4056_v22  ;;  %801 = vst [vmem:[#allocation3 + $0xe8] sm:$0xf] %v4057_v26  ;;  %v707_v42 = vpop.permute.xlu1 %706  ;;  %1648 = vmatprep.mubr.bf16.mxu1 %v4741_v17  ;;  %v4752_v39 = vld [vmem:[#allocation3 + $0xa8] ss:$20 sps:$4 sm:$0xff]  }
  0xc9   :  { %v730_v30 = vsel %vm45_vm0, %v660_v18, %v707_v42  ;;  %1649 = vmatmul.mubr.bf16.gmra.mxu1 %v4745_v62  ;;  %633 = vst [vmem:[#allocation3 + $0xf8] sm:$0xf] %v4042_v35  ;;  %634 = vst [vmem:[#allocation3 + $0x10c] sm:$0xf] %v4043_v36  ;;  %v540_v40 = vpop.permute.xlu0 %539 }
  0xca   :  { %v4058_v0 = vcombine.low %v730_v30, %v730_v30  ;;  %v4059_v34 = vcombine.high %v730_v30, %v730_v30  ;;  %v564_v41 = vsel %vm45_vm0, %v492_v6, %v540_v40 }
  0xcb   :  { %v4748_v38 = vld [vmem:[#allocation3 + $0xac] ss:$20 sps:$4 sm:$0xff]   ;;  %v4044_v31 = vcombine.low %v564_v41, %v564_v41  ;;  %v4045_v47 = vcombine.high %v564_v41, %v564_v41 }
  0xcc   :  { %802 = vst [vmem:[#allocation3 + $0xfc] sm:$0xf] %v4058_v0  ;;  %803 = vst [vmem:[#allocation3 + $0x110] sm:$0xf] %v4059_v34  ;;  %v709_v44 = vpop.permute.xlu1 %708  ;;  %1656 = vmatprep.mubr.bf16.mxu1 %v4748_v38  ;;  %v4759_v51 = vld [vmem:[#allocation3 + $0xd0] ss:$20 sps:$4 sm:$0xff]  }
  0xcd   :  { %v733_v52 = vsel %vm45_vm0, %v661_v21, %v709_v44  ;;  %635 = vst [vmem:[#allocation3 + $0x120] sm:$0xf] %v4044_v31  ;;  %636 = vst [vmem:[#allocation3 + $0x134] sm:$0xf] %v4045_v47 }
  0xce   :  { %v4060_v63 = vcombine.low %v733_v52, %v733_v52  ;;  %v4061_v14 = vcombine.high %v733_v52, %v733_v52  ;;  %1576 = vmatmul.mubr.bf16.gmra.mxu0 %v4751_v33 }
  0xcf   :  { %v4755_v48 = vld [vmem:[#allocation3 + $0xd4] ss:$20 sps:$4 sm:$0xff]   ;;  %1583 = vmatprep.mubr.bf16.mxu0 %v4753_v45 }
  0xd0   :  { %804 = vst [vmem:[#allocation3 + $0x124] sm:$0xf] %v4060_v63  ;;  %805 = vst [vmem:[#allocation3 + $0x138] sm:$0xf] %v4061_v14  ;;  %v4763_v55 = vld [vmem:[#allocation3 + $0xf8] ss:$20 sps:$4 sm:$0xff]  }
  0xd1   :  { %1657 = vmatmul.mubr.bf16.gmra.mxu1 %v4752_v39 }
  0xd2   :  { %1664 = vmatprep.mubr.bf16.mxu1 %v4755_v48 }
  0xd3   :  { %v4760_v15 = vld [vmem:[#allocation3 + $0xfc] ss:$20 sps:$4 sm:$0xff]  }
  0xd4   :  { %v4768_v32 = vld [vmem:[#allocation3 + $0x120] ss:$20 sps:$4 sm:$0xff]  }
  0xd6   :  { %1584 = vmatmul.mubr.bf16.gmra.mxu0 %v4758_v46  ;;  %v1789_v46 = vld [vmem:[%s6625_s3 + $0x10] sm:$0xff] }
  0xd7   :  { %4624 = vmatprep.mubr.bf16.mxu0 %v4762_v54  ;;  %v4765_v57 = vld [vmem:[#allocation3 + $0x124] ss:$20 sps:$4 sm:$0xff]  }
  0xd9   :  { %1665 = vmatmul.mubr.bf16.gmra.mxu1 %v4759_v51  ;;  %v1787_v51 = vld [vmem:[%s6625_s3] sm:$0xff] }
  0xda   :  { %1672 = vmatprep.mubr.bf16.mxu1 %v4760_v15 }
  0xde   :  { %4625 = vmatmul.mubr.bf16.vlgmr.msra.gmra.mxu0 %v4764_v56 }
  0xdf   :  { %4628 = vmatprep.mubr.bf16.mxu0 %v4767_v49 }
  0xe1   :  { %1673 = vmatmul.mubr.bf16.gmra.mxu1 %v4763_v55  ;;  %v5578_v55 = vstv %s6622_s0 }
  0xe2   :  { %1680 = vmatprep.mubr.bf16.mxu1 %v4765_v57  ;;  %v1796_v49 = vmul.f32 %v5578_v55, %v1787_v51  ;;  %v5598_v51 = vld [vmem:[%s6626_s4] ss:$0 sm:$0xff] }
  0xe6   :  { %4629 = vmatmul.mubr.bf16.gmra.mxu0 %v4769_v7 }
  0xe7   :  { %4632 = vmatprep.mubr.bf16.mxu0 %v4770_v11  ;;  %v1788_v11 = vld [vmem:[%s6625_s3 + $0x8] sm:$0xff] }
  0xe9   :  { %1681 = vmatmul.mubr.bf16.gmra.mxu1 %v4768_v32 }
  0xee   :  { %4633 = vmatmul.mubr.bf16.gmra.mxu0 %v4771_v37 }
  0xef   :  { %4636 = vmatprep.mubr.bf16.mxu0 %v4772_v58 }
  0xf6   :  { %4637 = vmatmul.mubr.bf16.gmra.mxu0 %v4773_v53  ;;  %v1798_v53 = vmul.f32 %v5578_v55, %v1789_v46  ;;  %v1797_v46 = vmul.f32 %v5578_v55, %v1788_v11 }
 0x155   :  { %v5489_v4 = vpop.f32.mrf.mxu0 }
 0x157   :  { %v5491_v59 = vpop.f32.mrf.mxu0 }
 0x159   :  { %v5493_v2 = vpop.f32.mrf.mxu0 }
 0x15b   :  { %v5495_v3 = vpop.f32.mrf.mxu0 }
 0x15d   :  { %v4342_v8 = vpop.f32.mrf.mxu0 }
 0x15f   :  { %v4343_v9 = vpop.f32.mrf.mxu0 }
 0x161   :  { %v5497_v10 = vpop.f32.mrf.mxu0 }
 0x163   :  { %v5499_v60 = vpop.f32.mrf.mxu0 }
 0x165   :  { %v5501_v13 = vpop.f32.mrf.mxu0 }
 0x167   :  { %v5503_v16 = vpop.f32.mrf.mxu0 }
 0x169   :  { %v5505_v18 = vpop.f32.mrf.mxu0 }
 0x16b   :  { %v5507_v26 = vpop.f32.mrf.mxu0 }
 0x171   :  { %v4400_v1 = vpop.f32.mrf.mxu1 }
 0x173   :  { %v4401_v43 = vpop.f32.mrf.mxu1 }
 0x174   :  { %v4402_v32 = vadd.f32 %v4401_v43, %v4400_v1  ;;  %v1790_v1 = vld [vmem:[%s6625_s3 + $0x18] sm:$0xff] }
 0x175   :  { %v4403_v22 = vpop.f32.mrf.mxu1  ;;  %v1799_v11 = vmul.f32 %v5578_v55, %v1790_v1 }
 0x176   :  { %v5509_v27 = vpop.f32.mrf.mxu0 }
 0x177   :  { %v4404_v24 = vpop.f32.mrf.mxu1 }
 0x178   :  { %v5511_v29 = vpop.f32.mrf.mxu0 }
 0x179   :  { %v4406_v28 = vpop.f32.mrf.mxu1 }
 0x17a   :  { %v5513_v25 = vpop.f32.mrf.mxu0 }
 0x17b   :  { %v4407_v19 = vpop.f32.mrf.mxu1 }
 0x17c   :  { %v5515_v12 = vpop.f32.mrf.mxu0  ;;  %v4408_v7 = vadd.f32 %v4407_v19, %v4406_v28  ;;  %v5606_v19 = vadd.f32 %v5598_v51, %v1796_v49 }
 0x17d   :  { %v4409_v23 = vpop.f32.mrf.mxu1 }
 0x17e   :  { %v5517_v17 = vpop.f32.mrf.mxu0 }
 0x17f   :  { %v4410_v20 = vpop.f32.mrf.mxu1 }
 0x180   :  { %v5521_v50 = vpop.f32.mrf.mxu0 }
 0x181   :  { %v5519_v42 = vpop.f32.mrf.mxu1 }
 0x182   :  { %v5525_v30 = vpop.f32.mrf.mxu0 }
 0x183   :  { %v5523_v62 = vpop.f32.mrf.mxu1 }
 0x184   :  { %v5529_v21 = vpop.f32.mrf.mxu0  ;;  %v4414_v1 = vadd.f32 %v5523_v62, %v5519_v42 }
 0x185   :  { %v5527_v5 = vpop.f32.mrf.mxu1 }
 0x186   :  { %v5533_v34 = vpop.f32.mrf.mxu0 }
 0x187   :  { %v5531_v0 = vpop.f32.mrf.mxu1 }
 0x188   :  { %v5535_v6 = vpop.f32.mrf.mxu0 }
 0x189   :  { %v4418_v61 = vpop.f32.mrf.mxu1 }
 0x18a   :  { %v5537_v36 = vpop.f32.mrf.mxu0 }
 0x18b   :  { %v4419_v35 = vpop.f32.mrf.mxu1 }
 0x18c   :  { %v5541_v44 = vpop.f32.mrf.mxu0 }
 0x18d   :  { %v5539_v38 = vpop.f32.mrf.mxu1 }
 0x18e   :  { %v5545_v40 = vpop.f32.mrf.mxu0 }
 0x18f   :  { %v5543_v52 = vpop.f32.mrf.mxu1 }
 0x190   :  { %v5549_v14 = vpop.f32.mrf.mxu0 }
 0x191   :  { %v5547_v63 = vpop.f32.mrf.mxu1  ;;  %6639 = vst [vmem:[#allocation8_spill] sm:$0xff] %v5549_v14 }
 0x192   :  { %v5553_v39 = vpop.f32.mrf.mxu0 }
 0x193   :  { %v5551_v41 = vpop.f32.mrf.mxu1  ;;  %6640 = vst [vmem:[#allocation9_spill] sm:$0xff] %v5553_v39  ;;  %v1791_v39 = vld [vmem:[%s6625_s3 + $0x20] sm:$0xff] }
 0x194   :  { %v5557_v31 = vpop.f32.mrf.mxu0  ;;  %v1800_v14 = vmul.f32 %v5578_v55, %v1791_v39  ;;  %v5645_v39 = vadd.f32 %v5598_v51, %v1799_v11 }
 0x195   :  { %v5555_v45 = vpop.f32.mrf.mxu1  ;;  %6641 = vst [vmem:[#allocation10_spill] sm:$0xff] %v5557_v31  ;;  %v4338_v31 = vadd.f32 %v5491_v59, %v5489_v4  ;;  %v4411_v4 = vadd.f32 %v4410_v20, %v4409_v23 }
 0x196   :  { %v5561_v48 = vpop.f32.mrf.mxu0 }
 0x197   :  { %v5559_v47 = vpop.f32.mrf.mxu1  ;;  %6642 = vst [vmem:[#allocation11_spill] sm:$0xff] %v5561_v48 }
 0x198   :  { %v5568_v54 = vpop.f32.mrf.mxu0 }
 0x199   :  { %v5563_v33 = vpop.f32.mrf.mxu1  ;;  %6643 = vst [vmem:[#allocation12_spill] sm:$0xff] %v5568_v54  ;;  %v5616_v54 = vadd.f32 %v5598_v51, %v1798_v53 }
 0x19a   :  { %v5580_v56 = vpop.f32.mrf.mxu0 }
 0x19b   :  { %v5570_v15 = vpop.f32.mrf.mxu1  ;;  %6644 = vst [vmem:[#allocation13_spill] sm:$0xff] %v5580_v56  ;;  %v4344_v56 = vadd.f32 %v4343_v9, %v4342_v8  ;;  %v1627_v8 = vadd.f32 %v4402_v32, %v4338_v31  ;;  %v1793_v9 = vld [vmem:[%s6625_s3 + $0x30] sm:$0xff]  ;;  %v4420_v31 = vadd.f32 %v4419_v35, %v4418_v61  ;;  %v4350_v61 = vadd.f32 %v5503_v16, %v5501_v13  ;;  %v1794_v13 = vld [vmem:[%s6625_s3 + $0x38] sm:$0xff] }
 0x19c   :  { %v5588_v37 = vpop.f32.mrf.mxu0  ;;  %v1802_v53 = vmul.f32 %v5578_v55, %v1793_v9  ;;  %v4356_v35 = vadd.f32 %v5511_v29, %v5509_v27  ;;  %v4417_v16 = vadd.f32 %v5531_v0, %v5527_v5  ;;  %v4423_v9 = vadd.f32 %v5543_v52, %v5539_v38 }
 0x19d   :  { %v5582_v57 = vpop.f32.mrf.mxu1  ;;  %6645 = vst [vmem:[#allocation14_spill] sm:$0xff] %v5588_v37  ;;  %v4405_v37 = vadd.f32 %v4404_v24, %v4403_v22  ;;  %v1635_v59 = vadd.f32 %v4408_v7, %v4344_v56  ;;  %v4341_v22 = vadd.f32 %v5495_v3, %v5493_v2  ;;  %v4347_v24 = vadd.f32 %v5499_v60, %v5497_v10  ;;  %v1792_v60 = vld [vmem:[%s6625_s3 + $0x28] sm:$0xff] }
 0x19e   :  { %v4626_v28 = vpop.f32.mrf.mxu0  ;;  %v5628_v7 = vadd.f32 %v5598_v51, %v1797_v46  ;;  %v1651_v27 = vadd.f32 %v4420_v31, %v4356_v35  ;;  %v1643_v11 = vadd.f32 %v4414_v1, %v4350_v61  ;;  %v4353_v5 = vadd.f32 %v5507_v26, %v5505_v18 }
 0x19f   :  { %v5590_v58 = vpop.f32.mrf.mxu1  ;;  %v1732_v23 = vadd.f32 %v4626_v28, %v1635_v59  ;;  %v1638_v3 = vadd.f32 %v4411_v4, %v4347_v24  ;;  %v1630_v10 = vadd.f32 %v4405_v37, %v4341_v22  ;;  %v5660_v59 = vadd.f32 %v5598_v51, %v1802_v53 }
 0x1a0   :  { %v1723_v49 = vpop.f32.mrf.mxu0  ;;  %v5670_v22 = vadd.f32 %v5598_v51, %v1800_v14  ;;  %v4359_v0 = vadd.f32 %v5515_v12, %v5513_v25  ;;  %v1803_v38 = vmul.f32 %v5578_v55, %v1794_v13  ;;  %v4426_v18 = vadd.f32 %v5551_v41, %v5547_v63 }
 0x1a1   :  { %v5603_v43 = vpop.f32.mrf.mxu1  ;;  %v1724_v20 = vadd.f32 %v1723_v49, %v1627_v8  ;;  %v5650_v62 = vadd.f32 %v5616_v54, %v1732_v23  ;;  %v1801_v8 = vmul.f32 %v5578_v55, %v1792_v60  ;;  %v1646_v25 = vadd.f32 %v4417_v16, %v4353_v5 }
 0x1a2   :  { %v4627_v32 = vpop.f32.mrf.mxu0  ;;  %v4432_v53 = vadd.f32 %v5570_v15, %v5563_v33  ;;  %v4368_v63 = vadd.f32 %v5535_v6, %v5533_v34  ;;  %v5704_v33 = vadd.f32 %v5598_v51, %v1803_v38  ;;  %v4429_v6 = vadd.f32 %v5559_v47, %v5555_v45 }
 0x1a3   :  { %v5618_v48 = vpop.f32.mrf.mxu1  ;;  %v5635_v2 = vadd.f32 %v5606_v19, %v1724_v20  ;;  %v1735_v37 = vadd.f32 %v4627_v32, %v1638_v3  ;;  %v1836_v14 = vmul.f32 %v5650_v62, %v5650_v62  ;;  %v5687_v12 = vadd.f32 %v5598_v51, %v1801_v8 }
 0x1a4   :  { %v1726_v42 = vpop.f32.mrf.mxu0  ;;  %v1654_v3 = vadd.f32 %v4423_v9, %v4359_v0  ;;  %v4371_v13 = vadd.f32 %v5541_v44, %v5537_v36  ;;  %v4438_v8 = vadd.f32 %v5618_v48, %v5603_v43  ;;  %v6647_v0 = vld [vmem:[#allocation11_spill] sm:$0xff] }
 0x1a5   :  { %v5625_v56 = vpop.f32.mrf.mxu1  ;;  %v1727_v46 = vadd.f32 %v1726_v42, %v1630_v10  ;;  %v1834_v4 = vmul.f32 %v5635_v2, %v5635_v2  ;;  %v5678_v52 = vadd.f32 %v5645_v39, %v1735_v37  ;;  %v4362_v10 = vadd.f32 %v5521_v50, %v5517_v17 }
 0x1a6   :  { %v4630_v29 = vpop.f32.mrf.mxu0  ;;  %v4435_v17 = vadd.f32 %v5590_v58, %v5582_v57 }
 0x1a7   :  { %v5647_v28 = vpop.f32.mrf.mxu1  ;;  %v5666_v49 = vadd.f32 %v5628_v7, %v1727_v46  ;;  %1866 = vrot.lane.b32.xlu0 %v1834_v4, %s4903_s1  ;;  %v1748_v23 = vadd.f32 %v4630_v29, %v1651_v27  ;;  %v1837_v42 = vmul.f32 %v5678_v52, %v5678_v52  ;;  %v1659_v34 = vadd.f32 %v4426_v18, %v4362_v10 }
 0x1a8   :  { %v1739_v20 = vpop.f32.mrf.mxu0  ;;  %v1667_v46 = vadd.f32 %v4432_v53, %v4368_v63  ;;  %v4365_v4 = vadd.f32 %v5529_v21, %v5525_v30  ;;  %v1670_v30 = vadd.f32 %v4435_v17, %v4371_v13  ;;  %v6651_v63 = vld [vmem:[#allocation13_spill] sm:$0xff] }
 0x1a9   :  { %v4442_v24 = vpop.f32.mrf.mxu1  ;;  %v1740_v31 = vadd.f32 %v1739_v20, %v1643_v11  ;;  %v1835_v32 = vmul.f32 %v5666_v49, %v5666_v49  ;;  %v5701_v41 = vadd.f32 %v5660_v59, %v1748_v23  ;;  %v6646_v11 = vld [vmem:[#allocation8_spill] sm:$0xff] }
 0x1aa   :  { %v4631_v26 = vpop.f32.mrf.mxu0  ;;  %v1662_v44 = vadd.f32 %v4429_v6, %v4365_v4  ;;  %v4374_v5 = vadd.f32 %v6646_v11, %v5545_v40  ;;  %v6648_v23 = vld [vmem:[#allocation12_spill] sm:$0xff] }
 0x1ab   :  { %v5692_v1 = vadd.f32 %v5670_v22, %v1740_v31  ;;  %1868 = vrot.lane.b32.xlu1 %v1835_v32, %s4903_s1  ;;  %1870 = vrot.lane.b32.xlu0 %v1836_v14, %s4903_s1  ;;  %v4443_v60 = vpop.f32.mrf.mxu1  ;;  %v1751_v61 = vadd.f32 %v4631_v26, %v1654_v3  ;;  %v1840_v16 = vmul.f32 %v5701_v41, %v5701_v41  ;;  %v6650_v3 = vld [vmem:[#allocation10_spill] sm:$0xff] }
 0x1ac   :  { %v1742_v15 = vpop.f32.mrf.mxu0  ;;  %v4444_v9 = vadd.f32 %v4443_v60, %v4442_v24  ;;  %v4380_v20 = vadd.f32 %v6648_v23, %v6647_v0  ;;  %v4441_v14 = vadd.f32 %v5647_v28, %v5625_v56  ;;  %v1675_v18 = vadd.f32 %v4438_v8, %v4374_v5  ;;  %v6652_v60 = vld [vmem:[#allocation14_spill] sm:$0xff] }
 0x1ad   :  { %v1743_v35 = vadd.f32 %v1742_v15, %v1646_v25  ;;  %v1838_v37 = vmul.f32 %v5692_v1, %v5692_v1  ;;  %v4445_v57 = vpop.f32.mrf.mxu1  ;;  %v5726_v45 = vadd.f32 %v5704_v33, %v1751_v61  ;;  %v4383_v15 = vadd.f32 %v6652_v60, %v6651_v63 }
 0x1ae   :  { %v4634_v50 = vpop.f32.mrf.mxu0  ;;  %v1683_v53 = vadd.f32 %v4444_v9, %v4380_v20 }
 0x1af   :  { %v5715_v51 = vadd.f32 %v5687_v12, %v1743_v35  ;;  %1872 = vrot.lane.b32.xlu1 %v1837_v42, %s4903_s1  ;;  %1874 = vrot.lane.b32.xlu0 %v1838_v37, %s4903_s1  ;;  %v1764_v47 = vadd.f32 %v4634_v50, %v1667_v46  ;;  %v4446_v38 = vpop.f32.mrf.mxu1 }
 0x1b0   :  { %v1755_v58 = vpop.f32.mrf.mxu0  ;;  %v4447_v26 = vadd.f32 %v4446_v38, %v4445_v57 }
 0x1b1   :  { %v1756_v27 = vadd.f32 %v1755_v58, %v1659_v34  ;;  %v1839_v29 = vmul.f32 %v5715_v51, %v5715_v51  ;;  %v5742_v43 = vadd.f32 %v5616_v54, %v1764_v47  ;;  %v6649_v54 = vld [vmem:[#allocation9_spill] sm:$0xff] }
 0x1b2   :  { %v4635_v21 = vpop.f32.mrf.mxu0  ;;  %v4377_v10 = vadd.f32 %v6650_v3, %v6649_v54  ;;  %v1686_v50 = vadd.f32 %v4447_v26, %v4383_v15 }
 0x1b3   :  { %v5733_v36 = vadd.f32 %v5606_v19, %v1756_v27  ;;  %1876 = vrot.lane.b32.xlu1 %v1839_v29, %s4903_s1  ;;  %1878 = vrot.lane.b32.xlu0 %v1840_v16, %s4903_s1  ;;  %v1767_v31 = vadd.f32 %v4635_v21, %v1670_v30  ;;  %v1841_v19 = vmul.f32 %v5726_v45, %v5726_v45 }
 0x1b4   :  { %v1758_v48 = vpop.f32.mrf.mxu0  ;;  %v1844_v42 = vmul.f32 %v5742_v43, %v5742_v43 }
 0x1b5   :  { %v1759_v24 = vadd.f32 %v1758_v48, %v1662_v44  ;;  %v1842_v32 = vmul.f32 %v5733_v36, %v5733_v36  ;;  %v5760_v61 = vadd.f32 %v5645_v39, %v1767_v31  ;;  %v1678_v39 = vadd.f32 %v4441_v14, %v4377_v10 }
 0x1b6   :  { %v4638_v40 = vpop.f32.mrf.mxu0 }
 0x1b7   :  { %v5751_v25 = vadd.f32 %v5628_v7, %v1759_v24  ;;  %1880 = vrot.lane.b32.xlu1 %v1841_v19, %s4903_s1  ;;  %1882 = vrot.lane.b32.xlu0 %v1842_v32, %s4903_s1  ;;  %v1780_v28 = vadd.f32 %v4638_v40, %v1683_v53  ;;  %v1845_v6 = vmul.f32 %v5760_v61, %v5760_v61 }
 0x1b8   :  { %v1771_v56 = vpop.f32.mrf.mxu0 }
 0x1b9   :  { %v1772_v35 = vadd.f32 %v1771_v56, %v1675_v18  ;;  %v1843_v7 = vmul.f32 %v5751_v25, %v5751_v25  ;;  %v5774_v46 = vadd.f32 %v5660_v59, %v1780_v28 }
 0x1ba   :  { %v4639_v37 = vpop.f32.mrf.mxu0 }
 0x1bb   :  { %v5767_v17 = vadd.f32 %v5670_v22, %v1772_v35  ;;  %1884 = vrot.lane.b32.xlu1 %v1843_v7, %s4903_s1  ;;  %1886 = vrot.lane.b32.xlu0 %v1844_v42, %s4903_s1  ;;  %v1783_v4 = vadd.f32 %v4639_v37, %v1686_v50  ;;  %v1848_v59 = vmul.f32 %v5774_v46, %v5774_v46 }
 0x1bc   :  { %v1774_v34 = vpop.f32.mrf.mxu0 }
 0x1bd   :  { %v1775_v13 = vadd.f32 %v1774_v34, %v1678_v39  ;;  %v1846_v57 = vmul.f32 %v5767_v17, %v5767_v17  ;;  %v5784_v58 = vadd.f32 %v5704_v33, %v1783_v4 }
 0x1bf   :  { %v5779_v22 = vadd.f32 %v5687_v12, %v1775_v13  ;;  %1888 = vrot.lane.b32.xlu1 %v1845_v6, %s4903_s1  ;;  %1890 = vrot.lane.b32.xlu0 %v1846_v57, %s4903_s1  ;;  %v1849_v12 = vmul.f32 %v5784_v58, %v5784_v58 }
 0x1c1   :  { %v1847_v16 = vmul.f32 %v5779_v22, %v5779_v22 }
 0x1c3   :  { %1892 = vrot.lane.b32.xlu1 %v1847_v16, %s4903_s1  ;;  %1894 = vrot.lane.b32.xlu0 %v1848_v59, %s4903_s1 }
 0x1c7   :  { %1896 = vrot.lane.b32.xlu1 %v1849_v12, %s4903_s1 }
 0x219   :  { %v1867_v47 = vpop.permute.xlu0 %1866 }
 0x21a   :  { %v1914_v33 = vsel %vm45_vm0, %v5635_v2, %v1867_v47 }
 0x21d   :  { %v1869_v27 = vpop.permute.xlu1 %1868  ;;  %v1871_v29 = vpop.permute.xlu0 %1870 }
 0x21e   :  { %v1915_v8 = vsel %vm45_vm0, %v5666_v49, %v1869_v27  ;;  %v1916_v21 = vsel %vm45_vm0, %v5650_v62, %v1871_v29 }
 0x21f   :  { %v1930_v30 = vadd.f32 %v1915_v8, %v1914_v33 }
 0x221   :  { %v1931_v9 = vadd.f32 %v1930_v30, %v1916_v21  ;;  %v1873_v44 = vpop.permute.xlu1 %1872  ;;  %v1875_v11 = vpop.permute.xlu0 %1874 }
 0x222   :  { %v1917_v5 = vsel %vm45_vm0, %v5678_v52, %v1873_v44  ;;  %v1918_v23 = vsel %vm45_vm0, %v5692_v1, %v1875_v11 }
 0x223   :  { %v1932_v0 = vadd.f32 %v1931_v9, %v1917_v5 }
 0x225   :  { %v1933_v20 = vadd.f32 %v1932_v0, %v1918_v23  ;;  %v1877_v38 = vpop.permute.xlu1 %1876  ;;  %v1879_v31 = vpop.permute.xlu0 %1878  ;;  %v4904_v0 = vmov 1966171168  }
 0x226   :  { %v1919_v48 = vsel %vm45_vm0, %v5715_v51, %v1877_v38  ;;  %v1920_v19 = vsel %vm45_vm0, %v5701_v41, %v1879_v31  ;;  %v1963_v23 = vunpack.c.l.s4 %v4904_v0 }
 0x227   :  { %v1934_v24 = vadd.f32 %v1933_v20, %v1919_v48  ;;  %v1965_v20 = vlaneseq }
 0x228   :  { %v1964_v38 = vunpack.c.0.s8 %v1963_v23 }
 0x229   :  { %v1935_v32 = vadd.f32 %v1934_v24, %v1920_v19  ;;  %v1881_v14 = vpop.permute.xlu1 %1880  ;;  %v1883_v40 = vpop.permute.xlu0 %1882  ;;  %v1966_v31 = vshrl.u32 %v1965_v20, 7 }
 0x22a   :  { %v1921_v18 = vsel %vm45_vm0, %v5726_v45, %v1881_v14  ;;  %v1922_v53 = vsel %vm45_vm0, %v5733_v36, %v1883_v40  ;;  %v4774_v14 = vld [vmem:[%s6629_s7 + $0x78] sm:$0xff]  }
 0x22b   :  { %v1936_v26 = vadd.f32 %v1935_v32, %v1921_v18  ;;  %v5828_v48 = vsub.s32 %v1964_v38, %v1966_v31  ;;  %v4775_v40 = vld [vmem:[%s6629_s7 + $0x38] sm:$0xff]   ;;  %v4776_v18 = vld [vmem:[%s6629_s7 + $0x70] sm:$0xff]   ;;  %4464 = vmatprep.subr.bf16.mxu1 %v4774_v14 }
 0x22c   :  { %4465 = vmatpush3.bf16.msra.mxu1 %v4775_v40 }
 0x22d   :  { %v1937_v54 = vadd.f32 %v1936_v26, %v1922_v53  ;;  %v1885_v3 = vpop.permute.xlu1 %1884  ;;  %v1887_v10 = vpop.permute.xlu0 %1886  ;;  %6653 = vst [vmem:[#allocation8_spill] sm:$0xff] %v5828_v48  ;;  %v4777_v26 = vld [vmem:[%s6629_s7 + $0x30] sm:$0xff]   ;;  %4466 = vmatprep.subr.bf16.mxu1 %v4776_v18  ;;  %v4778_v53 = vld [vmem:[%s6629_s7 + $0x68] sm:$0xff]  }
 0x22e   :  { %v1923_v63 = vsel %vm45_vm0, %v5751_v25, %v1885_v3  ;;  %v1924_v15 = vsel %vm45_vm0, %v5742_v43, %v1887_v10  ;;  %v4780_v3 = vld [vmem:[%s6629_s7 + $0x60] sm:$0xff]  }
 0x22f   :  { %v1938_v60 = vadd.f32 %v1937_v54, %v1923_v63  ;;  %v4779_v54 = vld [vmem:[%s6629_s7 + $0x28] sm:$0xff]   ;;  %v4781_v10 = vld [vmem:[%s6629_s7 + $0x20] sm:$0xff]   ;;  %v4782_v63 = vld [vmem:[%s6629_s7 + $0x58] sm:$0xff]  }
 0x230   :  { %4467 = vmatpush3.bf16.msra.mxu1 %v4777_v26 }
 0x231   :  { %v1939_v56 = vadd.f32 %v1938_v60, %v1924_v15  ;;  %v1889_v28 = vpop.permute.xlu1 %1888  ;;  %v1891_v35 = vpop.permute.xlu0 %1890  ;;  %4468 = vmatprep.subr.bf16.mxu1 %v4778_v53  ;;  %v4783_v60 = vld [vmem:[%s6629_s7 + $0x18] sm:$0xff]   ;;  %v4784_v15 = vld [vmem:[%s6629_s7 + $0x50] sm:$0xff]  }
 0x232   :  { %v1925_v7 = vsel %vm45_vm0, %v5760_v61, %v1889_v28  ;;  %v1926_v37 = vsel %vm45_vm0, %v5767_v17, %v1891_v35  ;;  %v4786_v28 = vld [vmem:[%s6629_s7 + $0x48] sm:$0xff]  }
 0x233   :  { %v1940_v42 = vadd.f32 %v1939_v56, %v1925_v7  ;;  %v4785_v56 = vld [vmem:[%s6629_s7 + $0x10] sm:$0xff]   ;;  %v4787_v35 = vld [vmem:[%s6629_s7 + $0x8] sm:$0xff]   ;;  %v1958_v7 = vld [vmem:[%s6627_s5] sm:$0x1] }
 0x234   :  { %4469 = vmatpush3.bf16.msra.mxu1 %v4779_v54 }
 0x235   :  { %v1941_v50 = vadd.f32 %v1940_v42, %v1926_v37  ;;  %v1893_v39 = vpop.permute.xlu1 %1892  ;;  %v1895_v34 = vpop.permute.xlu0 %1894  ;;  %4470 = vmatprep.subr.bf16.mxu1 %v4780_v3  ;;  %v5878_v42 = vsub.s32 0, %v1966_v31 }
 0x236   :  { %v1927_v6 = vsel %vm45_vm0, %v5779_v22, %v1893_v39  ;;  %v1928_v13 = vsel %vm45_vm0, %v5774_v46, %v1895_v34  ;;  %v1980_v39 = vld [vmem:[%s6628_s6] sm:$0x1] }
 0x237   :  { %v1942_v4 = vadd.f32 %v1941_v50, %v1927_v6  ;;  %6654 = vst [vmem:[#allocation11_spill] sm:$0xff] %v5878_v42 }
 0x238   :  { %4471 = vmatpush3.bf16.msra.mxu1 %v4781_v10 }
 0x239   :  { %v1943_v57 = vadd.f32 %v1942_v4, %v1928_v13  ;;  %v1897_v16 = vpop.permute.xlu1 %1896  ;;  %4472 = vmatprep.subr.bf16.mxu1 %v4782_v63 }
 0x23a   :  { %v1929_v59 = vsel %vm45_vm0, %v5784_v58, %v1897_v16 }
 0x23b   :  { %v1944_v12 = vadd.f32 %v1943_v57, %v1929_v59 }
 0x23c   :  { %4473 = vmatpush3.bf16.msra.mxu1 %v4783_v60 }
 0x23d   :  { %v1945_v47 = vrot.slane %v1944_v12, 4  ;;  %4474 = vmatprep.subr.bf16.mxu1 %v4784_v15 }
 0x23f   :  { %v1946_v27 = vadd.f32 %v1945_v47, %v1944_v12 }
 0x240   :  { %4475 = vmatpush3.bf16.msra.mxu1 %v4785_v56  ;;  %v4792_v56 = vld [vmem:[%s6629_s7 + $0xf0] sm:$0xff]  }
 0x241   :  { %v1947_v29 = vrot.slane %v1946_v27, 2  ;;  %4476 = vmatprep.subr.bf16.mxu1 %v4786_v28  ;;  %v2083_v28 = vld [vmem:[#allocation2 + $0x8] sm:$0xff] }
 0x243   :  { %v1948_v33 = vadd.f32 %v1947_v29, %v1946_v27 }
 0x244   :  { %4477 = vmatpush3.bf16.msra.mxu1 %v4787_v35 }
 0x245   :  { %v1949_v8 = vrot.slane %v1948_v33, 1 }
 0x247   :  { %v1950_v30 = vadd.f32 %v1949_v8, %v1948_v33 }
 0x249   :  { %v1951_v21 = vmul.f32 0.0078125, %v1950_v30 }
 0x24b   :  { %v1952_v9 = vmul.f32 %v1951_v21, %v1951_v21 }
 0x24d   :  { %1954 = vrot.lane.b32.xlu0 %v1952_v9, %s4903_s1 }
 0x2bf   :  { %v1955_v44 = vpop.permute.xlu0 %1954 }
 0x2c0   :  { %v1957_v11 = vsub.f32 %v1951_v21, %v1955_v44 }
 0x2c2   :  { %v1959_v5 = vadd.f32 1e-05, %v1957_v11 }
 0x2c4   :  { %4869 = vrsqrt.f32 %v1959_v5 }
 0x2d1   :  { %v4870_v24 = vpop.eup %4869 }
 0x2d2   :  { %v1968_v19 = vrot.slane %v4870_v24, %v5828_v48  ;;  %v4788_v24 = vld [vmem:[%s6629_s7 + $0xf8] sm:$0xff]  }
 0x2d3   :  { %4528 = vmatprep.subr.bf16.mxu0 %v4788_v24 }
 0x2d4   :  { %v1975_v32 = vrot.slane %v1968_v19, %v5828_v48  ;;  %v4789_v19 = vld [vmem:[%s6629_s7 + $0xb8] sm:$0xff]  }
 0x2d5   :  { %4529 = vmatpush3.bf16.msra.mxu0 %v4789_v19 }
 0x2d6   :  { %1976 = vrot.lane.b32.xlu1 %v1975_v32, %s4903_s1  ;;  %4530 = vmatprep.subr.bf16.mxu0 %v4792_v56 }
 0x348   :  { %v1977_v37 = vpop.permute.xlu1 %1976 }
 0x349   :  { %v1979_v50 = vmul.f32 %v1977_v37, %v1958_v7  ;;  %v4793_v37 = vld [vmem:[%s6629_s7 + $0xb0] sm:$0xff]  }
 0x34a   :  { %4531 = vmatpush3.bf16.msra.mxu0 %v4793_v37  ;;  %v6045_v37 = vld [vmem:[%s6629_s7 + $0x138] sm:$0xff]  }
 0x34b   :  { %v1981_v34 = vmul.f32 %v1979_v50, %v1951_v21  ;;  %v1987_v6 = vrot.slane %v1979_v50, %v5878_v42 }
 0x34d   :  { %v1982_v4 = vsub.f32 %v1980_v39, %v1981_v34  ;;  %v1989_v13 = vmul.f32 %v1987_v6, %v5635_v2  ;;  %v1990_v57 = vmul.f32 %v1987_v6, %v5666_v49  ;;  %v1991_v16 = vmul.f32 %v1987_v6, %v5650_v62 }
 0x34e   :  { %v1992_v59 = vmul.f32 %v1987_v6, %v5678_v52  ;;  %v1993_v12 = vmul.f32 %v1987_v6, %v5692_v1  ;;  %v1994_v47 = vmul.f32 %v1987_v6, %v5715_v51  ;;  %v1995_v27 = vmul.f32 %v1987_v6, %v5701_v41 }
 0x34f   :  { %v2009_v29 = vrot.slane %v1982_v4, %v5878_v42  ;;  %v1996_v33 = vmul.f32 %v1987_v6, %v5726_v45  ;;  %v1997_v8 = vmul.f32 %v1987_v6, %v5733_v36  ;;  %v1998_v2 = vmul.f32 %v1987_v6, %v5751_v25 }
 0x350   :  { %v1999_v49 = vmul.f32 %v1987_v6, %v5742_v43  ;;  %v2000_v62 = vmul.f32 %v1987_v6, %v5760_v61  ;;  %v2001_v52 = vmul.f32 %v1987_v6, %v5767_v17  ;;  %v2002_v1 = vmul.f32 %v1987_v6, %v5779_v22 }
 0x351   :  { %v2011_v30 = vadd.f32 %v2009_v29, %v1989_v13  ;;  %v2012_v51 = vadd.f32 %v2009_v29, %v1990_v57  ;;  %v2013_v21 = vadd.f32 %v2009_v29, %v1991_v16  ;;  %v2014_v41 = vadd.f32 %v2009_v29, %v1992_v59 }
 0x352   :  { %v2015_v9 = vadd.f32 %v2009_v29, %v1993_v12  ;;  %v2016_v44 = vadd.f32 %v2009_v29, %v1994_v47  ;;  %v2017_v11 = vadd.f32 %v2009_v29, %v1995_v27  ;;  %v2018_v45 = vadd.f32 %v2009_v29, %v1996_v33 }
 0x353   :  { %v2027_v5 = vmax.f32 %v2011_v30, 0.0  ;;  %v2028_v36 = vmax.f32 %v2012_v51, 0.0  ;;  %v2029_v0 = vmax.f32 %v2013_v21, 0.0  ;;  %v2030_v25 = vmax.f32 %v2014_v41, 0.0 }
 0x354   :  { %v2031_v23 = vmax.f32 %v2015_v9, 0.0  ;;  %v2032_v43 = vmax.f32 %v2016_v44, 0.0  ;;  %v2033_v20 = vmax.f32 %v2017_v11, 0.0  ;;  %v2034_v61 = vmax.f32 %v2018_v45, 0.0 }
 0x355   :  { %2043 = vst.msk [vmem:[#allocation2 + $0x20] sm:$0xff] %vm45_vm0, %v2027_v5  ;;  %2044 = vst.msk [vmem:[#allocation2 + $0x38] sm:$0xff] %vm45_vm0, %v2028_v36  ;;  %v2019_v17 = vadd.f32 %v2009_v29, %v1997_v8  ;;  %v2020_v22 = vadd.f32 %v2009_v29, %v1998_v2  ;;  %v2021_v38 = vadd.f32 %v2009_v29, %v1999_v49 }
 0x356   :  { %2045 = vst.msk [vmem:[#allocation2 + $0x50] sm:$0xff] %vm45_vm0, %v2029_v0  ;;  %2046 = vst.msk [vmem:[#allocation2 + $0x68] sm:$0xff] %vm45_vm0, %v2030_v25  ;;  %v2022_v31 = vadd.f32 %v2009_v29, %v2000_v62  ;;  %v2023_v32 = vadd.f32 %v2009_v29, %v2001_v52  ;;  %v2024_v14 = vadd.f32 %v2009_v29, %v2002_v1 }
 0x357   :  { %2047 = vst.msk [vmem:[#allocation2 + $0x80] sm:$0xff] %vm45_vm0, %v2031_v23  ;;  %2048 = vst.msk [vmem:[#allocation2 + $0x98] sm:$0xff] %vm45_vm0, %v2032_v43  ;;  %v2003_v40 = vmul.f32 %v1987_v6, %v5774_v46  ;;  %v2004_v18 = vmul.f32 %v1987_v6, %v5784_v58  ;;  %v2035_v26 = vmax.f32 %v2019_v17, 0.0  ;;  %v2036_v53 = vmax.f32 %v2020_v22, 0.0  ;;  %v4790_v46 = vld [vmem:[%s6629_s7 + $0x40] sm:$0xff]  }
 0x358   :  { %2049 = vst.msk [vmem:[#allocation2 + $0xb0] sm:$0xff] %vm45_vm0, %v2033_v20  ;;  %2050 = vst.msk [vmem:[#allocation2 + $0xc8] sm:$0xff] %vm45_vm0, %v2034_v61  ;;  %v2037_v54 = vmax.f32 %v2021_v38, 0.0  ;;  %v2038_v3 = vmax.f32 %v2022_v31, 0.0  ;;  %v2039_v10 = vmax.f32 %v2023_v32, 0.0  ;;  %v2040_v63 = vmax.f32 %v2024_v14, 0.0  ;;  %4478 = vmatprep.subr.bf16.mxu1 %v4790_v46 }
 0x359   :  { %v2025_v60 = vadd.f32 %v2009_v29, %v2003_v40  ;;  %v2026_v15 = vadd.f32 %v2009_v29, %v2004_v18  ;;  %2051 = vst.msk [vmem:[#allocation2 + $0x110] sm:$0xff] %vm45_vm0, %v2035_v26  ;;  %2052 = vst.msk [vmem:[#allocation2 + $0x128] sm:$0xff] %vm45_vm0, %v2036_v53  ;;  %v4791_v58 = vld [vmem:[%s6629_s7] sm:$0xff]   ;;  %v2091_v40 = vld [vmem:[#allocation2 + $0xf8] sm:$0xff] }
 0x35a   :  { %2053 = vst.msk [vmem:[#allocation2 + $0x140] sm:$0xff] %vm45_vm0, %v2037_v54  ;;  %2054 = vst.msk [vmem:[#allocation2 + $0x158] sm:$0xff] %vm45_vm0, %v2038_v3  ;;  %4479 = vmatpush3.bf16.msra.mxu1 %v4791_v58 }
 0x35b   :  { %2055 = vst.msk [vmem:[#allocation2 + $0x170] sm:$0xff] %vm45_vm0, %v2039_v10  ;;  %2056 = vst.msk [vmem:[#allocation2 + $0x188] sm:$0xff] %vm45_vm0, %v2040_v63  ;;  %v2041_v35 = vmax.f32 %v2025_v60, 0.0  ;;  %v2042_v7 = vmax.f32 %v2026_v15, 0.0  ;;  %4640 = vmatprep.subr.bf16.mxu1 %v6045_v37 }
 0x35c   :  { %v5933_v50 = vld [vmem:[#allocation2 + $0x1f] sm:$0xff]  ;;  %v2252_v39 = vld [vmem:[#allocation2 + $0x37] sm:$0xff] }
 0x35d   :  { %v5935_v34 = vld [vmem:[#allocation2 + $0x20] sm:$0xff]  ;;  %2057 = vst.msk [vmem:[#allocation2 + $0x1a0] sm:$0xff] %vm45_vm0, %v2041_v35  ;;  %2058 = vst.msk [vmem:[#allocation2 + $0x1b8] sm:$0xff] %vm45_vm0, %v2042_v7  ;;  %v2267_v6 = vpack.c.bf16 %v2252_v39, %v5933_v50  ;;  %v2253_v13 = vld [vmem:[#allocation2 + $0x4f] sm:$0xff] }
 0x35e   :  { %v2099_v4 = vpack.c.bf16 %v5935_v34, %v2083_v28  ;;  %v2254_v57 = vld [vmem:[#allocation2 + $0x67] sm:$0xff]  ;;  %v5941_v16 = vld [vmem:[#allocation2 + $0x38] sm:$0xff]  ;;  %v5943_v59 = vld [vmem:[#allocation2 + $0x50] sm:$0xff]  ;;  %v5945_v27 = vpack.c.bf16 %v2253_v13, %v2252_v39 }
 0x35f   :  { %v2255_v12 = vld [vmem:[#allocation2 + $0x7f] sm:$0xff]  ;;  %v2256_v47 = vld [vmem:[#allocation2 + $0x97] sm:$0xff]  ;;  %2283 = vrot.lane.b32.xlu1 %v2267_v6, %s4903_s1  ;;  %v5951_v33 = vld [vmem:[#allocation2 + $0x68] sm:$0xff]  ;;  %v2268_v30 = vpack.c.bf16 %v2254_v57, %v2253_v13  ;;  %v2100_v51 = vpack.c.bf16 %v5943_v59, %v5941_v16 }
 0x360   :  { %2115 = vrot.lane.b32.xlu0 %v2099_v4, %s4903_s1  ;;  %v5953_v8 = vld [vmem:[#allocation2 + $0x80] sm:$0xff]  ;;  %v2257_v2 = vld [vmem:[#allocation2 + $0xaf] sm:$0xff]  ;;  %v5955_v49 = vpack.c.bf16 %v2255_v12, %v2254_v57  ;;  %v5957_v62 = vld [vmem:[#allocation2 + $0x98] sm:$0xff]  ;;  %v2269_v25 = vpack.c.bf16 %v2256_v47, %v2255_v12 }
 0x361   :  { %v5959_v52 = vpack.c.bf16 %v2257_v2, %v2256_v47  ;;  %v5965_v21 = vld [vmem:[#allocation2 + $0x127] sm:$0xff]  ;;  %v5969_v9 = vld [vmem:[#allocation2 + $0x39] sm:$0xff]  ;;  %v5979_v5 = vld [vmem:[#allocation2 + $0x51] sm:$0xff]  ;;  %v5987_v23 = vpack.c.bf16 %v5953_v8, %v5951_v33 }
 0x362   :  { %v5971_v44 = vld [vmem:[#allocation2 + $0x13f] sm:$0xff]  ;;  %v5975_v11 = vld [vmem:[#allocation2 + $0x157] sm:$0xff]  ;;  %v5981_v36 = vld [vmem:[#allocation2 + $0x69] sm:$0xff]  ;;  %v2244_v17 = vpack.c.bf16 %v5979_v5, %v5969_v9 }
 0x363   :  { %2285 = vrot.lane.b32.xlu1 %v2268_v30, %s4903_s1  ;;  %v5983_v0 = vld [vmem:[#allocation2 + $0x16f] sm:$0xff]  ;;  %v2258_v43 = vld [vmem:[#allocation2 + $0xc7] sm:$0xff]  ;;  %v5997_v31 = vld [vmem:[#allocation2 + $0x99] sm:$0xff]  ;;  %v2436_v39 = vpack.c.bf16 %v5981_v36, %v5979_v5 }
 0x364   :  { %2117 = vrot.lane.b32.xlu0 %v2100_v51, %s4903_s1  ;;  %v2090_v20 = vld [vmem:[#allocation2 + $0xb0] sm:$0xff]  ;;  %v5989_v61 = vld [vmem:[#allocation2 + $0x187] sm:$0xff]  ;;  %v5999_v24 = vld [vmem:[#allocation2 + $0x19f] sm:$0xff]  ;;  %v2270_v26 = vpack.c.bf16 %v2258_v43, %v2257_v2 }
 0x365   :  { %v5995_v38 = vld [vmem:[#allocation2 + $0x81] sm:$0xff]  ;;  %v6008_v14 = vld [vmem:[#allocation2 + $0x10f] sm:$0xff]  ;;  %v6013_v53 = vpack.c.bf16 %v2090_v20, %v5957_v62  ;;  %v6021_v60 = vld [vmem:[#allocation2 + $0x159] sm:$0xff]  ;;  %v2273_v41 = vpack.c.bf16 %v5989_v61, %v5983_v0 }
 0x366   :  { %v2245_v19 = vpack.c.bf16 %v5995_v38, %v5981_v36  ;;  %v6010_v18 = vld [vmem:[#allocation2 + $0xb1] sm:$0xff]  ;;  %v6015_v3 = vld [vmem:[#allocation2 + $0x129] sm:$0xff]  ;;  %v6017_v10 = vld [vmem:[#allocation2 + $0x141] sm:$0xff]  ;;  %v2271_v6 = vpack.c.bf16 %v5965_v21, %v6008_v14 }
 0x367   :  { %2287 = vrot.lane.b32.xlu1 %v2269_v25, %s4903_s1  ;;  %v2092_v54 = vld [vmem:[#allocation2 + $0x110] sm:$0xff]  ;;  %v6032_v56 = vld [vmem:[#allocation2 + $0x1a1] sm:$0xff]  ;;  %v4804_v2 = vld [vmem:[%s6629_s7 + $0xd8] sm:$0xff]   ;;  %v6655_v36 = vpack.c.bf16 %v6010_v18, %v5997_v31 }
 0x368   :  { %2119 = vrot.lane.b32.xlu0 %v5987_v23, %s4903_s1  ;;  %v6023_v15 = vld [vmem:[#allocation2 + $0x171] sm:$0xff]  ;;  %v6025_v46 = vld [vmem:[#allocation2 + $0x189] sm:$0xff]  ;;  %v2103_v4 = vpack.c.bf16 %v2092_v54, %v2091_v40  ;;  %v4800_v13 = vld [vmem:[%s6629_s7 + $0xe0] sm:$0xff]  }
 0x369   :  { %v4794_v35 = vld [vmem:[%s6629_s7 + $0xe8] sm:$0xff]   ;;  %v4801_v12 = vld [vmem:[%s6629_s7 + $0xa0] sm:$0xff]   ;;  %v2095_v43 = vld [vmem:[#allocation2 + $0x158] sm:$0xff] }
 0x36a   :  { %v4795_v7 = vld [vmem:[%s6629_s7 + $0xa8] sm:$0xff]   ;;  %4532 = vmatprep.subr.bf16.mxu0 %v4794_v35  ;;  %v2094_v25 = vld [vmem:[#allocation2 + $0x140] sm:$0xff]  ;;  %v4805_v20 = vld [vmem:[%s6629_s7 + $0x98] sm:$0xff]  }
 0x36b   :  { %2289 = vrot.lane.b32.xlu1 %v2270_v26, %s4903_s1  ;;  %v6054_v57 = vld [vmem:[#allocation2 + $0x21] sm:$0xff]  ;;  %4533 = vmatpush3.bf16.msra.mxu0 %v4795_v7  ;;  %v2272_v26 = vpack.c.bf16 %v5975_v11, %v5971_v44  ;;  %v2096_v35 = vld [vmem:[#allocation2 + $0x170] sm:$0xff]  ;;  %v2731_v7 = vld [vmem:[#allocation2 + $0x39] sm:$0xff] }
 0x36c   :  { %2121 = vrot.lane.b32.xlu0 %v6013_v53, %s4903_s1  ;;  %v2435_v47 = vpack.c.bf16 %v5969_v9, %v6054_v57  ;;  %4534 = vmatprep.subr.bf16.mxu0 %v4800_v13  ;;  %v2093_v30 = vld [vmem:[#allocation2 + $0x128] sm:$0xff]  ;;  %v6089_v58 = vpack.c.bf16 %v2096_v35, %v2095_v43  ;;  %v2742_v29 = vld [vmem:[#allocation2 + $0x171] sm:$0xff] }
 0x36d   :  { %v2738_v40 = vld [vmem:[#allocation2 + $0xe1] sm:$0xff]  ;;  %v6074_v54 = vpack.c.bf16 %v2094_v25, %v2093_v30  ;;  %v2733_v13 = vld [vmem:[#allocation2 + $0x69] sm:$0xff]  ;;  %v2736_v25 = vld [vmem:[#allocation2 + $0xb1] sm:$0xff] }
 0x36e   :  { %v2737_v32 = vld [vmem:[#allocation2 + $0xc9] sm:$0xff]  ;;  %v2740_v45 = vld [vmem:[#allocation2 + $0x141] sm:$0xff] }
 0x36f   :  { %2291 = vrot.lane.b32.xlu1 %v2271_v6, %s4903_s1  ;;  %4535 = vmatpush3.bf16.msra.mxu0 %v4801_v12  ;;  %v4809_v6 = vld [vmem:[%s6629_s7 + $0x90] sm:$0xff]   ;;  %v2734_v12 = vld [vmem:[#allocation2 + $0x81] sm:$0xff]  ;;  %v2750_v28 = vpack.c.bf16 %v2738_v40, %v2737_v32 }
 0x370   :  { %2123 = vrot.lane.b32.xlu0 %v2103_v4, %s4903_s1  ;;  %4536 = vmatprep.subr.bf16.mxu0 %v4804_v2  ;;  %v2732_v4 = vld [vmem:[#allocation2 + $0x51] sm:$0xff]  ;;  %v2748_v30 = vpack.c.bf16 %v2734_v12, %v2733_v13  ;;  %v2735_v2 = vld [vmem:[#allocation2 + $0x99] sm:$0xff]  ;;  %v2739_v1 = vld [vmem:[#allocation2 + $0x129] sm:$0xff] }
 0x371   :  { %v2749_v22 = vpack.c.bf16 %v2736_v25, %v2735_v2  ;;  %v2751_v12 = vpack.c.bf16 %v2740_v45, %v2739_v1  ;;  %v2743_v40 = vld [vmem:[#allocation2 + $0x189] sm:$0xff]  ;;  %v2744_v25 = vld [vmem:[#allocation2 + $0x1a1] sm:$0xff]  ;;  %v2762_v35 = vsel %vm45_vm0, %v2750_v28, 0  ;;  %v2745_v1 = vld [vmem:[#allocation2 + $0x1b9] sm:$0xff] }
 0x372   :  { %v2758_v13 = vsel %vm45_vm0, %v2748_v30, 0  ;;  %v2746_v45 = vld [vmem:[#allocation2 + $0x1d1] sm:$0xff]  ;;  %v4813_v30 = vld [vmem:[%s6629_s7 + $0x88] sm:$0xff]  }
 0x373   :  { %2619 = vrot.lane.b32.xlu1 %v2100_v51, %s4903_s1  ;;  %v4808_v51 = vld [vmem:[%s6629_s7 + $0xd0] sm:$0xff]   ;;  %4537 = vmatpush3.bf16.msra.mxu0 %v4805_v20  ;;  %v4225_v2 = vcombine.low %v2758_v13, %v2758_v13  ;;  %v4226_v32 = vcombine.high %v2758_v13, %v2758_v13  ;;  %v2760_v43 = vsel %vm45_vm0, %v2749_v22, 0  ;;  %v4230_v22 = vcombine.high %v2762_v35, %v2762_v35 }
 0x374   :  { %2451 = vrot.lane.b32.xlu0 %v2435_v47, %s4903_s1  ;;  %v2747_v47 = vpack.c.bf16 %v2732_v4, %v2731_v7  ;;  %4538 = vmatprep.subr.bf16.mxu0 %v4808_v51  ;;  %v4812_v7 = vld [vmem:[%s6629_s7 + $0xc8] sm:$0xff]   ;;  %v2764_v51 = vsel %vm45_vm0, %v2751_v12, 0  ;;  %v2753_v13 = vpack.c.bf16 %v2744_v25, %v2743_v40 }
 0x375   :  { %2829 = vst [vmem:[#allocation3 + $0x38] sm:$0xf] %v4225_v2  ;;  %2830 = vst [vmem:[#allocation3 + $0x4c] sm:$0xf] %v4226_v32  ;;  %v4231_v28 = vcombine.low %v2764_v51, %v2764_v51  ;;  %v4817_v2 = vld [vmem:[%s6629_s7 + $0x80] sm:$0xff]  }
 0x376   :  { %v2756_v4 = vsel %vm45_vm0, %v2747_v47, 0  ;;  %2834 = vst [vmem:[#allocation3 + $0x9c] sm:$0xf] %v4230_v22 }
 0x377   :  { %2293 = vrot.lane.b32.xlu1 %v2272_v26, %s4903_s1  ;;  %v2741_v26 = vld [vmem:[#allocation2 + $0x159] sm:$0xff]  ;;  %v4223_v63 = vcombine.low %v2756_v4, %v2756_v4  ;;  %v4224_v20 = vcombine.high %v2756_v4, %v2756_v4  ;;  %4539 = vmatpush3.bf16.msra.mxu0 %v4809_v6  ;;  %v4229_v4 = vcombine.low %v2762_v35, %v2762_v35 }
 0x378   :  { %2125 = vrot.lane.b32.xlu0 %v6074_v54, %s4903_s1  ;;  %v2752_v47 = vpack.c.bf16 %v2742_v29, %v2741_v26  ;;  %4540 = vmatprep.subr.bf16.mxu0 %v4812_v7  ;;  %v4816_v29 = vld [vmem:[%s6629_s7 + $0xc0] sm:$0xff]   ;;  %v4232_v26 = vcombine.high %v2764_v51, %v2764_v51  ;;  %2835 = vst [vmem:[#allocation3 + $0xb0] sm:$0xf] %v4231_v28  ;;  %v2768_v7 = vsel %vm45_vm0, %v2753_v13, 0  ;;  %v2266_v51 = vld [vmem:[#allocation2 + $0x1b7] sm:$0xff] }
 0x379   :  { %2827 = vst [vmem:[#allocation3 + $0x10] sm:$0xf] %v4223_v63  ;;  %2828 = vst [vmem:[#allocation3 + $0x24] sm:$0xf] %v4224_v20  ;;  %v2754_v20 = vpack.c.bf16 %v2746_v45, %v2745_v1  ;;  %v4235_v32 = vcombine.low %v2768_v7, %v2768_v7  ;;  %v4236_v40 = vcombine.high %v2768_v7, %v2768_v7  ;;  %v2098_v1 = vld [vmem:[#allocation2 + $0x1a0] sm:$0xff]  ;;  %v6145_v13 = vld [vmem:[#allocation2 + $0x1b8] sm:$0xff] }
 0x37a   :  { %v2766_v6 = vsel %vm45_vm0, %v2752_v47, 0  ;;  %2833 = vst [vmem:[#allocation3 + $0x88] sm:$0xf] %v4229_v4  ;;  %2836 = vst [vmem:[#allocation3 + $0xc4] sm:$0xf] %v4232_v26  ;;  %v2097_v47 = vld [vmem:[#allocation2 + $0x188] sm:$0xff]  ;;  %v2440_v26 = vpack.c.bf16 %v6021_v60, %v6017_v10 }
 0x37b   :  { %2621 = vrot.lane.b32.xlu1 %v5987_v23, %s4903_s1  ;;  %v4227_v23 = vcombine.low %v2760_v43, %v2760_v43  ;;  %v4233_v63 = vcombine.low %v2766_v6, %v2766_v6  ;;  %v4234_v12 = vcombine.high %v2766_v6, %v2766_v6  ;;  %4541 = vmatpush3.bf16.msra.mxu0 %v4813_v30  ;;  %v2770_v25 = vsel %vm45_vm0, %v2754_v20, 0  ;;  %v2594_v45 = vld [vmem:[#allocation2 + $0xe0] sm:$0xff]  ;;  %v2426_v4 = vld [vmem:[#allocation2 + $0xc9] sm:$0xff] }
 0x37c   :  { %2453 = vrot.lane.b32.xlu0 %v2436_v39, %s4903_s1  ;;  %v4228_v39 = vcombine.high %v2760_v43, %v2760_v43  ;;  %4542 = vmatprep.subr.bf16.mxu0 %v4816_v29  ;;  %v4237_v43 = vcombine.low %v2770_v25, %v2770_v25  ;;  %v4238_v35 = vcombine.high %v2770_v25, %v2770_v25  ;;  %v6129_v29 = vld [vmem:[#allocation2 + $0x111] sm:$0xff]  ;;  %v2059_v7 = vld [vmem:[#allocation2 + $0x7] sm:$0xff] }
 0x37d   :  { %2831 = vst [vmem:[#allocation3 + $0x60] sm:$0xf] %v4227_v23  ;;  %2837 = vst [vmem:[#allocation3 + $0xd8] sm:$0xf] %v4233_v63  ;;  %v2274_v30 = vpack.c.bf16 %v2266_v51, %v5999_v24  ;;  %v2106_v23 = vpack.c.bf16 %v2098_v1, %v2097_v47  ;;  %v2439_v28 = vpack.c.bf16 %v6015_v3, %v6129_v29  ;;  %v2602_v63 = vld [vmem:[#allocation2 + $0x1d0] sm:$0xff] }
 0x37e   :  { %2832 = vst [vmem:[#allocation3 + $0x74] sm:$0xf] %v4228_v39  ;;  %2838 = vst [vmem:[#allocation3 + $0xec] sm:$0xf] %v4234_v12  ;;  %v6123_v39 = vld [vmem:[#allocation2 + $0xc8] sm:$0xff]  ;;  %v2441_v6 = vpack.c.bf16 %v6025_v46, %v6023_v15  ;;  %v2434_v12 = vld [vmem:[#allocation2 + $0x1b9] sm:$0xff] }
 0x37f   :  { %2295 = vrot.lane.b32.xlu1 %v2273_v41, %s4903_s1  ;;  %v2437_v41 = vpack.c.bf16 %v5997_v31, %v5995_v38  ;;  %2839 = vst [vmem:[#allocation3 + $0x100] sm:$0xf] %v4235_v32  ;;  %2840 = vst [vmem:[#allocation3 + $0x114] sm:$0xf] %v4236_v40  ;;  %4543 = vmatpush3.bf16.msra.mxu0 %v4817_v2  ;;  %v2606_v22 = vpack.c.bf16 %v2594_v45, %v6123_v39 }
 0x380   :  { %2127 = vrot.lane.b32.xlu0 %v6089_v58, %s4903_s1  ;;  %2841 = vst [vmem:[#allocation3 + $0x128] sm:$0xf] %v4237_v43  ;;  %2842 = vst [vmem:[#allocation3 + $0x13c] sm:$0xf] %v4238_v35  ;;  %v2442_v20 = vpack.c.bf16 %v2434_v12, %v6032_v56  ;;  %v2075_v32 = vpack.c.bf16 %v5933_v50, %v2059_v7 }
 0x383   :  { %2623 = vrot.lane.b32.xlu1 %v6013_v53, %s4903_s1  ;;  %v2438_v53 = vpack.c.bf16 %v2426_v4, %v6010_v18 }
 0x384   :  { %2455 = vrot.lane.b32.xlu0 %v2437_v41, %s4903_s1 }
 0x387   :  { %2297 = vrot.lane.b32.xlu1 %v2274_v30, %s4903_s1 }
 0x388   :  { %2129 = vrot.lane.b32.xlu0 %v2106_v23, %s4903_s1 }
 0x38b   :  { %2625 = vrot.lane.b32.xlu1 %v2606_v22, %s4903_s1 }
 0x38c   :  { %2457 = vrot.lane.b32.xlu0 %v2438_v53, %s4903_s1 }
 0x38f   :  { %2627 = vrot.lane.b32.xlu1 %v6074_v54, %s4903_s1  ;;  %v2610_v54 = vpack.c.bf16 %v2602_v63, %v6145_v13 }
 0x390   :  { %2459 = vrot.lane.b32.xlu0 %v2439_v28, %s4903_s1 }
 0x393   :  { %2629 = vrot.lane.b32.xlu1 %v6089_v58, %s4903_s1  ;;  %v2227_v58 = vld [vmem:[#allocation2 + $0x9] sm:$0xff] }
 0x394   :  { %2461 = vrot.lane.b32.xlu0 %v2440_v26, %s4903_s1  ;;  %v2243_v2 = vpack.c.bf16 %v6054_v57, %v2227_v58 }
 0x397   :  { %2631 = vrot.lane.b32.xlu1 %v2106_v23, %s4903_s1 }
 0x398   :  { %2463 = vrot.lane.b32.xlu0 %v2441_v6, %s4903_s1 }
 0x39b   :  { %2633 = vrot.lane.b32.xlu1 %v2610_v54, %s4903_s1 }
 0x39c   :  { %2465 = vrot.lane.b32.xlu0 %v2442_v20, %s4903_s1 }
 0x3d1   :  { %v2284_v40 = vpop.permute.xlu1 %2283 }
 0x3d2   :  { %v2116_v25 = vpop.permute.xlu0 %2115  ;;  %v2301_v41 = vsel %vm45_vm0, %v2243_v2, %v2284_v40  ;;  %v2235_v2 = vld [vmem:[#allocation2 + $0xf9] sm:$0xff]  ;;  %v4806_v40 = vld [vmem:[%s6629_s7 + $0x130] sm:$0xff]  }
 0x3d3   :  { %v2133_v43 = vsel %vm45_vm0, %v2075_v32, %v2116_v25  ;;  %v4175_v35 = vcombine.low %v2301_v41, %v2301_v41  ;;  %v4176_v51 = vcombine.high %v2301_v41, %v2301_v41  ;;  %v2067_v32 = vld [vmem:[#allocation2 + $0xf7] sm:$0xff] }
 0x3d4   :  { %v4159_v47 = vcombine.low %v2133_v43, %v2133_v43  ;;  %v4160_v1 = vcombine.high %v2133_v43, %v2133_v43 }
 0x3d5   :  { %2379 = vst [vmem:[#allocation3 + $0x4] sm:$0xf] %v4175_v35  ;;  %2380 = vst [vmem:[#allocation3 + $0x18] sm:$0xf] %v4176_v51  ;;  %v2286_v45 = vpop.permute.xlu1 %2285  ;;  %v2247_v51 = vpack.c.bf16 %v6129_v29, %v2235_v2  ;;  %v4814_v29 = vld [vmem:[%s6629_s7 + $0x128] sm:$0xff]  }
 0x3d6   :  { %2211 = vst [vmem:[#allocation3] sm:$0xf] %v4159_v47  ;;  %2212 = vst [vmem:[#allocation3 + $0x14] sm:$0xf] %v4160_v1  ;;  %v2118_v30 = vpop.permute.xlu0 %2117  ;;  %v2304_v50 = vsel %vm45_vm0, %v2244_v17, %v2286_v45  ;;  %v2079_v47 = vpack.c.bf16 %v6008_v14, %v2067_v32 }
 0x3d7   :  { %v2136_v57 = vsel %vm45_vm0, %v5945_v27, %v2118_v30  ;;  %v4177_v23 = vcombine.low %v2304_v50, %v2304_v50  ;;  %v4178_v4 = vcombine.high %v2304_v50, %v2304_v50 }
 0x3d8   :  { %v4161_v22 = vcombine.low %v2136_v57, %v2136_v57  ;;  %v4162_v53 = vcombine.high %v2136_v57, %v2136_v57 }
 0x3d9   :  { %2381 = vst [vmem:[#allocation3 + $0x2c] sm:$0xf] %v4177_v23  ;;  %2382 = vst [vmem:[#allocation3 + $0x40] sm:$0xf] %v4178_v4  ;;  %v2288_v28 = vpop.permute.xlu1 %2287 }
 0x3da   :  { %2213 = vst [vmem:[#allocation3 + $0x28] sm:$0xf] %v4161_v22  ;;  %2214 = vst [vmem:[#allocation3 + $0x3c] sm:$0xf] %v4162_v53  ;;  %v2120_v26 = vpop.permute.xlu0 %2119  ;;  %v2307_v9 = vsel %vm45_vm0, %v2245_v19, %v2288_v28  ;;  %v6656_v53 = vpack.c.bf16 %v5941_v16, %v5935_v34  ;;  %v6657_v16 = vpack.c.bf16 %v6017_v10, %v6015_v3 }
 0x3db   :  { %v2139_v5 = vsel %vm45_vm0, %v5955_v49, %v2120_v26  ;;  %v4179_v17 = vcombine.low %v2307_v9, %v2307_v9  ;;  %v4180_v6 = vcombine.high %v2307_v9, %v2307_v9  ;;  %v4823_v9 = vld [vmem:[%s6629_s7 + $0x120] sm:$0xff]  }
 0x3dc   :  { %v4163_v63 = vcombine.low %v2139_v5, %v2139_v5  ;;  %v4164_v12 = vcombine.high %v2139_v5, %v2139_v5  ;;  %v4798_v7 = vld [vmem:[#allocation3 + $0x4] ss:$20 sps:$4 sm:$0xff]  }
 0x3dd   :  { %v4796_v54 = vld [vmem:[#allocation3] ss:$20 sps:$4 sm:$0xff]   ;;  %2383 = vst [vmem:[#allocation3 + $0x54] sm:$0xf] %v4179_v17  ;;  %2384 = vst [vmem:[#allocation3 + $0x68] sm:$0xf] %v4180_v6  ;;  %v2290_v20 = vpop.permute.xlu1 %2289  ;;  %3451 = vmatprep.mubr.bf16.mxu1 %v4798_v7 }
 0x3de   :  { %2215 = vst [vmem:[#allocation3 + $0x50] sm:$0xf] %v4163_v63  ;;  %2216 = vst [vmem:[#allocation3 + $0x64] sm:$0xf] %v4164_v12  ;;  %v2122_v58 = vpop.permute.xlu0 %2121  ;;  %v2310_v38 = vsel %vm45_vm0, %v6655_v36, %v2290_v20  ;;  %3452 = vmatmul.mubr.bf16.vlgmr.msra.gmra.mxu1 %v4796_v54  ;;  %v6658_v20 = vpack.c.bf16 %v5971_v44, %v5965_v21  ;;  %v4830_v7 = vld [vmem:[%s6629_s7 + $0x118] sm:$0xff]  }
 0x3df   :  { %v2142_v19 = vsel %vm45_vm0, %v5959_v52, %v2122_v58  ;;  %v4181_v25 = vcombine.low %v2310_v38, %v2310_v38  ;;  %v4182_v41 = vcombine.high %v2310_v38, %v2310_v38  ;;  %4641 = vmatpush3.bf16.msra.mxu1 %v6045_v37 }
 0x3e0   :  { %v4165_v43 = vcombine.low %v2142_v19, %v2142_v19  ;;  %v4166_v35 = vcombine.high %v2142_v19, %v2142_v19  ;;  %v4802_v31 = vld [vmem:[#allocation3 + $0x2c] ss:$20 sps:$4 sm:$0xff]   ;;  %4642 = vmatprep.subr.bf16.mxu1 %v4806_v40  ;;  %v6659_v19 = vpack.c.bf16 %v5951_v33, %v5943_v59 }
 0x3e1   :  { %2385 = vst [vmem:[#allocation3 + $0x7c] sm:$0xf] %v4181_v25  ;;  %2386 = vst [vmem:[#allocation3 + $0x90] sm:$0xf] %v4182_v41  ;;  %v2292_v18 = vpop.permute.xlu1 %2291  ;;  %3459 = vmatprep.mubr.bf16.mxu1 %v4802_v31  ;;  %v4807_v26 = vld [vmem:[#allocation3 + $0x28] ss:$20 sps:$4 sm:$0xff]  }
 0x3e2   :  { %2217 = vst [vmem:[#allocation3 + $0x78] sm:$0xf] %v4165_v43  ;;  %2218 = vst [vmem:[#allocation3 + $0x8c] sm:$0xf] %v4166_v35  ;;  %v2124_v1 = vpop.permute.xlu0 %2123  ;;  %v2313_v45 = vsel %vm45_vm0, %v2247_v51, %v2292_v18  ;;  %v4837_v41 = vld [vmem:[%s6629_s7 + $0x110] sm:$0xff]  }
 0x3e3   :  { %v2145_v30 = vsel %vm45_vm0, %v2079_v47, %v2124_v1  ;;  %v4183_v14 = vcombine.low %v2313_v45, %v2313_v45  ;;  %v4184_v50 = vcombine.high %v2313_v45, %v2313_v45  ;;  %4643 = vmatpush3.bf16.msra.mxu1 %v4806_v40  ;;  %v6660_v1 = vpack.c.bf16 %v6023_v15, %v6021_v60 }
 0x3e4   :  { %v4167_v57 = vcombine.low %v2145_v30, %v2145_v30  ;;  %v4168_v23 = vcombine.high %v2145_v30, %v2145_v30  ;;  %4644 = vmatprep.subr.bf16.mxu1 %v4814_v29  ;;  %v4810_v12 = vld [vmem:[#allocation3 + $0x54] ss:$20 sps:$4 sm:$0xff]   ;;  %v6661_v30 = vpack.c.bf16 %v5983_v0, %v5975_v11 }
 0x3e5   :  { %2387 = vst [vmem:[#allocation3 + $0xa4] sm:$0xf] %v4183_v14  ;;  %2388 = vst [vmem:[#allocation3 + $0xb8] sm:$0xf] %v4184_v50  ;;  %v2620_v37 = vpop.permute.xlu1 %2619  ;;  %v4815_v25 = vld [vmem:[#allocation3 + $0x50] ss:$20 sps:$4 sm:$0xff]  }
 0x3e6   :  { %2219 = vst [vmem:[#allocation3 + $0xa0] sm:$0xf] %v4167_v57  ;;  %2220 = vst [vmem:[#allocation3 + $0xb4] sm:$0xf] %v4168_v23  ;;  %v2452_v4 = vpop.permute.xlu0 %2451  ;;  %v2637_v22 = vsel %vm45_vm0, %v5945_v27, %v2620_v37  ;;  %3460 = vmatmul.mubr.bf16.gmra.mxu1 %v4807_v26  ;;  %v4845_v14 = vld [vmem:[%s6629_s7 + $0x108] sm:$0xff]  }
 0x3e7   :  { %v2469_v28 = vsel %vm45_vm0, %v6656_v53, %v2452_v4  ;;  %v4207_v5 = vcombine.low %v2637_v22, %v2637_v22  ;;  %v4208_v17 = vcombine.high %v2637_v22, %v2637_v22  ;;  %3467 = vmatprep.mubr.bf16.mxu1 %v4810_v12  ;;  %4645 = vmatpush3.bf16.msra.mxu1 %v4814_v29 }
 0x3e8   :  { %v4191_v6 = vcombine.low %v2469_v28, %v2469_v28  ;;  %v4192_v63 = vcombine.high %v2469_v28, %v2469_v28  ;;  %4646 = vmatprep.subr.bf16.mxu1 %v4823_v9  ;;  %v4818_v31 = vld [vmem:[#allocation3 + $0x7c] ss:$20 sps:$4 sm:$0xff]   ;;  %v6662_v4 = vpack.c.bf16 %v5957_v62, %v5953_v8  ;;  %v4852_v28 = vld [vmem:[%s6629_s7 + $0x100] sm:$0xff]  }
 0x3e9   :  { %2715 = vst [vmem:[#allocation3 + $0xc] sm:$0xf] %v4207_v5  ;;  %2716 = vst [vmem:[#allocation3 + $0x20] sm:$0xf] %v4208_v17  ;;  %v2294_v27 = vpop.permute.xlu1 %2293  ;;  %v4824_v53 = vld [vmem:[#allocation3 + $0x78] ss:$20 sps:$4 sm:$0xff]  }
 0x3ea   :  { %2547 = vst [vmem:[#allocation3 + $0x8] sm:$0xf] %v4191_v6  ;;  %2548 = vst [vmem:[#allocation3 + $0x1c] sm:$0xf] %v4192_v63  ;;  %v2126_v34 = vpop.permute.xlu0 %2125  ;;  %v2316_v54 = vsel %vm45_vm0, %v6657_v16, %v2294_v27  ;;  %v2570_v63 = vld [vmem:[#allocation2 + $0xdf] sm:$0xff]  ;;  %v2569_v27 = vld [vmem:[#allocation2 + $0xc7] sm:$0xff]  ;;  %v6663_v16 = vpack.c.bf16 %v6032_v56, %v6025_v46 }
 0x3eb   :  { %v2148_v58 = vsel %vm45_vm0, %v6658_v20, %v2126_v34  ;;  %v4185_v2 = vcombine.low %v2316_v54, %v2316_v54  ;;  %v4186_v32 = vcombine.high %v2316_v54, %v2316_v54  ;;  %4647 = vmatpush3.bf16.msra.mxu1 %v4823_v9  ;;  %v2401_v34 = vld [vmem:[#allocation2 + $0xb0] sm:$0xff]  ;;  %v6664_v20 = vpack.c.bf16 %v5999_v24, %v5989_v61  ;;  %v2404_v24 = vld [vmem:[#allocation2 + $0x128] sm:$0xff] }
 0x3ec   :  { %v4169_v36 = vcombine.low %v2148_v58, %v2148_v58  ;;  %v4170_v38 = vcombine.high %v2148_v58, %v2148_v58  ;;  %4648 = vmatprep.subr.bf16.mxu1 %v4830_v7  ;;  %v4825_v6 = vld [vmem:[#allocation3 + $0xa4] ss:$20 sps:$4 sm:$0xff]   ;;  %v2403_v61 = vld [vmem:[#allocation2 + $0x110] sm:$0xff] }
 0x3ed   :  { %2389 = vst [vmem:[#allocation3 + $0xcc] sm:$0xf] %v4185_v2  ;;  %2390 = vst [vmem:[#allocation3 + $0xe0] sm:$0xf] %v4186_v32  ;;  %v2622_v3 = vpop.permute.xlu1 %2621 }
 0x3ee   :  { %2221 = vst [vmem:[#allocation3 + $0xc8] sm:$0xf] %v4169_v36  ;;  %2222 = vst [vmem:[#allocation3 + $0xdc] sm:$0xf] %v4170_v38  ;;  %v2454_v10 = vpop.permute.xlu0 %2453  ;;  %v2640_v21 = vsel %vm45_vm0, %v5955_v49, %v2622_v3  ;;  %3468 = vmatmul.mubr.bf16.gmra.mxu1 %v4815_v25  ;;  %v2582_v38 = vpack.c.bf16 %v2570_v63, %v2569_v27  ;;  %v2414_v3 = vpack.c.bf16 %v6123_v39, %v2401_v34 }
 0x3ef   :  { %v2472_v40 = vsel %vm45_vm0, %v6659_v19, %v2454_v10  ;;  %v4209_v43 = vcombine.low %v2640_v21, %v2640_v21  ;;  %v4210_v35 = vcombine.high %v2640_v21, %v2640_v21  ;;  %3475 = vmatprep.mubr.bf16.mxu1 %v4818_v31  ;;  %4649 = vmatpush3.bf16.msra.mxu1 %v4830_v7  ;;  %v2571_v10 = vld [vmem:[#allocation2 + $0x127] sm:$0xff] }
 0x3f0   :  { %v4193_v51 = vcombine.low %v2472_v40, %v2472_v40  ;;  %v4194_v47 = vcombine.high %v2472_v40, %v2472_v40  ;;  %v4822_v49 = vld [vmem:[#allocation3 + $0xc] ss:$20 sps:$4 sm:$0xff]   ;;  %4650 = vmatprep.subr.bf16.mxu1 %v4837_v41  ;;  %v2415_v31 = vpack.c.bf16 %v2404_v24, %v2403_v61 }
 0x3f1   :  { %v4820_v18 = vld [vmem:[#allocation3 + $0x8] ss:$20 sps:$4 sm:$0xff]   ;;  %2717 = vst [vmem:[#allocation3 + $0x34] sm:$0xf] %v4209_v43  ;;  %2718 = vst [vmem:[#allocation3 + $0x48] sm:$0xf] %v4210_v35  ;;  %v2296_v59 = vpop.permute.xlu1 %2295  ;;  %3548 = vmatprep.mubr.bf16.mxu0 %v4822_v49 }
 0x3f2   :  { %2549 = vst [vmem:[#allocation3 + $0x30] sm:$0xf] %v4193_v51  ;;  %2550 = vst [vmem:[#allocation3 + $0x44] sm:$0xf] %v4194_v47  ;;  %v2128_v33 = vpop.permute.xlu0 %2127  ;;  %v2319_v45 = vsel %vm45_vm0, %v6660_v1, %v2296_v59  ;;  %3549 = vmatmul.mubr.bf16.vlgmr.msra.gmra.mxu0 %v4820_v18  ;;  %v4831_v40 = vld [vmem:[#allocation3 + $0xa0] ss:$20 sps:$4 sm:$0xff]   ;;  %v2583_v47 = vpack.c.bf16 %v5971_v44, %v2571_v10 }
 0x3f3   :  { %v2151_v29 = vsel %vm45_vm0, %v6661_v30, %v2128_v33  ;;  %v4187_v50 = vcombine.low %v2319_v45, %v2319_v45  ;;  %v4188_v57 = vcombine.high %v2319_v45, %v2319_v45  ;;  %4651 = vmatpush3.bf16.msra.mxu1 %v4837_v41  ;;  %v2573_v51 = vld [vmem:[#allocation2 + $0x157] sm:$0xff]  ;;  %v2405_v1 = vld [vmem:[#allocation2 + $0x140] sm:$0xff] }
 0x3f4   :  { %v4171_v23 = vcombine.low %v2151_v29, %v2151_v29  ;;  %v4172_v37 = vcombine.high %v2151_v29, %v2151_v29  ;;  %4652 = vmatprep.subr.bf16.mxu1 %v4845_v14  ;;  %v4832_v39 = vld [vmem:[#allocation3 + $0xcc] ss:$20 sps:$4 sm:$0xff]   ;;  %v2406_v45 = vld [vmem:[#allocation2 + $0x158] sm:$0xff] }
 0x3f5   :  { %2391 = vst [vmem:[#allocation3 + $0xf4] sm:$0xf] %v4187_v50  ;;  %2392 = vst [vmem:[#allocation3 + $0x108] sm:$0xf] %v4188_v57  ;;  %v2624_v60 = vpop.permute.xlu1 %2623 }
 0x3f6   :  { %2223 = vst [vmem:[#allocation3 + $0xf0] sm:$0xf] %v4171_v23  ;;  %2224 = vst [vmem:[#allocation3 + $0x104] sm:$0xf] %v4172_v37  ;;  %v2456_v15 = vpop.permute.xlu0 %2455  ;;  %v2643_v11 = vsel %vm45_vm0, %v5959_v52, %v2624_v60  ;;  %3476 = vmatmul.mubr.bf16.gmra.mxu1 %v4824_v53  ;;  %v2873_v23 = vld [vmem:[#allocation3 + $0xc8] sm:$0xff]  ;;  %v2876_v37 = vld [vmem:[#allocation3 + $0xdc] sm:$0xff]  ;;  %v2584_v60 = vpack.c.bf16 %v5983_v0, %v2573_v51 }
 0x3f7   :  { %v2475_v22 = vsel %vm45_vm0, %v6662_v4, %v2456_v15  ;;  %v4211_v26 = vcombine.low %v2643_v11, %v2643_v11  ;;  %v4212_v9 = vcombine.high %v2643_v11, %v2643_v11  ;;  %3483 = vmatprep.mubr.bf16.mxu1 %v4825_v6  ;;  %4653 = vmatpush3.bf16.msra.mxu1 %v4845_v14  ;;  %v2575_v11 = vld [vmem:[#allocation2 + $0x187] sm:$0xff]  ;;  %v2576_v53 = vld [vmem:[#allocation2 + $0x19f] sm:$0xff] }
 0x3f8   :  { %v4195_v5 = vcombine.low %v2475_v22, %v2475_v22  ;;  %v4196_v17 = vcombine.high %v2475_v22, %v2475_v22  ;;  %v4827_v12 = vld [vmem:[#allocation3 + $0x34] ss:$20 sps:$4 sm:$0xff]   ;;  %4654 = vmatprep.subr.bf16.mxu1 %v4852_v28  ;;  %v2416_v15 = vpack.c.bf16 %v2406_v45, %v2405_v1 }
 0x3f9   :  { %2719 = vst [vmem:[#allocation3 + $0x5c] sm:$0xf] %v4211_v26  ;;  %2720 = vst [vmem:[#allocation3 + $0x70] sm:$0xf] %v4212_v9  ;;  %v2298_v8 = vpop.permute.xlu1 %2297  ;;  %v4829_v52 = vld [vmem:[#allocation3 + $0x30] ss:$20 sps:$4 sm:$0xff]   ;;  %3556 = vmatprep.mubr.bf16.mxu0 %v4827_v12 }
 0x3fa   :  { %2551 = vst [vmem:[#allocation3 + $0x58] sm:$0xf] %v4195_v5  ;;  %2552 = vst [vmem:[#allocation3 + $0x6c] sm:$0xf] %v4196_v17  ;;  %v2130_v62 = vpop.permute.xlu0 %2129  ;;  %v2322_v54 = vsel %vm45_vm0, %v6663_v16, %v2298_v8  ;;  %3557 = vmatmul.mubr.bf16.gmra.mxu0 %v4829_v52  ;;  %v2408_v26 = vld [vmem:[#allocation2 + $0x188] sm:$0xff]  ;;  %v4264_v17 = vcombine.low %v2873_v23, %v2876_v37  ;;  %v2585_v52 = vpack.c.bf16 %v2576_v53, %v2575_v11 }
 0x3fb   :  { %v2154_v58 = vsel %vm45_vm0, %v6664_v20, %v2130_v62  ;;  %v4189_v7 = vcombine.low %v2322_v54, %v2322_v54  ;;  %v4190_v2 = vcombine.high %v2322_v54, %v2322_v54  ;;  %4655 = vmatpush3.bf16.msra.mxu1 %v4852_v28  ;;  %v2407_v28 = vld [vmem:[#allocation2 + $0x170] sm:$0xff]  ;;  %v4868_v23 = vld [vmem:[#allocation3 + $0x128] ss:$20 sps:$4 sm:$0xff]  }
 0x3fc   :  { %v4173_v32 = vcombine.low %v2154_v58, %v2154_v58  ;;  %v4174_v36 = vcombine.high %v2154_v58, %v2154_v58  ;;  %v4838_v8 = vld [vmem:[#allocation3 + $0xf4] ss:$20 sps:$4 sm:$0xff]   ;;  %v2417_v27 = vpack.c.bf16 %v2408_v26, %v2407_v28 }
 0x3fd   :  { %2393 = vst [vmem:[#allocation3 + $0x11c] sm:$0xf] %v4189_v7  ;;  %2394 = vst [vmem:[#allocation3 + $0x130] sm:$0xf] %v4190_v2  ;;  %v2626_v46 = vpop.permute.xlu1 %2625  ;;  %v2578_v62 = vld [vmem:[#allocation2 + $0x1cf] sm:$0xff]  ;;  %v2577_v58 = vld [vmem:[#allocation2 + $0x1b7] sm:$0xff] }
 0x3fe   :  { %2225 = vst [vmem:[#allocation3 + $0x118] sm:$0xf] %v4173_v32  ;;  %2226 = vst [vmem:[#allocation3 + $0x12c] sm:$0xf] %v4174_v36  ;;  %v2458_v56 = vpop.permute.xlu0 %2457  ;;  %v2646_v21 = vsel %vm45_vm0, %v2582_v38, %v2626_v46  ;;  %3484 = vmatmul.mubr.bf16.gmra.mxu1 %v4831_v40  ;;  %v2409_v7 = vld [vmem:[#allocation2 + $0x1a0] sm:$0xff] }
 0x3ff   :  { %v2478_v19 = vsel %vm45_vm0, %v2414_v3, %v2458_v56  ;;  %v4213_v25 = vcombine.low %v2646_v21, %v2646_v21  ;;  %v4214_v41 = vcombine.high %v2646_v21, %v2646_v21  ;;  %3491 = vmatprep.mubr.bf16.mxu1 %v4832_v39  ;;  %v2586_v56 = vpack.c.bf16 %v2578_v62, %v2577_v58  ;;  %v4859_v1 = vld [vmem:[#allocation3 + $0x60] ss:$20 sps:$4 sm:$0xff]  }
 0x400   :  { %v4197_v43 = vcombine.low %v2478_v19, %v2478_v19  ;;  %v4198_v35 = vcombine.high %v2478_v19, %v2478_v19  ;;  %v4834_v18 = vld [vmem:[#allocation3 + $0x5c] ss:$20 sps:$4 sm:$0xff]   ;;  %v2418_v10 = vpack.c.bf16 %v6145_v13, %v2409_v7 }
 0x401   :  { %2721 = vst [vmem:[#allocation3 + $0x84] sm:$0xf] %v4213_v25  ;;  %2722 = vst [vmem:[#allocation3 + $0x98] sm:$0xf] %v4214_v41  ;;  %v2628_v59 = vpop.permute.xlu1 %2627  ;;  %v4836_v49 = vld [vmem:[#allocation3 + $0x58] ss:$20 sps:$4 sm:$0xff]   ;;  %3564 = vmatprep.mubr.bf16.mxu0 %v4834_v18 }
 0x402   :  { %2553 = vst [vmem:[#allocation3 + $0x80] sm:$0xf] %v4197_v43  ;;  %2554 = vst [vmem:[#allocation3 + $0x94] sm:$0xf] %v4198_v35  ;;  %v2460_v33 = vpop.permute.xlu0 %2459  ;;  %v2649_v30 = vsel %vm45_vm0, %v2583_v47, %v2628_v59  ;;  %3565 = vmatmul.mubr.bf16.gmra.mxu0 %v4836_v49  ;;  %v4846_v25 = vld [vmem:[#allocation3 + $0xf0] ss:$20 sps:$4 sm:$0xff]  }
 0x403   :  { %v2481_v29 = vsel %vm45_vm0, %v2415_v31, %v2460_v33  ;;  %v4215_v14 = vcombine.low %v2649_v30, %v2649_v30  ;;  %v4216_v50 = vcombine.high %v2649_v30, %v2649_v30  ;;  %v4854_v18 = vld [vmem:[#allocation3 + $0x10] ss:$20 sps:$4 sm:$0xff]   ;;  %v4858_v49 = vld [vmem:[#allocation3 + $0x38] ss:$20 sps:$4 sm:$0xff]  }
 0x404   :  { %v4199_v44 = vcombine.low %v2481_v29, %v2481_v29  ;;  %v4200_v57 = vcombine.high %v2481_v29, %v2481_v29  ;;  %v4847_v51 = vld [vmem:[#allocation3 + $0x11c] ss:$20 sps:$4 sm:$0xff]  }
 0x405   :  { %2723 = vst [vmem:[#allocation3 + $0xac] sm:$0xf] %v4215_v14  ;;  %2724 = vst [vmem:[#allocation3 + $0xc0] sm:$0xf] %v4216_v50  ;;  %v2630_v4 = vpop.permute.xlu1 %2629  ;;  %v4853_v31 = vld [vmem:[#allocation3 + $0x118] ss:$20 sps:$4 sm:$0xff]  }
 0x406   :  { %2555 = vst [vmem:[#allocation3 + $0xa8] sm:$0xf] %v4199_v44  ;;  %2556 = vst [vmem:[#allocation3 + $0xbc] sm:$0xf] %v4200_v57  ;;  %v2462_v22 = vpop.permute.xlu0 %2461  ;;  %v2652_v9 = vsel %vm45_vm0, %v2584_v60, %v2630_v4  ;;  %3492 = vmatmul.mubr.bf16.gmra.mxu1 %v4264_v17  ;;  %v4863_v29 = vld [vmem:[#allocation3 + $0x88] ss:$20 sps:$4 sm:$0xff]  }
 0x407   :  { %v2484_v5 = vsel %vm45_vm0, %v2416_v15, %v2462_v22  ;;  %v4217_v6 = vcombine.low %v2652_v9, %v2652_v9  ;;  %v4218_v63 = vcombine.high %v2652_v9, %v2652_v9  ;;  %3499 = vmatprep.mubr.bf16.mxu1 %v4838_v8  ;;  %v4864_v14 = vld [vmem:[#allocation3 + $0xb0] ss:$20 sps:$4 sm:$0xff]   ;;  %v4866_v44 = vld [vmem:[#allocation3 + $0xd8] ss:$20 sps:$4 sm:$0xff]   ;;  %v4867_v57 = vld [vmem:[#allocation3 + $0x100] ss:$20 sps:$4 sm:$0xff]  }
 0x408   :  { %v4201_v12 = vcombine.low %v2484_v5, %v2484_v5  ;;  %v4202_v0 = vcombine.high %v2484_v5, %v2484_v5  ;;  %v4840_v34 = vld [vmem:[#allocation3 + $0x84] ss:$20 sps:$4 sm:$0xff]  }
 0x409   :  { %2725 = vst [vmem:[#allocation3 + $0xd4] sm:$0xf] %v4217_v6  ;;  %2726 = vst [vmem:[#allocation3 + $0xe8] sm:$0xf] %v4218_v63  ;;  %v2632_v16 = vpop.permute.xlu1 %2631  ;;  %v4842_v20 = vld [vmem:[#allocation3 + $0x80] ss:$20 sps:$4 sm:$0xff]   ;;  %3572 = vmatprep.mubr.bf16.mxu0 %v4840_v34 }
 0x40a   :  { %2557 = vst [vmem:[#allocation3 + $0xd0] sm:$0xf] %v4201_v12  ;;  %2558 = vst [vmem:[#allocation3 + $0xe4] sm:$0xf] %v4202_v0  ;;  %v2464_v54 = vpop.permute.xlu0 %2463  ;;  %v2655_v2 = vsel %vm45_vm0, %v2585_v52, %v2632_v16  ;;  %3573 = vmatmul.mubr.bf16.gmra.mxu0 %v4842_v20 }
 0x40b   :  { %v2487_v32 = vsel %vm45_vm0, %v2417_v27, %v2464_v54  ;;  %v4219_v36 = vcombine.low %v2655_v2, %v2655_v2  ;;  %v4220_v38 = vcombine.high %v2655_v2, %v2655_v2 }
 0x40c   :  { %v4203_v3 = vcombine.low %v2487_v32, %v2487_v32  ;;  %v4204_v46 = vcombine.high %v2487_v32, %v2487_v32  ;;  %v4843_v61 = vld [vmem:[#allocation3 + $0xac] ss:$20 sps:$4 sm:$0xff]  }
 0x40d   :  { %2727 = vst [vmem:[#allocation3 + $0xfc] sm:$0xf] %v4219_v36  ;;  %2728 = vst [vmem:[#allocation3 + $0x110] sm:$0xf] %v4220_v38  ;;  %v2634_v24 = vpop.permute.xlu1 %2633  ;;  %3580 = vmatprep.mubr.bf16.mxu0 %v4843_v61  ;;  %v4849_v13 = vld [vmem:[#allocation3 + $0xa8] ss:$20 sps:$4 sm:$0xff]  }
 0x40e   :  { %2559 = vst [vmem:[#allocation3 + $0xf8] sm:$0xf] %v4203_v3  ;;  %2560 = vst [vmem:[#allocation3 + $0x10c] sm:$0xf] %v4204_v46  ;;  %v2466_v21 = vpop.permute.xlu0 %2465  ;;  %v2658_v19 = vsel %vm45_vm0, %v2586_v56, %v2634_v24  ;;  %3500 = vmatmul.mubr.bf16.gmra.mxu1 %v4846_v25 }
 0x40f   :  { %v2490_v40 = vsel %vm45_vm0, %v2418_v10, %v2466_v21  ;;  %v4221_v41 = vcombine.low %v2658_v19, %v2658_v19  ;;  %v4222_v43 = vcombine.high %v2658_v19, %v2658_v19  ;;  %3507 = vmatprep.mubr.bf16.mxu1 %v4847_v51 }
 0x410   :  { %v4205_v35 = vcombine.low %v2490_v40, %v2490_v40  ;;  %v4206_v39 = vcombine.high %v2490_v40, %v2490_v40  ;;  %v4850_v47 = vld [vmem:[#allocation3 + $0xd4] ss:$20 sps:$4 sm:$0xff]  }
 0x411   :  { %2729 = vst [vmem:[#allocation3 + $0x124] sm:$0xf] %v4221_v41  ;;  %2730 = vst [vmem:[#allocation3 + $0x138] sm:$0xf] %v4222_v43  ;;  %v4855_v59 = vld [vmem:[#allocation3 + $0xd0] ss:$20 sps:$4 sm:$0xff]  }
 0x412   :  { %2561 = vst [vmem:[#allocation3 + $0x120] sm:$0xf] %v4205_v35  ;;  %2562 = vst [vmem:[#allocation3 + $0x134] sm:$0xf] %v4206_v39  ;;  %3581 = vmatmul.mubr.bf16.gmra.mxu0 %v4849_v13 }
 0x413   :  { %3588 = vmatprep.mubr.bf16.mxu0 %v4850_v47 }
 0x414   :  { %v4856_v33 = vld [vmem:[#allocation3 + $0xfc] ss:$20 sps:$4 sm:$0xff]  }
 0x415   :  { %v4860_v45 = vld [vmem:[#allocation3 + $0xf8] ss:$20 sps:$4 sm:$0xff]  }
 0x416   :  { %3508 = vmatmul.mubr.bf16.gmra.mxu1 %v4853_v31 }
 0x417   :  { %4656 = vmatprep.mubr.bf16.mxu1 %v4854_v18  ;;  %v3711_v18 = vld [vmem:[%s6630_s8] sm:$0xff] }
 0x418   :  { %v4861_v30 = vld [vmem:[#allocation3 + $0x124] ss:$20 sps:$4 sm:$0xff]  }
 0x419   :  { %v4865_v50 = vld [vmem:[#allocation3 + $0x120] ss:$20 sps:$4 sm:$0xff]  }
 0x41a   :  { %3589 = vmatmul.mubr.bf16.gmra.mxu0 %v4855_v59 }
 0x41b   :  { %3596 = vmatprep.mubr.bf16.mxu0 %v4856_v33 }
 0x41e   :  { %4657 = vmatmul.mubr.bf16.vlgmr.msra.gmra.mxu1 %v4858_v49  ;;  %v3713_v49 = vld [vmem:[%s6630_s8 + $0x10] sm:$0xff] }
 0x41f   :  { %4660 = vmatprep.mubr.bf16.mxu1 %v4859_v1 }
 0x422   :  { %3597 = vmatmul.mubr.bf16.gmra.mxu0 %v4860_v45 }
 0x423   :  { %3604 = vmatprep.mubr.bf16.mxu0 %v4861_v30  ;;  %v3719_v30 = vmul.f32 %v3711_v18, %v5578_v55 }
 0x426   :  { %4661 = vmatmul.mubr.bf16.gmra.mxu1 %v4863_v29 }
 0x427   :  { %4664 = vmatprep.mubr.bf16.mxu1 %v4864_v14 }
 0x42a   :  { %3605 = vmatmul.mubr.bf16.gmra.mxu0 %v4865_v50  ;;  %v3712_v50 = vld [vmem:[%s6630_s8 + $0x8] sm:$0xff] }
 0x42b   :  { %v3720_v18 = vmul.f32 %v3712_v50, %v5578_v55 }
 0x42e   :  { %4665 = vmatmul.mubr.bf16.gmra.mxu1 %v4866_v44 }
 0x42f   :  { %4668 = vmatprep.mubr.bf16.mxu1 %v4867_v57 }
 0x436   :  { %4669 = vmatmul.mubr.bf16.gmra.mxu1 %v4868_v23  ;;  %v3721_v23 = vmul.f32 %v3713_v49, %v5578_v55 }
 0x49e   :  { %v4480_v37 = vpop.f32.mrf.mxu1 }
 0x4a0   :  { %v4481_v60 = vpop.f32.mrf.mxu1 }
 0x4a1   :  { %v4482_v42 = vadd.f32 %v4481_v60, %v4480_v37 }
 0x4a2   :  { %v6257_v15 = vpop.f32.mrf.mxu1 }
 0x4a4   :  { %v6259_v11 = vpop.f32.mrf.mxu1 }
 0x4a6   :  { %v4486_v4 = vpop.f32.mrf.mxu1 }
 0x4a8   :  { %v4487_v22 = vpop.f32.mrf.mxu1 }
 0x4a9   :  { %v4488_v48 = vadd.f32 %v4487_v22, %v4486_v4  ;;  %v3717_v22 = vld [vmem:[%s6630_s8 + $0x30] sm:$0xff] }
 0x4aa   :  { %v6261_v53 = vpop.f32.mrf.mxu1 }
 0x4ac   :  { %v6263_v28 = vpop.f32.mrf.mxu1 }
 0x4ae   :  { %v6265_v26 = vpop.f32.mrf.mxu1 }
 0x4b0   :  { %v6267_v9 = vpop.f32.mrf.mxu1 }
 0x4b2   :  { %v6269_v5 = vpop.f32.mrf.mxu1  ;;  %v4544_v17 = vpop.f32.mrf.mxu0 }
 0x4b4   :  { %v6271_v6 = vpop.f32.mrf.mxu1  ;;  %v4545_v63 = vpop.f32.mrf.mxu0 }
 0x4b5   :  { %v4546_v29 = vadd.f32 %v4545_v63, %v4544_v17  ;;  %v3714_v17 = vld [vmem:[%s6630_s8 + $0x18] sm:$0xff] }
 0x4b6   :  { %v6273_v12 = vpop.f32.mrf.mxu1  ;;  %v4547_v0 = vpop.f32.mrf.mxu0  ;;  %v3722_v50 = vmul.f32 %v3714_v17, %v5578_v55 }
 0x4b7   :  { %v3551_v4 = vadd.f32 %v4546_v29, %v4482_v42  ;;  %v4491_v42 = vadd.f32 %v6263_v28, %v6261_v53  ;;  %v3716_v53 = vld [vmem:[%s6630_s8 + $0x28] sm:$0xff]  ;;  %v4494_v28 = vadd.f32 %v6267_v9, %v6265_v26  ;;  %v3718_v26 = vld [vmem:[%s6630_s8 + $0x38] sm:$0xff] }
 0x4b8   :  { %v6275_v8 = vpop.f32.mrf.mxu1  ;;  %v4548_v62 = vpop.f32.mrf.mxu0 }
 0x4b9   :  { %v4549_v49 = vadd.f32 %v4548_v62, %v4547_v0 }
 0x4ba   :  { %v6277_v52 = vpop.f32.mrf.mxu1  ;;  %v4550_v27 = vpop.f32.mrf.mxu0 }
 0x4bc   :  { %v6279_v34 = vpop.f32.mrf.mxu1  ;;  %v4551_v16 = vpop.f32.mrf.mxu0 }
 0x4bd   :  { %v4552_v14 = vadd.f32 %v4551_v16, %v4550_v27 }
 0x4be   :  { %v6281_v54 = vpop.f32.mrf.mxu1  ;;  %v4553_v20 = vpop.f32.mrf.mxu0 }
 0x4bf   :  { %v3559_v60 = vadd.f32 %v4552_v14, %v4488_v48  ;;  %v4485_v48 = vadd.f32 %v6259_v11, %v6257_v15 }
 0x4c0   :  { %v6283_v58 = vpop.f32.mrf.mxu1  ;;  %v4554_v7 = vpop.f32.mrf.mxu0 }
 0x4c1   :  { %v4555_v37 = vadd.f32 %v4554_v7, %v4553_v20  ;;  %v3554_v11 = vadd.f32 %v4549_v49, %v4485_v48  ;;  %v4503_v48 = vadd.f32 %v6279_v34, %v6277_v52 }
 0x4c2   :  { %v6285_v2 = vpop.f32.mrf.mxu1  ;;  %v4556_v32 = vpop.f32.mrf.mxu0 }
 0x4c3   :  { %v3562_v15 = vadd.f32 %v4555_v37, %v4491_v42 }
 0x4c4   :  { %v6287_v36 = vpop.f32.mrf.mxu1  ;;  %v4557_v38 = vpop.f32.mrf.mxu0 }
 0x4c5   :  { %v4558_v17 = vadd.f32 %v4557_v38, %v4556_v32 }
 0x4c6   :  { %v6289_v3 = vpop.f32.mrf.mxu1  ;;  %v6291_v46 = vpop.f32.mrf.mxu0 }
 0x4c8   :  { %v6293_v56 = vpop.f32.mrf.mxu1  ;;  %v6295_v10 = vpop.f32.mrf.mxu0 }
 0x4c9   :  { %v4561_v9 = vadd.f32 %v6295_v10, %v6291_v46  ;;  %v4497_v10 = vadd.f32 %v6271_v6, %v6269_v5 }
 0x4ca   :  { %v6297_v61 = vpop.f32.mrf.mxu1  ;;  %v4562_v24 = vpop.f32.mrf.mxu0 }
 0x4cb   :  { %v3570_v34 = vadd.f32 %v4561_v9, %v4497_v10 }
 0x4cc   :  { %v6299_v21 = vpop.f32.mrf.mxu1  ;;  %v4563_v19 = vpop.f32.mrf.mxu0 }
 0x4cd   :  { %v4564_v20 = vadd.f32 %v4563_v19, %v4562_v24  ;;  %v4500_v24 = vadd.f32 %v6275_v8, %v6273_v12 }
 0x4ce   :  { %v6301_v40 = vpop.f32.mrf.mxu1  ;;  %v6303_v25 = vpop.f32.mrf.mxu0 }
 0x4cf   :  { %v3575_v8 = vadd.f32 %v4564_v20, %v4500_v24 }
 0x4d0   :  { %v6305_v41 = vpop.f32.mrf.mxu1  ;;  %v6307_v43 = vpop.f32.mrf.mxu0 }
 0x4d2   :  { %v6309_v35 = vpop.f32.mrf.mxu1  ;;  %v6311_v39 = vpop.f32.mrf.mxu0 }
 0x4d3   :  { %6665 = vst [vmem:[#allocation12_spill] sm:$0xff] %v6309_v35 }
 0x4d4   :  { %v6313_v51 = vpop.f32.mrf.mxu1  ;;  %v6315_v13 = vpop.f32.mrf.mxu0 }
 0x4d5   :  { %6666 = vst [vmem:[#allocation9_spill] sm:$0xff] %v6313_v51  ;;  %v4570_v5 = vadd.f32 %v6315_v13, %v6311_v39  ;;  %v4506_v39 = vadd.f32 %v6283_v58, %v6281_v54  ;;  %v4512_v13 = vadd.f32 %v6293_v56, %v6289_v3 }
 0x4d6   :  { %v6317_v47 = vpop.f32.mrf.mxu1  ;;  %v6319_v31 = vpop.f32.mrf.mxu0 }
 0x4d7   :  { %6667 = vst [vmem:[#allocation10_spill] sm:$0xff] %v6317_v47  ;;  %v3583_v3 = vadd.f32 %v4570_v5, %v4506_v39 }
 0x4d8   :  { %v6324_v59 = vpop.f32.mrf.mxu1  ;;  %v6326_v33 = vpop.f32.mrf.mxu0 }
 0x4d9   :  { %6668 = vst [vmem:[#allocation13_spill] sm:$0xff] %v6324_v59  ;;  %v4573_v56 = vadd.f32 %v6326_v33, %v6319_v31 }
 0x4da   :  { %v6331_v1 = vpop.f32.mrf.mxu1  ;;  %v6333_v45 = vpop.f32.mrf.mxu0 }
 0x4db   :  { %6669 = vst [vmem:[#allocation14_spill] sm:$0xff] %v6331_v1  ;;  %v6347_v1 = vld [vmem:[%s6631_s9] ss:$0 sm:$0xff] }
 0x4dc   :  { %v6339_v44 = vpop.f32.mrf.mxu1  ;;  %v6341_v57 = vpop.f32.mrf.mxu0  ;;  %v6355_v16 = vadd.f32 %v6347_v1, %v3719_v30  ;;  %v6365_v51 = vadd.f32 %v6347_v1, %v3721_v23  ;;  %v6377_v14 = vadd.f32 %v6347_v1, %v3720_v18  ;;  %v3725_v23 = vmul.f32 %v3717_v22, %v5578_v55 }
 0x4dd   :  { %6670 = vst [vmem:[#allocation15_spill] sm:$0xff] %v6339_v44  ;;  %v3715_v44 = vld [vmem:[%s6630_s8 + $0x20] sm:$0xff]  ;;  %v6392_v19 = vadd.f32 %v6347_v1, %v3722_v50  ;;  %v4567_v22 = vadd.f32 %v6307_v43, %v6303_v25  ;;  %v3567_v50 = vadd.f32 %v4558_v17, %v4494_v28  ;;  %v3726_v25 = vmul.f32 %v3718_v26, %v5578_v55 }
 0x4de   :  { %v6352_v63 = vpop.f32.mrf.mxu0  ;;  %v4658_v27 = vpop.f32.mrf.mxu1  ;;  %v3723_v59 = vmul.f32 %v3715_v44, %v5578_v55  ;;  %v4515_v26 = vadd.f32 %v6299_v21, %v6297_v61  ;;  %v6671_v10 = vld [vmem:[#allocation10_spill] sm:$0xff] }
 0x4df   :  { %v3656_v0 = vadd.f32 %v4658_v27, %v3559_v60  ;;  %v6409_v60 = vadd.f32 %v6347_v1, %v3725_v23 }
 0x4e0   :  { %v6367_v35 = vpop.f32.mrf.mxu0  ;;  %v3647_v30 = vpop.f32.mrf.mxu1  ;;  %v6419_v46 = vadd.f32 %v6347_v1, %v3723_v59 }
 0x4e1   :  { %v3648_v62 = vadd.f32 %v3647_v30, %v3551_v4  ;;  %v6397_v38 = vadd.f32 %v6365_v51, %v3656_v0  ;;  %v3724_v4 = vmul.f32 %v3716_v53, %v5578_v55  ;;  %v4576_v55 = vadd.f32 %v6341_v57, %v6333_v45 }
 0x4e2   :  { %v6374_v7 = vpop.f32.mrf.mxu0  ;;  %v4659_v29 = vpop.f32.mrf.mxu1  ;;  %v6453_v53 = vadd.f32 %v6347_v1, %v3726_v25  ;;  %v4579_v54 = vadd.f32 %v6367_v35, %v6352_v63 }
 0x4e3   :  { %v6382_v47 = vadd.f32 %v6355_v16, %v3648_v62  ;;  %v3659_v27 = vadd.f32 %v4659_v29, %v3562_v15  ;;  %v3759_v59 = vmul.f32 %v6397_v38, %v6397_v38  ;;  %v6436_v23 = vadd.f32 %v6347_v1, %v3724_v4 }
 0x4e4   :  { %v6394_v44 = vpop.f32.mrf.mxu0  ;;  %v3650_v32 = vpop.f32.mrf.mxu1  ;;  %v3578_v15 = vadd.f32 %v4567_v22, %v4503_v48  ;;  %v6672_v48 = vld [vmem:[#allocation13_spill] sm:$0xff]  ;;  %v6676_v39 = vld [vmem:[#allocation15_spill] sm:$0xff] }
 0x4e5   :  { %v3651_v18 = vadd.f32 %v3650_v32, %v3554_v11  ;;  %v3757_v49 = vmul.f32 %v6382_v47, %v6382_v47  ;;  %v6427_v43 = vadd.f32 %v6392_v19, %v3659_v27  ;;  %v4582_v4 = vadd.f32 %v6394_v44, %v6374_v7 }
 0x4e6   :  { %v6406_v12 = vpop.f32.mrf.mxu0  ;;  %v4662_v37 = vpop.f32.mrf.mxu1 }
 0x4e7   :  { %v6415_v30 = vadd.f32 %v6377_v14, %v3651_v18  ;;  %3789 = vrot.lane.b32.xlu0 %v3757_v49, %s4903_s1  ;;  %v3672_v42 = vadd.f32 %v4662_v37, %v3575_v8  ;;  %v3760_v32 = vmul.f32 %v6427_v43, %v6427_v43  ;;  %v3591_v18 = vadd.f32 %v4576_v55, %v4512_v13 }
 0x4e8   :  { %v4584_v0 = vpop.f32.mrf.mxu0  ;;  %v3663_v62 = vpop.f32.mrf.mxu1  ;;  %v4509_v49 = vadd.f32 %v6287_v36, %v6285_v2  ;;  %v3594_v2 = vadd.f32 %v4579_v54, %v4515_v26 }
 0x4e9   :  { %v3664_v20 = vadd.f32 %v3663_v62, %v3567_v50  ;;  %v3758_v29 = vmul.f32 %v6415_v30, %v6415_v30  ;;  %v6450_v11 = vadd.f32 %v6409_v60, %v3672_v42  ;;  %v4518_v50 = vadd.f32 %v6305_v41, %v6301_v40 }
 0x4ea   :  { %v4586_v6 = vpop.f32.mrf.mxu0  ;;  %v4663_v52 = vpop.f32.mrf.mxu1  ;;  %v3586_v21 = vadd.f32 %v4573_v56, %v4509_v49  ;;  %v4524_v42 = vadd.f32 %v6672_v48, %v6671_v10 }
 0x4eb   :  { %v6441_v17 = vadd.f32 %v6419_v46, %v3664_v20  ;;  %3791 = vrot.lane.b32.xlu1 %v3758_v29, %s4903_s1  ;;  %3793 = vrot.lane.b32.xlu0 %v3759_v59, %s4903_s1  ;;  %v3675_v28 = vadd.f32 %v4663_v52, %v3578_v15  ;;  %v3763_v9 = vmul.f32 %v6450_v11, %v6450_v11  ;;  %v6675_v15 = vld [vmem:[#allocation14_spill] sm:$0xff] }
 0x4ec   :  { %v4587_v45 = vpop.f32.mrf.mxu0  ;;  %v3666_v57 = vpop.f32.mrf.mxu1  ;;  %v4585_v59 = vadd.f32 %v4584_v0, %v6406_v12  ;;  %v3599_v40 = vadd.f32 %v4582_v4, %v4518_v50  ;;  %v4527_v13 = vadd.f32 %v6676_v39, %v6675_v15 }
 0x4ed   :  { %v3667_v24 = vadd.f32 %v3666_v57, %v3570_v34  ;;  %v3761_v27 = vmul.f32 %v6441_v17, %v6441_v17  ;;  %v6475_v31 = vadd.f32 %v6453_v53, %v3675_v28  ;;  %v4588_v22 = vadd.f32 %v4587_v45, %v4586_v6  ;;  %v6674_v34 = vld [vmem:[#allocation9_spill] sm:$0xff] }
 0x4ee   :  { %v4666_v58 = vpop.f32.mrf.mxu1  ;;  %v4589_v35 = vpop.f32.mrf.mxu0 }
 0x4ef   :  { %v6464_v1 = vadd.f32 %v6436_v23, %v3667_v24  ;;  %3795 = vrot.lane.b32.xlu1 %v3760_v32, %s4903_s1  ;;  %3797 = vrot.lane.b32.xlu0 %v3761_v27, %s4903_s1  ;;  %v3688_v33 = vadd.f32 %v4666_v58, %v3591_v18  ;;  %v3607_v52 = vadd.f32 %v4588_v22, %v4524_v42 }
 0x4f0   :  { %v3679_v63 = vpop.f32.mrf.mxu1  ;;  %v4590_v62 = vpop.f32.mrf.mxu0 }
 0x4f1   :  { %v3680_v8 = vadd.f32 %v3679_v63, %v3583_v3  ;;  %v3762_v37 = vmul.f32 %v6464_v1, %v6464_v1  ;;  %v6491_v44 = vadd.f32 %v6365_v51, %v3688_v33  ;;  %v4591_v41 = vadd.f32 %v4590_v62, %v4589_v35  ;;  %v6673_v51 = vld [vmem:[#allocation12_spill] sm:$0xff] }
 0x4f2   :  { %v4667_v36 = vpop.f32.mrf.mxu1  ;;  %v4521_v55 = vadd.f32 %v6674_v34, %v6673_v51 }
 0x4f3   :  { %v6482_v61 = vadd.f32 %v6355_v16, %v3680_v8  ;;  %3799 = vrot.lane.b32.xlu1 %v3762_v37, %s4903_s1  ;;  %3801 = vrot.lane.b32.xlu0 %v3763_v9, %s4903_s1  ;;  %v3691_v25 = vadd.f32 %v4667_v36, %v3594_v2  ;;  %v3764_v16 = vmul.f32 %v6475_v31, %v6475_v31 }
 0x4f4   :  { %v3682_v7 = vpop.f32.mrf.mxu1  ;;  %v3767_v28 = vmul.f32 %v6491_v44, %v6491_v44  ;;  %v3610_v27 = vadd.f32 %v4591_v41, %v4527_v13 }
 0x4f5   :  { %v3683_v20 = vadd.f32 %v3682_v7, %v3586_v21  ;;  %v3765_v29 = vmul.f32 %v6482_v61, %v6482_v61  ;;  %v6508_v45 = vadd.f32 %v6392_v19, %v3691_v25  ;;  %v3602_v19 = vadd.f32 %v4585_v59, %v4521_v55 }
 0x4f6   :  { %v4670_v5 = vpop.f32.mrf.mxu1 }
 0x4f7   :  { %v6499_v6 = vadd.f32 %v6377_v14, %v3683_v20  ;;  %3803 = vrot.lane.b32.xlu1 %v3764_v16, %s4903_s1  ;;  %3805 = vrot.lane.b32.xlu0 %v3765_v29, %s4903_s1  ;;  %v3704_v0 = vadd.f32 %v4670_v5, %v3607_v52  ;;  %v3768_v58 = vmul.f32 %v6508_v45, %v6508_v45 }
 0x4f8   :  { %v3695_v12 = vpop.f32.mrf.mxu1 }
 0x4f9   :  { %v3696_v57 = vadd.f32 %v3695_v12, %v3599_v40  ;;  %v3766_v14 = vmul.f32 %v6499_v6, %v6499_v6  ;;  %v6522_v3 = vadd.f32 %v6409_v60, %v3704_v0 }
 0x4fa   :  { %v4671_v24 = vpop.f32.mrf.mxu1 }
 0x4fb   :  { %v6515_v32 = vadd.f32 %v6419_v46, %v3696_v57  ;;  %3807 = vrot.lane.b32.xlu1 %v3766_v14, %s4903_s1  ;;  %3809 = vrot.lane.b32.xlu0 %v3767_v28, %s4903_s1  ;;  %v3707_v56 = vadd.f32 %v4671_v24, %v3610_v27  ;;  %v3771_v60 = vmul.f32 %v6522_v3, %v6522_v3 }
 0x4fc   :  { %v3698_v54 = vpop.f32.mrf.mxu1 }
 0x4fd   :  { %v3699_v18 = vadd.f32 %v3698_v54, %v3602_v19  ;;  %v3769_v49 = vmul.f32 %v6515_v32, %v6515_v32  ;;  %v6532_v26 = vadd.f32 %v6453_v53, %v3707_v56 }
 0x4ff   :  { %v6527_v46 = vadd.f32 %v6436_v23, %v3699_v18  ;;  %3811 = vrot.lane.b32.xlu1 %v3768_v58, %s4903_s1  ;;  %3813 = vrot.lane.b32.xlu0 %v3769_v49, %s4903_s1  ;;  %v3772_v23 = vmul.f32 %v6532_v26, %v6532_v26 }
 0x501   :  { %v3770_v35 = vmul.f32 %v6527_v46, %v6527_v46 }
 0x503   :  { %3815 = vrot.lane.b32.xlu1 %v3770_v35, %s4903_s1  ;;  %3817 = vrot.lane.b32.xlu0 %v3771_v60, %s4903_s1 }
 0x507   :  { %3819 = vrot.lane.b32.xlu1 %v3772_v23, %s4903_s1 }
 0x559   :  { %v3790_v63 = vpop.permute.xlu0 %3789 }
 0x55a   :  { %v3837_v53 = vsel %vm45_vm0, %v6382_v47, %v3790_v63 }
 0x55d   :  { %v3792_v9 = vpop.permute.xlu1 %3791  ;;  %v3794_v33 = vpop.permute.xlu0 %3793 }
 0x55e   :  { %v3838_v8 = vsel %vm45_vm0, %v6415_v30, %v3792_v9  ;;  %v3839_v4 = vsel %vm45_vm0, %v6397_v38, %v3794_v33 }
 0x55f   :  { %v3853_v37 = vadd.f32 %v3838_v8, %v3837_v53 }
 0x561   :  { %v3854_v2 = vadd.f32 %v3853_v37, %v3839_v4  ;;  %v3796_v36 = vpop.permute.xlu1 %3795  ;;  %v3798_v22 = vpop.permute.xlu0 %3797 }
 0x562   :  { %v3840_v21 = vsel %vm45_vm0, %v6427_v43, %v3796_v36  ;;  %v3841_v10 = vsel %vm45_vm0, %v6441_v17, %v3798_v22 }
 0x563   :  { %v3855_v50 = vadd.f32 %v3854_v2, %v3840_v21 }
 0x565   :  { %v3856_v48 = vadd.f32 %v3855_v50, %v3841_v10  ;;  %v3800_v42 = vpop.permute.xlu1 %3799  ;;  %v3802_v62 = vpop.permute.xlu0 %3801  ;;  %v6677_v50 = vld [vmem:[#allocation8_spill] sm:$0xff] }
 0x566   :  { %v3842_v25 = vsel %vm45_vm0, %v6464_v1, %v3800_v42  ;;  %v3843_v20 = vsel %vm45_vm0, %v6450_v11, %v3802_v62  ;;  %v3881_v42 = vld [vmem:[%s6632_s10] sm:$0x1]  ;;  %s4905_s10 = smov [#allocation5]  }
 0x567   :  { %v3857_v7 = vadd.f32 %v3856_v48, %v3842_v25 }
 0x569   :  { %v3858_v16 = vadd.f32 %v3857_v7, %v3843_v20  ;;  %v3804_v29 = vpop.permute.xlu1 %3803  ;;  %v3806_v59 = vpop.permute.xlu0 %3805  ;;  %v3903_v7 = vld [vmem:[%s6633_s11] sm:$0x1]  ;;  %s3987_s11 = sshll.u32 %s4905_s10, 4  ;;  %s3988_s11 = int_to_ptr.vmem [resolvable:$true] %s3987_s11 }
 0x56a   :  { %v3844_v5 = vsel %vm45_vm0, %v6475_v31, %v3804_v29  ;;  %v3845_v41 = vsel %vm45_vm0, %v6482_v61, %v3806_v59  ;;  %p4885_p1 = scmp.lt.s32.totalorder %s3988_s11, %s3988_s11 }
 0x56b   :  { %v3859_v40 = vadd.f32 %v3858_v16, %v3844_v5  ;;  %v6678_v16 = vld [vmem:[#allocation11_spill] sm:$0xff] }
 0x56d   :  { %v3860_v52 = vadd.f32 %v3859_v40, %v3845_v41  ;;  %v3808_v51 = vpop.permute.xlu1 %3807  ;;  %v3810_v34 = vpop.permute.xlu0 %3809 }
 0x56e   :  { %v3846_v55 = vsel %vm45_vm0, %v6499_v6, %v3808_v51  ;;  %v3847_v39 = vsel %vm45_vm0, %v6491_v44, %v3810_v34 }
 0x56f   :  { %v3861_v15 = vadd.f32 %v3860_v52, %v3846_v55 }
 0x571   :  { %v3862_v13 = vadd.f32 %v3861_v15, %v3847_v39  ;;  %v3812_v12 = vpop.permute.xlu1 %3811  ;;  %v3814_v0 = vpop.permute.xlu0 %3813 }
 0x572   :  { %v3848_v57 = vsel %vm45_vm0, %v6508_v45, %v3812_v12  ;;  %v3849_v28 = vsel %vm45_vm0, %v6515_v32, %v3814_v0 }
 0x573   :  { %v3863_v14 = vadd.f32 %v3862_v13, %v3848_v57 }
 0x575   :  { %v3864_v24 = vadd.f32 %v3863_v14, %v3849_v28  ;;  %v3816_v27 = vpop.permute.xlu1 %3815  ;;  %v3818_v19 = vpop.permute.xlu0 %3817 }
 0x576   :  { %v3850_v54 = vsel %vm45_vm0, %v6527_v46, %v3816_v27  ;;  %v3851_v56 = vsel %vm45_vm0, %v6522_v3, %v3818_v19 }
 0x577   :  { %v3865_v58 = vadd.f32 %v3864_v24, %v3850_v54 }
 0x579   :  { %v3866_v18 = vadd.f32 %v3865_v58, %v3851_v56  ;;  %v3820_v49 = vpop.permute.xlu1 %3819 }
 0x57a   :  { %v3852_v35 = vsel %vm45_vm0, %v6532_v26, %v3820_v49 }
 0x57b   :  { %v3867_v60 = vadd.f32 %v3866_v18, %v3852_v35 }
 0x57d   :  { %v3868_v23 = vrot.slane %v3867_v60, 4 }
 0x57f   :  { %v3869_v63 = vadd.f32 %v3868_v23, %v3867_v60 }
 0x581   :  { %v3870_v9 = vrot.slane %v3869_v63, 2 }
 0x583   :  { %v3871_v33 = vadd.f32 %v3870_v9, %v3869_v63 }
 0x585   :  { %v3872_v53 = vrot.slane %v3871_v33, 1 }
 0x587   :  { %v3873_v8 = vadd.f32 %v3872_v53, %v3871_v33 }
 0x589   :  { %v3874_v37 = vmul.f32 0.0078125, %v3873_v8 }
 0x58b   :  { %v3875_v4 = vmul.f32 %v3874_v37, %v3874_v37 }
 0x58d   :  { %3877 = vrot.lane.b32.xlu0 %v3875_v4, %s4903_s1 }
 0x5ff   :  { %v3878_v2 = vpop.permute.xlu0 %3877 }
 0x600   :  { %v3880_v36 = vsub.f32 %v3874_v37, %v3878_v2 }
 0x602   :  { %v3882_v22 = vadd.f32 1e-05, %v3880_v36 }
 0x604   :  { %4871 = vrsqrt.f32 %v3882_v22 }
 0x611   :  { %v4872_v21 = vpop.eup %4871 }
 0x612   :  { %v3891_v10 = vrot.slane %v4872_v21, %v6677_v50 }
 0x614   :  { %v3898_v48 = vrot.slane %v3891_v10, %v6677_v50 }
 0x616   :  { %3899 = vrot.lane.b32.xlu1 %v3898_v48, %s4903_s1  ;;  %s4880_s1 = scalar_lea.vmem %s3988_s11, 2048 }
 0x617   :  { %p4881_p0 = scmp.ne.s32.totalorder %s3988_s11, %s4880_s1  ;;  %p4886_p2 = scmp.lt.s32.totalorder %s4880_s1, %s4880_s1 }
 0x619   :  { %p4887_p3 = por %p4886_p2, %p4885_p1 }
 0x61b   :  { %p4888_p4 = pnand %p4887_p3, %p4881_p0 }
 0x688   :  { %v3900_v62 = vpop.permute.xlu1 %3899 }
 0x689   :  { %v3902_v25 = vmul.f32 %v3900_v62, %v3881_v42 }
 0x68b   :  { %v3904_v20 = vmul.f32 %v3902_v25, %v3874_v37  ;;  %v3910_v29 = vrot.slane %v3902_v25, %v6678_v16 }
 0x68d   :  { %v3905_v59 = vsub.f32 %v3903_v7, %v3904_v20  ;;  %v3912_v5 = vmul.f32 %v3910_v29, %v6382_v47  ;;  %v3913_v40 = vmul.f32 %v3910_v29, %v6415_v30  ;;  %v3914_v41 = vmul.f32 %v3910_v29, %v6397_v38 }
 0x68e   :  { %v3915_v52 = vmul.f32 %v3910_v29, %v6427_v43  ;;  %v3916_v51 = vmul.f32 %v3910_v29, %v6441_v17  ;;  %v3917_v34 = vmul.f32 %v3910_v29, %v6464_v1  ;;  %v3918_v55 = vmul.f32 %v3910_v29, %v6450_v11 }
 0x68f   :  { %v3932_v15 = vrot.slane %v3905_v59, %v6678_v16  ;;  %v3919_v39 = vmul.f32 %v3910_v29, %v6475_v31  ;;  %v3920_v13 = vmul.f32 %v3910_v29, %v6482_v61  ;;  %v3921_v47 = vmul.f32 %v3910_v29, %v6499_v6 }
 0x690   :  { %v3922_v30 = vmul.f32 %v3910_v29, %v6491_v44  ;;  %v3923_v38 = vmul.f32 %v3910_v29, %v6508_v45  ;;  %v3924_v43 = vmul.f32 %v3910_v29, %v6515_v32  ;;  %v3925_v17 = vmul.f32 %v3910_v29, %v6527_v46 }
 0x691   :  { %v3926_v1 = vmul.f32 %v3910_v29, %v6522_v3  ;;  %v3927_v11 = vmul.f32 %v3910_v29, %v6532_v26  ;;  %v3934_v12 = vadd.f32 %v3932_v15, %v3912_v5  ;;  %v3935_v0 = vadd.f32 %v3932_v15, %v3913_v40 }
 0x692   :  { %v3936_v57 = vadd.f32 %v3932_v15, %v3914_v41  ;;  %v3937_v31 = vadd.f32 %v3932_v15, %v3915_v52  ;;  %v3938_v14 = vadd.f32 %v3932_v15, %v3916_v51  ;;  %v3939_v61 = vadd.f32 %v3932_v15, %v3917_v34 }
 0x693   :  { %v3940_v28 = vadd.f32 %v3932_v15, %v3918_v55  ;;  %v3941_v6 = vadd.f32 %v3932_v15, %v3919_v39  ;;  %v3942_v24 = vadd.f32 %v3932_v15, %v3920_v13  ;;  %v3943_v44 = vadd.f32 %v3932_v15, %v3921_v47 }
 0x694   :  { %v3944_v27 = vadd.f32 %v3932_v15, %v3922_v30  ;;  %v3945_v45 = vadd.f32 %v3932_v15, %v3923_v38  ;;  %v3946_v19 = vadd.f32 %v3932_v15, %v3924_v43  ;;  %v3947_v32 = vadd.f32 %v3932_v15, %v3925_v17 }
 0x695   :  { %v3948_v54 = vadd.f32 %v3932_v15, %v3926_v1  ;;  %v3949_v46 = vadd.f32 %v3932_v15, %v3927_v11  ;;  %v3950_v58 = vmax.f32 %v3934_v12, 0.0  ;;  %v3951_v3 = vmax.f32 %v3935_v0, 0.0 }
 0x696   :  { %v3952_v56 = vmax.f32 %v3936_v57, 0.0  ;;  %v3953_v26 = vmax.f32 %v3937_v31, 0.0  ;;  %v3954_v18 = vmax.f32 %v3938_v14, 0.0  ;;  %v3955_v49 = vmax.f32 %v3939_v61, 0.0 }
 0x697   :  { %v3956_v35 = vmax.f32 %v3940_v28, 0.0  ;;  %v3957_v60 = vmax.f32 %v3941_v6, 0.0  ;;  %v3958_v23 = vmax.f32 %v3942_v24, 0.0  ;;  %v3959_v63 = vmax.f32 %v3943_v44, 0.0  ;;  %3966 = vst.msk [vmem:[#allocation5] sm:$0xff] %vm45_vm0, %v3950_v58  ;;  %3967 = vst.msk [vmem:[#allocation5 + $0x8] sm:$0xff] %vm45_vm0, %v3951_v3 }
 0x698   :  { %v3960_v9 = vmax.f32 %v3944_v27, 0.0  ;;  %v3961_v33 = vmax.f32 %v3945_v45, 0.0  ;;  %v3962_v53 = vmax.f32 %v3946_v19, 0.0  ;;  %v3963_v8 = vmax.f32 %v3947_v32, 0.0  ;;  %3968 = vst.msk [vmem:[#allocation5 + $0x10] sm:$0xff] %vm45_vm0, %v3952_v56  ;;  %3969 = vst.msk [vmem:[#allocation5 + $0x18] sm:$0xff] %vm45_vm0, %v3953_v26 }
 0x699   :  { %3970 = vst.msk [vmem:[#allocation5 + $0x20] sm:$0xff] %vm45_vm0, %v3954_v18  ;;  %3971 = vst.msk [vmem:[#allocation5 + $0x28] sm:$0xff] %vm45_vm0, %v3955_v49  ;;  %v3964_v37 = vmax.f32 %v3948_v54, 0.0  ;;  %v3965_v4 = vmax.f32 %v3949_v46, 0.0 }
 0x69a   :  { %3972 = vst.msk [vmem:[#allocation5 + $0x30] sm:$0xff] %vm45_vm0, %v3956_v35  ;;  %3973 = vst.msk [vmem:[#allocation5 + $0x38] sm:$0xff] %vm45_vm0, %v3957_v60 }
 0x69b   :  { %3974 = vst.msk [vmem:[#allocation5 + $0x40] sm:$0xff] %vm45_vm0, %v3958_v23  ;;  %3975 = vst.msk [vmem:[#allocation5 + $0x48] sm:$0xff] %vm45_vm0, %v3959_v63 }
 0x69c   :  { %3976 = vst.msk [vmem:[#allocation5 + $0x50] sm:$0xff] %vm45_vm0, %v3960_v9  ;;  %3977 = vst.msk [vmem:[#allocation5 + $0x58] sm:$0xff] %vm45_vm0, %v3961_v33 }
 0x69d   :  { %3978 = vst.msk [vmem:[#allocation5 + $0x60] sm:$0xff] %vm45_vm0, %v3962_v53  ;;  %3979 = vst.msk [vmem:[#allocation5 + $0x68] sm:$0xff] %vm45_vm0, %v3963_v8 }
 0x69e   :  { %3980 = vst.msk [vmem:[#allocation5 + $0x70] sm:$0xff] %vm45_vm0, %v3964_v37  ;;  %3981 = vst.msk [vmem:[#allocation5 + $0x78] sm:$0xff] %vm45_vm0, %v3965_v4 }
 0x69f   :  { %4891 = shalt.err (!%p4888_p4)
}
 0x6a0   :  { %s4906_s13 = smov 128   ;;  %s4907_s5 = smov 8  }
 0x6a1   :  { %3993 = dma.vmem_to_hbm [thread:$0]  %s3988_s11, 2048, %s6634_s12, [#allocation6], %s4906_s13, %s4906_s13, %s4907_s5  }
 0x6a2   :  { %4900 = dma.done.wait [#allocation6], 2048  }
 0x6a3   :  { %4901 = vsyncadd [#allocation6], 4294965248 }
 0x6a4   :  { %3997 = vsyncpa [#allocation6], 1 }

</bundles_post_ra>
